<compile_context>
chip_gen: v5e
topology: v5e:2x2
jax: 0.10.0
libtpu: 0.0.40
codegen_flags: <defaults>
</compile_context>

<pallas_src>
import math

import numpy as np
import jax
import jax.numpy as jnp
from jax import lax
from jax.experimental import pallas as pl
from jax.experimental.pallas import tpu as pltpu  # noqa: F401  (imported per spec)

# ---------------------------------------------------------------------------
# Small, forward-consistent configuration
# ---------------------------------------------------------------------------
B            = 2          # batch
ENC_IN       = 4          # input channels of x_enc
D_MARK       = 4          # time-feature channels of x_mark_enc
INPUT_SIZE   = 16         # sequence length L
D_MODEL      = 32
WINDOW_SIZE  = [2, 2, 2]  # pyramid window sizes (list -> 3 conv layers)
INNER_SIZE   = 3
N_HEAD       = 2
D_K          = 16
D_V          = 16
D_INNER      = 64         # d_inner_hid of the FFN
D_BOTTLENECK = 16
N_LAYER      = 2
BN_EPS       = 1e-5
LN_EPS_CSCM  = 1e-5       # nn.LayerNorm default
LN_EPS_ATTN  = 1e-6       # LayerNorm(eps=1e-6) in attention / FFN sublayers

# kernel is specialized to the configured 3-level, window-2 pyramid
assert len(WINDOW_SIZE) == 3 and all(w == 2 for w in WINDOW_SIZE)
assert INPUT_SIZE % 8 == 0


# ---------------------------------------------------------------------------
# get_mask (PAM-Naive pyramidal attention mask), pure numpy, deterministic.
# Returns float32 "blocked" mask: 1.0 where attention is NOT allowed.
# ---------------------------------------------------------------------------
def get_mask(input_size, window_size, inner_size):
    all_size = [input_size]
    for w in window_size:
        all_size.append(all_size[-1] // w)
    seq_length = sum(all_size)
    mask = np.zeros((seq_length, seq_length), dtype=np.float32)

    inner_window = inner_size // 2
    for layer_idx in range(len(all_size)):
        start = sum(all_size[:layer_idx])
        for i in range(start, start + all_size[layer_idx]):
            left = max(i - inner_window, start)
            right = min(i + inner_window + 1, start + all_size[layer_idx])
            mask[i, left:right] = 1
    for layer_idx in range(1, len(all_size)):
        start = sum(all_size[:layer_idx])
        for i in range(start, start + all_size[layer_idx]):
            left = (start - all_size[layer_idx - 1]) + (i - start) * window_size[layer_idx - 1]
            if i == (start + all_size[layer_idx] - 1):
                right = start
            else:
                right = (start - all_size[layer_idx - 1]) + (i - start + 1) * window_size[layer_idx - 1]
            mask[i, left:right] = 1
            mask[left:right, i] = 1

    blocked = (1.0 - mask).astype(np.float32)   # torch: mask = (1 - mask).bool()
    return blocked, all_size


def make_pos_encoding(length, d_model):
    position = np.arange(length, dtype=np.float32)[:, None]
    div_term = np.exp(np.arange(0, d_model, 2, dtype=np.float32)
                      * -(math.log(10000.0) / d_model))
    pe = np.zeros((length, d_model), dtype=np.float32)
    pe[:, 0::2] = np.sin(position * div_term)
    pe[:, 1::2] = np.cos(position * div_term)
    return pe


# ---------------------------------------------------------------------------
# Derived layout constants: per-batch pyramid levels, padded to 8-row slabs so
# every in-kernel slice / placement is sublane-tile aligned.
# ---------------------------------------------------------------------------
_MASK30_BLOCKED, ALL_SIZE = get_mask(INPUT_SIZE, WINDOW_SIZE, INNER_SIZE)
N_LEVELS      = len(ALL_SIZE)                              # 4 (16, 8, 4, 2)
PAD_SIZES     = [((s + 7) // 8) * 8 for s in ALL_SIZE]     # [16, 8, 8, 8]
LEVEL_OFFSETS = [int(x) for x in np.cumsum([0] + PAD_SIZES[:-1])]   # [0,16,24,32]
N_PAD_PB      = int(sum(PAD_SIZES))                        # 40 padded rows per batch
BN_ROWS       = B * N_PAD_PB                               # 80 rows total
BL_ROWS       = B * INPUT_SIZE                             # 32 embedding rows


# ---------------------------------------------------------------------------
# Host-built constant matrices (consumed as tiny matmuls; MXU is otherwise idle)
# ---------------------------------------------------------------------------
def downsample_selectors(n_out):
    """0/1 matrices selecting even / odd rows for the stride-2 'conv' im2col."""
    se = np.zeros((n_out, 2 * n_out), np.float32)
    so = np.zeros((n_out, 2 * n_out), np.float32)
    r = np.arange(n_out)
    se[r, 2 * r] = 1.0
    so[r, 2 * r + 1] = 1.0
    return se, so


def placement_matrix(rows_per_batch, pad_offset):
    """Scatter a batch-major level (B*rows_per_batch rows) into the padded layout."""
    pmat = np.zeros((BN_ROWS, B * rows_per_batch), np.float32)
    for b in range(B):
        for t in range(rows_per_batch):
            pmat[b * N_PAD_PB + pad_offset + t, b * rows_per_batch + t] = 1.0
    return pmat


def build_mask_bias(blocked30):
    """Additive attention bias over the padded (B*40, B*40) layout.

    -1e9 where attention is disallowed (pyramid mask, cross-batch, padding
    columns); 0 elsewhere.  Padding *query* rows stay all-zero so their softmax
    is finite (their outputs are never read)."""
    neg = np.float32(-1e9)
    orig_to_pad = np.concatenate(
        [LEVEL_OFFSETS[k] + np.arange(ALL_SIZE[k]) for k in range(N_LEVELS)])
    bias = np.zeros((BN_ROWS, BN_ROWS), np.float32)
    add30 = np.where(blocked30 > 0, neg, np.float32(0.0)).astype(np.float32)
    for b in range(B):
        rows = b * N_PAD_PB + orig_to_pad
        bias[rows, :] = neg                      # block everything for real query rows
        bias[np.ix_(rows, rows)] = add30         # then open same-batch pyramid pattern
    return bias


# ---------------------------------------------------------------------------
# The single fused Pallas kernel (no grid: everything lives in VMEM)
# ---------------------------------------------------------------------------
def _fused_encoder_kernel(
    xcat_ref, xmark_ref, w_tok_ref, w_mark_ref, emb_bias_ref,
    w_down_ref, b_down_ref,
    conv_wa_ref, conv_wb_ref, conv_b_ref,
    se0_ref, so0_ref, se1_ref, so1_ref, se2_ref, so2_ref,
    w_up_ref, b_up_ref,
    p_seq_ref, p_lvl1_ref, p_lvl2_ref, p_lvl3_ref,
    lnc_g_ref, lnc_b_ref, mask_ref,
    qk_ref, wv_ref, wo_ref, bo_ref,
    ln1_g_ref, ln1_b_ref, w1_ref, b1_ref, w2_ref, b2_ref, ln2_g_ref, ln2_b_ref,
    o_ref,
):
    f32 = jnp.float32

    def layer_norm(x, g, b, eps):
        mu = jnp.mean(x, axis=-1, keepdims=True)
        xc = x - mu
        var = jnp.mean(xc * xc, axis=-1, keepdims=True)
        return xc * lax.rsqrt(var + eps) * g + b          # rsqrt -> EUP slot

    # --- DataEmbedding: circular conv1d(k=3) + temporal linear + positional ---
    seq = (jnp.dot(xcat_ref[...], w_tok_ref[...], preferred_element_type=f32)
           + jnp.dot(xmark_ref[...], w_mark_ref[...], preferred_element_type=f32)
           + emb_bias_ref[...])                            # (B*L, D_MODEL)

    # --- Bottleneck_Construct CSCM: down-linear, 3x (strided conv + BN + ELU) ---
    cur = jnp.dot(seq, w_down_ref[...], preferred_element_type=f32) + b_down_ref[...]
    sels = ((se0_ref, so0_ref), (se1_ref, so1_ref), (se2_ref, so2_ref))
    level_outs = []
    for i in range(3):
        ta = jnp.dot(cur, conv_wa_ref[i], preferred_element_type=f32)   # even-phase tap
        tb = jnp.dot(cur, conv_wb_ref[i], preferred_element_type=f32)   # odd-phase tap
        se_ref, so_ref = sels[i]
        y = (jnp.dot(se_ref[...], ta, preferred_element_type=f32)
             + jnp.dot(so_ref[...], tb, preferred_element_type=f32)
             + conv_b_ref[i])                              # conv bias + folded BatchNorm
        # TODO(synk): torch ELU uses expm1; exp(y)-1 kept for guaranteed Mosaic lowering.
        y = jnp.where(y > 0.0, y, jnp.exp(y) - 1.0)
        level_outs.append(y)
        cur = y

    # up-linear per level, then scatter fine + coarse levels into the padded
    # per-batch layout (pure 0/1-matrix matmuls; pad rows stay exactly zero)
    up = [jnp.dot(lvl, w_up_ref[...], preferred_element_type=f32) + b_up_ref[...]
          for lvl in level_outs]
    x = (jnp.dot(p_seq_ref[...], seq, preferred_element_type=f32)
         + jnp.dot(p_lvl1_ref[...], up[0], preferred_element_type=f32)
         + jnp.dot(p_lvl2_ref[...], up[1], preferred_element_type=f32)
         + jnp.dot(p_lvl3_ref[...], up[2], preferred_element_type=f32))   # (80, 32)
    x = layer_norm(x, lnc_g_ref[...], lnc_b_ref[...], LN_EPS_CSCM)

    mask_bias = mask_ref[...]                              # additive, -1e9 = blocked

    # --- stacked post-norm encoder layers (pyramidal masked attention + FFN) ---
    for l in range(N_LAYER):
        attn = jnp.zeros((BN_ROWS, D_MODEL), f32)
        for h in range(N_HEAD):
            idx = l * N_HEAD + h
            # score = (x Wq / temp) (x Wk)^T == x (Wq Wk^T / temp) x^T  (folded on host)
            t = jnp.dot(x, qk_ref[idx], preferred_element_type=f32)      # (80, 32)
            s = lax.dot_general(t, x, (((1,), (1,)), ((), ())),
                                preferred_element_type=f32) + mask_bias  # (80, 80)
            s = s - jnp.max(s, axis=-1, keepdims=True)
            p = jnp.exp(s)
            p = p * pl.reciprocal(jnp.sum(p, axis=-1, keepdims=True), approx=True)
            vh = jnp.dot(x, wv_ref[idx], preferred_element_type=f32)     # (80, D_V)
            oh = jnp.dot(p, vh, preferred_element_type=f32)              # (80, D_V)
            attn = attn + jnp.dot(oh, wo_ref[idx], preferred_element_type=f32)
        y = layer_norm(attn + bo_ref[l] + x, ln1_g_ref[l], ln1_b_ref[l], LN_EPS_ATTN)

        # Position-wise FFN (post-norm)
        h1 = jnp.dot(y, w1_ref[l], preferred_element_type=f32) + b1_ref[l]
        # TODO(synk): PyTorch F.gelu is exact-erf; tanh approximation used for Mosaic lowering.
        h1 = jax.nn.gelu(h1, approximate=True)
        h2 = jnp.dot(h1, w2_ref[l], preferred_element_type=f32) + b2_ref[l]
        x = layer_norm(h2 + y, ln2_g_ref[l], ln2_b_ref[l], LN_EPS_ATTN)

    # --- decoder_type == 'attention' + truncate: finest level of each batch ---
    for b in range(B):
        o_ref[b] = x[b * N_PAD_PB: b * N_PAD_PB + INPUT_SIZE, :]


# ---------------------------------------------------------------------------
# Wrapper: one pallas_call, whole arrays in VMEM (no grid, no BlockSpec tiling)
# ---------------------------------------------------------------------------
@jax.jit
def encoder_forward(x_enc, x_mark_enc, f):
    # circular-conv (k=3) im2col of the raw input — single XLA prep op feeding
    # the one fused kernel (no inter-kernel HBM bounces remain).
    xcat = jnp.concatenate([jnp.roll(x_enc, 1, axis=1), x_enc,
                            jnp.roll(x_enc, -1, axis=1)], axis=-1)
    xcat = xcat.reshape(BL_ROWS, 3 * ENC_IN)
    xmark = x_mark_enc.reshape(BL_ROWS, D_MARK)

    args = (xcat, xmark, f['w_tok'], f['w_mark'], f['emb_bias'],
            f['w_down'], f['b_down'],
            f['conv_wa'], f['conv_wb'], f['conv_b'],
            f['se0'], f['so0'], f['se1'], f['so1'], f['se2'], f['so2'],
            f['w_up'], f['b_up'],
            f['p_seq'], f['p_lvl1'], f['p_lvl2'], f['p_lvl3'],
            f['lnc_g'], f['lnc_b'], f['mask_bias'],
            f['qk_all'], f['wv_all'], f['wo_all'], f['bo_all'],
            f['ln1_g'], f['ln1_b'], f['w1_all'], f['b1_all'],
            f['w2_all'], f['b2_all'], f['ln2_g'], f['ln2_b'])

    return pl.pallas_call(
        _fused_encoder_kernel,
        out_shape=jax.ShapeDtypeStruct((B, INPUT_SIZE, D_MODEL), jnp.float32),
    )(*args)


# ---------------------------------------------------------------------------
# Parameters (deterministic, synthetic) in the module's own parameterization
# ---------------------------------------------------------------------------
def init_params(key):
    keys = jax.random.split(key, 16 + 16 * N_LAYER)
    it = iter(keys)

    def rnd(shape, scale=0.1):
        return (scale * jax.random.normal(next(it), shape)).astype(jnp.float32)

    p = {}
    # DataEmbedding
    p['w_tok'] = rnd((3 * ENC_IN, D_MODEL))           # circular conv1d k=3, bias=False
    p['w_mark'] = rnd((D_MARK, D_MODEL))              # TimeFeatureEmbedding Linear
    p['b_mark'] = rnd((1, D_MODEL))
    p['pos'] = jnp.asarray(make_pos_encoding(INPUT_SIZE, D_MODEL))
    # Bottleneck_Construct
    p['w_down'] = rnd((D_MODEL, D_BOTTLENECK))
    p['b_down'] = rnd((1, D_BOTTLENECK))
    convs = []
    for w in WINDOW_SIZE:
        convs.append(dict(
            w=rnd((w * D_BOTTLENECK, D_BOTTLENECK)),
            b=rnd((1, D_BOTTLENECK)),
            bn_g=jnp.ones((1, D_BOTTLENECK), jnp.float32),
            bn_b=jnp.zeros((1, D_BOTTLENECK), jnp.float32),
            bn_rm=jnp.zeros((1, D_BOTTLENECK), jnp.float32),
            bn_rv=jnp.ones((1, D_BOTTLENECK), jnp.float32),
        ))
    p['conv'] = convs
    p['w_up'] = rnd((D_BOTTLENECK, D_MODEL))
    p['b_up'] = rnd((1, D_MODEL))
    p['ln_g'] = jnp.ones((1, D_MODEL), jnp.float32)
    p['ln_b'] = jnp.zeros((1, D_MODEL), jnp.float32)
    # Encoder layers
    layers = []
    for _ in range(N_LAYER):
        layers.append(dict(
            wq=rnd((N_HEAD, D_MODEL, D_K)),
            wk=rnd((N_HEAD, D_MODEL, D_K)),
            wv=rnd((N_HEAD, D_MODEL, D_V)),
            wo=rnd((N_HEAD, D_V, D_MODEL)),
            bo=rnd((1, D_MODEL)),
            ln1_g=jnp.ones((1, D_MODEL), jnp.float32),
            ln1_b=jnp.zeros((1, D_MODEL), jnp.float32),
            w1=rnd((D_MODEL, D_INNER)),
            b1=rnd((1, D_INNER)),
            w2=rnd((D_INNER, D_MODEL)),
            b2=rnd((1, D_MODEL)),
            ln2_g=jnp.ones((1, D_MODEL), jnp.float32),
            ln2_b=jnp.zeros((1, D_MODEL), jnp.float32),
        ))
    p['layers'] = layers
    return p


def fold_params(p):
    """Eval-mode constant folding + stacking into kernel-ready arrays."""
    f = {}
    f['w_tok'] = p['w_tok']
    f['w_mark'] = p['w_mark']
    f['emb_bias'] = jnp.tile(p['pos'], (B, 1)) + p['b_mark']          # (B*L, D)
    f['w_down'] = p['w_down']
    f['b_down'] = p['b_down']

    conv_wa, conv_wb, conv_b = [], [], []
    for i, _w in enumerate(WINDOW_SIZE):
        cp = p['conv'][i]
        scale = cp['bn_g'] / jnp.sqrt(cp['bn_rv'] + BN_EPS)           # BN(eval) folding
        w_eff = cp['w'] * scale                                       # (2*DB, DB)
        b_eff = (cp['b'] - cp['bn_rm']) * scale + cp['bn_b']          # (1, DB)
        conv_wa.append(w_eff[:D_BOTTLENECK])
        conv_wb.append(w_eff[D_BOTTLENECK:])
        conv_b.append(b_eff)
    f['conv_wa'] = jnp.stack(conv_wa)
    f['conv_wb'] = jnp.stack(conv_wb)
    f['conv_b'] = jnp.stack(conv_b)

    f['w_up'] = p['w_up']
    f['b_up'] = p['b_up']
    f['lnc_g'] = p['ln_g']
    f['lnc_b'] = p['ln_b']

    # constant gather/scatter matrices + additive mask
    se0, so0 = downsample_selectors(B * ALL_SIZE[1])
    se1, so1 = downsample_selectors(B * ALL_SIZE[2])
    se2, so2 = downsample_selectors(B * ALL_SIZE[3])
    f['se0'], f['so0'] = jnp.asarray(se0), jnp.asarray(so0)
    f['se1'], f['so1'] = jnp.asarray(se1), jnp.asarray(so1)
    f['se2'], f['so2'] = jnp.asarray(se2), jnp.asarray(so2)
    f['p_seq'] = jnp.asarray(placement_matrix(ALL_SIZE[0], LEVEL_OFFSETS[0]))
    f['p_lvl1'] = jnp.asarray(placement_matrix(ALL_SIZE[1], LEVEL_OFFSETS[1]))
    f['p_lvl2'] = jnp.asarray(placement_matrix(ALL_SIZE[2], LEVEL_OFFSETS[2]))
    f['p_lvl3'] = jnp.asarray(placement_matrix(ALL_SIZE[3], LEVEL_OFFSETS[3]))
    f['mask_bias'] = jnp.asarray(build_mask_bias(_MASK30_BLOCKED))

    # attention: fold 1/temperature and Wq @ Wk^T into one per-head score matrix
    temperature = float(D_K) ** 0.5
    qk, wv, wo = [], [], []
    bo, l1g, l1b, w1, b1, w2, b2, l2g, l2b = ([] for _ in range(9))
    for lp in p['layers']:
        for h in range(N_HEAD):
            qk.append(jnp.dot(lp['wq'][h], lp['wk'][h].T) / temperature)
            wv.append(lp['wv'][h])
            wo.append(lp['wo'][h])
        bo.append(lp['bo'])
        l1g.append(lp['ln1_g']); l1b.append(lp['ln1_b'])
        w1.append(lp['w1']);     b1.append(lp['b1'])
        w2.append(lp['w2']);     b2.append(lp['b2'])
        l2g.append(lp['ln2_g']); l2b.append(lp['ln2_b'])
    f['qk_all'] = jnp.stack(qk)          # (N_LAYER*N_HEAD, D, D)
    f['wv_all'] = jnp.stack(wv)          # (N_LAYER*N_HEAD, D, D_V)
    f['wo_all'] = jnp.stack(wo)          # (N_LAYER*N_HEAD, D_V, D)
    f['bo_all'] = jnp.stack(bo)          # (N_LAYER, 1, D)
    f['ln1_g'] = jnp.stack(l1g); f['ln1_b'] = jnp.stack(l1b)
    f['w1_all'] = jnp.stack(w1); f['b1_all'] = jnp.stack(b1)
    f['w2_all'] = jnp.stack(w2); f['b2_all'] = jnp.stack(b2)
    f['ln2_g'] = jnp.stack(l2g); f['ln2_b'] = jnp.stack(l2b)
    return f


# ---------------------------------------------------------------------------
if __name__ == "__main__":
    key = jax.random.PRNGKey(0)
    k_in, k_mark, k_par = jax.random.split(key, 3)

    x_enc = jax.random.normal(k_in, (B, INPUT_SIZE, ENC_IN), dtype=jnp.float32)
    x_mark_enc = jax.random.normal(k_mark, (B, INPUT_SIZE, D_MARK), dtype=jnp.float32)

    params = init_params(k_par)
    folded = fold_params(params)

    out = encoder_forward(x_enc, x_mark_enc, folded)
    out = jax.block_until_ready(out)

    assert out.shape == (B, INPUT_SIZE, D_MODEL), out.shape
    assert bool(jnp.all(jnp.isfinite(out)))
    print("KERNEL_OK")
</pallas_src>

<mosaic_0001>
module attributes {stable_mosaic.version = 11 : i64} {
  func.func @_fused_encoder_kernel(%arg0: memref<32x12xf32, #tpu.memory_space<vmem>>, %arg1: memref<32x4xf32, #tpu.memory_space<vmem>>, %arg2: memref<12x32xf32, #tpu.memory_space<vmem>>, %arg3: memref<4x32xf32, #tpu.memory_space<vmem>>, %arg4: memref<32x32xf32, #tpu.memory_space<vmem>>, %arg5: memref<32x16xf32, #tpu.memory_space<vmem>>, %arg6: memref<1x16xf32, #tpu.memory_space<vmem>>, %arg7: memref<3x16x16xf32, #tpu.memory_space<vmem>>, %arg8: memref<3x16x16xf32, #tpu.memory_space<vmem>>, %arg9: memref<3x1x16xf32, #tpu.memory_space<vmem>>, %arg10: memref<16x32xf32, #tpu.memory_space<vmem>>, %arg11: memref<16x32xf32, #tpu.memory_space<vmem>>, %arg12: memref<8x16xf32, #tpu.memory_space<vmem>>, %arg13: memref<8x16xf32, #tpu.memory_space<vmem>>, %arg14: memref<4x8xf32, #tpu.memory_space<vmem>>, %arg15: memref<4x8xf32, #tpu.memory_space<vmem>>, %arg16: memref<16x32xf32, #tpu.memory_space<vmem>>, %arg17: memref<1x32xf32, #tpu.memory_space<vmem>>, %arg18: memref<80x32xf32, #tpu.memory_space<vmem>>, %arg19: memref<80x16xf32, #tpu.memory_space<vmem>>, %arg20: memref<80x8xf32, #tpu.memory_space<vmem>>, %arg21: memref<80x4xf32, #tpu.memory_space<vmem>>, %arg22: memref<1x32xf32, #tpu.memory_space<vmem>>, %arg23: memref<1x32xf32, #tpu.memory_space<vmem>>, %arg24: memref<80x80xf32, #tpu.memory_space<vmem>>, %arg25: memref<4x32x32xf32, #tpu.memory_space<vmem>>, %arg26: memref<4x32x16xf32, #tpu.memory_space<vmem>>, %arg27: memref<4x16x32xf32, #tpu.memory_space<vmem>>, %arg28: memref<2x1x32xf32, #tpu.memory_space<vmem>>, %arg29: memref<2x1x32xf32, #tpu.memory_space<vmem>>, %arg30: memref<2x1x32xf32, #tpu.memory_space<vmem>>, %arg31: memref<2x32x64xf32, #tpu.memory_space<vmem>>, %arg32: memref<2x1x64xf32, #tpu.memory_space<vmem>>, %arg33: memref<2x64x32xf32, #tpu.memory_space<vmem>>, %arg34: memref<2x1x32xf32, #tpu.memory_space<vmem>>, %arg35: memref<2x1x32xf32, #tpu.memory_space<vmem>>, %arg36: memref<2x1x32xf32, #tpu.memory_space<vmem>>, %arg37: memref<2x16x32xf32, #tpu.memory_space<vmem>>) attributes {dimension_semantics = [], scalar_prefetch = 0 : i64, scratch_operands = 0 : i64, tpu.core_type = #tpu.core_type<tc>} {
    %c0 = arith.constant 0 : index
    %c0_0 = arith.constant 0 : index
    %0 = vector.load %arg0[%c0, %c0_0] : memref<32x12xf32, #tpu.memory_space<vmem>>, vector<32x12xf32>
    %c0_1 = arith.constant 0 : index
    %c0_2 = arith.constant 0 : index
    %1 = vector.load %arg2[%c0_1, %c0_2] : memref<12x32xf32, #tpu.memory_space<vmem>>, vector<12x32xf32>
    %cst = arith.constant dense<0.000000e+00> : vector<32x32xf32>
    %2 = tpu.matmul %0, %1, %cst {dimension_numbers = #tpu.dot_dimension_numbers<[1], [0], [0], [1], [0, 0, 1, 1], [], []>} : vector<32x12xf32>, vector<12x32xf32>, vector<32x32xf32> -> vector<32x32xf32>
    %c0_3 = arith.constant 0 : index
    %c0_4 = arith.constant 0 : index
    %3 = vector.load %arg1[%c0_3, %c0_4] : memref<32x4xf32, #tpu.memory_space<vmem>>, vector<32x4xf32>
    %c0_5 = arith.constant 0 : index
    %c0_6 = arith.constant 0 : index
    %4 = vector.load %arg3[%c0_5, %c0_6] : memref<4x32xf32, #tpu.memory_space<vmem>>, vector<4x32xf32>
    %cst_7 = arith.constant dense<0.000000e+00> : vector<32x32xf32>
    %5 = tpu.matmul %3, %4, %cst_7 {dimension_numbers = #tpu.dot_dimension_numbers<[1], [0], [0], [1], [0, 0, 1, 1], [], []>} : vector<32x4xf32>, vector<4x32xf32>, vector<32x32xf32> -> vector<32x32xf32>
    %6 = arith.addf %2, %5 : vector<32x32xf32>
    %c0_8 = arith.constant 0 : index
    %c0_9 = arith.constant 0 : index
    %7 = vector.load %arg4[%c0_8, %c0_9] : memref<32x32xf32, #tpu.memory_space<vmem>>, vector<32x32xf32>
    %8 = arith.addf %6, %7 : vector<32x32xf32>
    %c0_10 = arith.constant 0 : index
    %c0_11 = arith.constant 0 : index
    %9 = vector.load %arg5[%c0_10, %c0_11] : memref<32x16xf32, #tpu.memory_space<vmem>>, vector<32x16xf32>
    %cst_12 = arith.constant dense<0.000000e+00> : vector<32x16xf32>
    %10 = tpu.matmul %8, %9, %cst_12 {dimension_numbers = #tpu.dot_dimension_numbers<[1], [0], [0], [1], [0, 0, 1, 1], [], []>} : vector<32x32xf32>, vector<32x16xf32>, vector<32x16xf32> -> vector<32x16xf32>
    %c0_13 = arith.constant 0 : index
    %c0_14 = arith.constant 0 : index
    %11 = vector.load %arg6[%c0_13, %c0_14] : memref<1x16xf32, #tpu.memory_space<vmem>>, vector<1x16xf32>
    %12 = vector.broadcast %11 : vector<1x16xf32> to vector<32x16xf32>
    %13 = arith.addf %10, %12 : vector<32x16xf32>
    %c0_15 = arith.constant 0 : index
    %c0_16 = arith.constant 0 : index
    %c0_17 = arith.constant 0 : index
    %14 = vector.load %arg7[%c0_15, %c0_16, %c0_17] : memref<3x16x16xf32, #tpu.memory_space<vmem>>, vector<1x16x16xf32>
    %15 = vector.shape_cast %14 : vector<1x16x16xf32> to vector<16x16xf32>
    %cst_18 = arith.constant dense<0.000000e+00> : vector<32x16xf32>
    %16 = tpu.matmul %13, %15, %cst_18 {dimension_numbers = #tpu.dot_dimension_numbers<[1], [0], [0], [1], [0, 0, 1, 1], [], []>} : vector<32x16xf32>, vector<16x16xf32>, vector<32x16xf32> -> vector<32x16xf32>
    %c0_19 = arith.constant 0 : index
    %c0_20 = arith.constant 0 : index
    %c0_21 = arith.constant 0 : index
    %17 = vector.load %arg8[%c0_19, %c0_20, %c0_21] : memref<3x16x16xf32, #tpu.memory_space<vmem>>, vector<1x16x16xf32>
    %18 = vector.shape_cast %17 : vector<1x16x16xf32> to vector<16x16xf32>
    %cst_22 = arith.constant dense<0.000000e+00> : vector<32x16xf32>
    %19 = tpu.matmul %13, %18, %cst_22 {dimension_numbers = #tpu.dot_dimension_numbers<[1], [0], [0], [1], [0, 0, 1, 1], [], []>} : vector<32x16xf32>, vector<16x16xf32>, vector<32x16xf32> -> vector<32x16xf32>
    %c0_23 = arith.constant 0 : index
    %c0_24 = arith.constant 0 : index
    %20 = vector.load %arg10[%c0_23, %c0_24] : memref<16x32xf32, #tpu.memory_space<vmem>>, vector<16x32xf32>
    %cst_25 = arith.constant dense<0.000000e+00> : vector<16x16xf32>
    %21 = tpu.matmul %20, %16, %cst_25 {dimension_numbers = #tpu.dot_dimension_numbers<[1], [0], [0], [1], [0, 0, 1, 1], [], []>} : vector<16x32xf32>, vector<32x16xf32>, vector<16x16xf32> -> vector<16x16xf32>
    %c0_26 = arith.constant 0 : index
    %c0_27 = arith.constant 0 : index
    %22 = vector.load %arg11[%c0_26, %c0_27] : memref<16x32xf32, #tpu.memory_space<vmem>>, vector<16x32xf32>
    %cst_28 = arith.constant dense<0.000000e+00> : vector<16x16xf32>
    %23 = tpu.matmul %22, %19, %cst_28 {dimension_numbers = #tpu.dot_dimension_numbers<[1], [0], [0], [1], [0, 0, 1, 1], [], []>} : vector<16x32xf32>, vector<32x16xf32>, vector<16x16xf32> -> vector<16x16xf32>
    %24 = arith.addf %21, %23 : vector<16x16xf32>
    %c0_29 = arith.constant 0 : index
    %c0_30 = arith.constant 0 : index
    %c0_31 = arith.constant 0 : index
    %25 = vector.load %arg9[%c0_29, %c0_30, %c0_31] : memref<3x1x16xf32, #tpu.memory_space<vmem>>, vector<1x1x16xf32>
    %26 = vector.shape_cast %25 : vector<1x1x16xf32> to vector<1x16xf32>
    %27 = vector.broadcast %26 : vector<1x16xf32> to vector<16x16xf32>
    %28 = arith.addf %24, %27 : vector<16x16xf32>
    %cst_32 = arith.constant 0.000000e+00 : f32
    %29 = vector.broadcast %cst_32 : f32 to vector<16x16xf32>
    %30 = arith.cmpf ogt, %28, %29 : vector<16x16xf32>
    %31 = math.exp %28 : vector<16x16xf32>
    %cst_33 = arith.constant 1.000000e+00 : f32
    %32 = vector.broadcast %cst_33 : f32 to vector<16x16xf32>
    %33 = arith.subf %31, %32 : vector<16x16xf32>
    %34 = arith.select %30, %28, %33 : vector<16x16xi1>, vector<16x16xf32>
    %c1 = arith.constant 1 : index
    %c0_34 = arith.constant 0 : index
    %c0_35 = arith.constant 0 : index
    %35 = vector.load %arg7[%c1, %c0_34, %c0_35] : memref<3x16x16xf32, #tpu.memory_space<vmem>>, vector<1x16x16xf32>
    %36 = vector.shape_cast %35 : vector<1x16x16xf32> to vector<16x16xf32>
    %cst_36 = arith.constant dense<0.000000e+00> : vector<16x16xf32>
    %37 = tpu.matmul %34, %36, %cst_36 {dimension_numbers = #tpu.dot_dimension_numbers<[1], [0], [0], [1], [0, 0, 1, 1], [], []>} : vector<16x16xf32>, vector<16x16xf32>, vector<16x16xf32> -> vector<16x16xf32>
    %c1_37 = arith.constant 1 : index
    %c0_38 = arith.constant 0 : index
    %c0_39 = arith.constant 0 : index
    %38 = vector.load %arg8[%c1_37, %c0_38, %c0_39] : memref<3x16x16xf32, #tpu.memory_space<vmem>>, vector<1x16x16xf32>
    %39 = vector.shape_cast %38 : vector<1x16x16xf32> to vector<16x16xf32>
    %cst_40 = arith.constant dense<0.000000e+00> : vector<16x16xf32>
    %40 = tpu.matmul %34, %39, %cst_40 {dimension_numbers = #tpu.dot_dimension_numbers<[1], [0], [0], [1], [0, 0, 1, 1], [], []>} : vector<16x16xf32>, vector<16x16xf32>, vector<16x16xf32> -> vector<16x16xf32>
    %c0_41 = arith.constant 0 : index
    %c0_42 = arith.constant 0 : index
    %41 = vector.load %arg12[%c0_41, %c0_42] : memref<8x16xf32, #tpu.memory_space<vmem>>, vector<8x16xf32>
    %cst_43 = arith.constant dense<0.000000e+00> : vector<8x16xf32>
    %42 = tpu.matmul %41, %37, %cst_43 {dimension_numbers = #tpu.dot_dimension_numbers<[1], [0], [0], [1], [0, 0, 1, 1], [], []>} : vector<8x16xf32>, vector<16x16xf32>, vector<8x16xf32> -> vector<8x16xf32>
    %c0_44 = arith.constant 0 : index
    %c0_45 = arith.constant 0 : index
    %43 = vector.load %arg13[%c0_44, %c0_45] : memref<8x16xf32, #tpu.memory_space<vmem>>, vector<8x16xf32>
    %cst_46 = arith.constant dense<0.000000e+00> : vector<8x16xf32>
    %44 = tpu.matmul %43, %40, %cst_46 {dimension_numbers = #tpu.dot_dimension_numbers<[1], [0], [0], [1], [0, 0, 1, 1], [], []>} : vector<8x16xf32>, vector<16x16xf32>, vector<8x16xf32> -> vector<8x16xf32>
    %45 = arith.addf %42, %44 : vector<8x16xf32>
    %c1_47 = arith.constant 1 : index
    %c0_48 = arith.constant 0 : index
    %c0_49 = arith.constant 0 : index
    %46 = vector.load %arg9[%c1_47, %c0_48, %c0_49] : memref<3x1x16xf32, #tpu.memory_space<vmem>>, vector<1x1x16xf32>
    %47 = vector.shape_cast %46 : vector<1x1x16xf32> to vector<1x16xf32>
    %48 = vector.broadcast %47 : vector<1x16xf32> to vector<8x16xf32>
    %49 = arith.addf %45, %48 : vector<8x16xf32>
    %cst_50 = arith.constant 0.000000e+00 : f32
    %50 = vector.broadcast %cst_50 : f32 to vector<8x16xf32>
    %51 = arith.cmpf ogt, %49, %50 : vector<8x16xf32>
    %52 = math.exp %49 : vector<8x16xf32>
    %cst_51 = arith.constant 1.000000e+00 : f32
    %53 = vector.broadcast %cst_51 : f32 to vector<8x16xf32>
    %54 = arith.subf %52, %53 : vector<8x16xf32>
    %55 = arith.select %51, %49, %54 : vector<8x16xi1>, vector<8x16xf32>
    %c2 = arith.constant 2 : index
    %c0_52 = arith.constant 0 : index
    %c0_53 = arith.constant 0 : index
    %56 = vector.load %arg7[%c2, %c0_52, %c0_53] : memref<3x16x16xf32, #tpu.memory_space<vmem>>, vector<1x16x16xf32>
    %57 = vector.shape_cast %56 : vector<1x16x16xf32> to vector<16x16xf32>
    %cst_54 = arith.constant dense<0.000000e+00> : vector<8x16xf32>
    %58 = tpu.matmul %55, %57, %cst_54 {dimension_numbers = #tpu.dot_dimension_numbers<[1], [0], [0], [1], [0, 0, 1, 1], [], []>} : vector<8x16xf32>, vector<16x16xf32>, vector<8x16xf32> -> vector<8x16xf32>
    %c2_55 = arith.constant 2 : index
    %c0_56 = arith.constant 0 : index
    %c0_57 = arith.constant 0 : index
    %59 = vector.load %arg8[%c2_55, %c0_56, %c0_57] : memref<3x16x16xf32, #tpu.memory_space<vmem>>, vector<1x16x16xf32>
    %60 = vector.shape_cast %59 : vector<1x16x16xf32> to vector<16x16xf32>
    %cst_58 = arith.constant dense<0.000000e+00> : vector<8x16xf32>
    %61 = tpu.matmul %55, %60, %cst_58 {dimension_numbers = #tpu.dot_dimension_numbers<[1], [0], [0], [1], [0, 0, 1, 1], [], []>} : vector<8x16xf32>, vector<16x16xf32>, vector<8x16xf32> -> vector<8x16xf32>
    %c0_59 = arith.constant 0 : index
    %c0_60 = arith.constant 0 : index
    %62 = vector.load %arg14[%c0_59, %c0_60] : memref<4x8xf32, #tpu.memory_space<vmem>>, vector<4x8xf32>
    %cst_61 = arith.constant dense<0.000000e+00> : vector<4x16xf32>
    %63 = tpu.matmul %62, %58, %cst_61 {dimension_numbers = #tpu.dot_dimension_numbers<[1], [0], [0], [1], [0, 0, 1, 1], [], []>} : vector<4x8xf32>, vector<8x16xf32>, vector<4x16xf32> -> vector<4x16xf32>
    %c0_62 = arith.constant 0 : index
    %c0_63 = arith.constant 0 : index
    %64 = vector.load %arg15[%c0_62, %c0_63] : memref<4x8xf32, #tpu.memory_space<vmem>>, vector<4x8xf32>
    %cst_64 = arith.constant dense<0.000000e+00> : vector<4x16xf32>
    %65 = tpu.matmul %64, %61, %cst_64 {dimension_numbers = #tpu.dot_dimension_numbers<[1], [0], [0], [1], [0, 0, 1, 1], [], []>} : vector<4x8xf32>, vector<8x16xf32>, vector<4x16xf32> -> vector<4x16xf32>
    %66 = arith.addf %63, %65 : vector<4x16xf32>
    %c2_65 = arith.constant 2 : index
    %c0_66 = arith.constant 0 : index
    %c0_67 = arith.constant 0 : index
    %67 = vector.load %arg9[%c2_65, %c0_66, %c0_67] : memref<3x1x16xf32, #tpu.memory_space<vmem>>, vector<1x1x16xf32>
    %68 = vector.shape_cast %67 : vector<1x1x16xf32> to vector<1x16xf32>
    %69 = vector.broadcast %68 : vector<1x16xf32> to vector<4x16xf32>
    %70 = arith.addf %66, %69 : vector<4x16xf32>
    %cst_68 = arith.constant 0.000000e+00 : f32
    %71 = vector.broadcast %cst_68 : f32 to vector<4x16xf32>
    %72 = arith.cmpf ogt, %70, %71 : vector<4x16xf32>
    %73 = math.exp %70 : vector<4x16xf32>
    %cst_69 = arith.constant 1.000000e+00 : f32
    %74 = vector.broadcast %cst_69 : f32 to vector<4x16xf32>
    %75 = arith.subf %73, %74 : vector<4x16xf32>
    %76 = arith.select %72, %70, %75 : vector<4x16xi1>, vector<4x16xf32>
    %c0_70 = arith.constant 0 : index
    %c0_71 = arith.constant 0 : index
    %77 = vector.load %arg16[%c0_70, %c0_71] : memref<16x32xf32, #tpu.memory_space<vmem>>, vector<16x32xf32>
    %cst_72 = arith.constant dense<0.000000e+00> : vector<16x32xf32>
    %78 = tpu.matmul %34, %77, %cst_72 {dimension_numbers = #tpu.dot_dimension_numbers<[1], [0], [0], [1], [0, 0, 1, 1], [], []>} : vector<16x16xf32>, vector<16x32xf32>, vector<16x32xf32> -> vector<16x32xf32>
    %c0_73 = arith.constant 0 : index
    %c0_74 = arith.constant 0 : index
    %79 = vector.load %arg17[%c0_73, %c0_74] : memref<1x32xf32, #tpu.memory_space<vmem>>, vector<1x32xf32>
    %80 = vector.broadcast %79 : vector<1x32xf32> to vector<16x32xf32>
    %81 = arith.addf %78, %80 : vector<16x32xf32>
    %c0_75 = arith.constant 0 : index
    %c0_76 = arith.constant 0 : index
    %82 = vector.load %arg16[%c0_75, %c0_76] : memref<16x32xf32, #tpu.memory_space<vmem>>, vector<16x32xf32>
    %cst_77 = arith.constant dense<0.000000e+00> : vector<8x32xf32>
    %83 = tpu.matmul %55, %82, %cst_77 {dimension_numbers = #tpu.dot_dimension_numbers<[1], [0], [0], [1], [0, 0, 1, 1], [], []>} : vector<8x16xf32>, vector<16x32xf32>, vector<8x32xf32> -> vector<8x32xf32>
    %c0_78 = arith.constant 0 : index
    %c0_79 = arith.constant 0 : index
    %84 = vector.load %arg17[%c0_78, %c0_79] : memref<1x32xf32, #tpu.memory_space<vmem>>, vector<1x32xf32>
    %85 = vector.broadcast %84 : vector<1x32xf32> to vector<8x32xf32>
    %86 = arith.addf %83, %85 : vector<8x32xf32>
    %c0_80 = arith.constant 0 : index
    %c0_81 = arith.constant 0 : index
    %87 = vector.load %arg16[%c0_80, %c0_81] : memref<16x32xf32, #tpu.memory_space<vmem>>, vector<16x32xf32>
    %cst_82 = arith.constant dense<0.000000e+00> : vector<4x32xf32>
    %88 = tpu.matmul %76, %87, %cst_82 {dimension_numbers = #tpu.dot_dimension_numbers<[1], [0], [0], [1], [0, 0, 1, 1], [], []>} : vector<4x16xf32>, vector<16x32xf32>, vector<4x32xf32> -> vector<4x32xf32>
    %c0_83 = arith.constant 0 : index
    %c0_84 = arith.constant 0 : index
    %89 = vector.load %arg17[%c0_83, %c0_84] : memref<1x32xf32, #tpu.memory_space<vmem>>, vector<1x32xf32>
    %90 = vector.broadcast %89 : vector<1x32xf32> to vector<4x32xf32>
    %91 = arith.addf %88, %90 : vector<4x32xf32>
    %c0_85 = arith.constant 0 : index
    %c0_86 = arith.constant 0 : index
    %92 = vector.load %arg18[%c0_85, %c0_86] : memref<80x32xf32, #tpu.memory_space<vmem>>, vector<80x32xf32>
    %cst_87 = arith.constant dense<0.000000e+00> : vector<80x32xf32>
    %93 = tpu.matmul %92, %8, %cst_87 {dimension_numbers = #tpu.dot_dimension_numbers<[1], [0], [0], [1], [0, 0, 1, 1], [], []>} : vector<80x32xf32>, vector<32x32xf32>, vector<80x32xf32> -> vector<80x32xf32>
    %c0_88 = arith.constant 0 : index
    %c0_89 = arith.constant 0 : index
    %94 = vector.load %arg19[%c0_88, %c0_89] : memref<80x16xf32, #tpu.memory_space<vmem>>, vector<80x16xf32>
    %cst_90 = arith.constant dense<0.000000e+00> : vector<80x32xf32>
    %95 = tpu.matmul %94, %81, %cst_90 {dimension_numbers = #tpu.dot_dimension_numbers<[1], [0], [0], [1], [0, 0, 1, 1], [], []>} : vector<80x16xf32>, vector<16x32xf32>, vector<80x32xf32> -> vector<80x32xf32>
    %96 = arith.addf %93, %95 : vector<80x32xf32>
    %c0_91 = arith.constant 0 : index
    %c0_92 = arith.constant 0 : index
    %97 = vector.load %arg20[%c0_91, %c0_92] : memref<80x8xf32, #tpu.memory_space<vmem>>, vector<80x8xf32>
    %cst_93 = arith.constant dense<0.000000e+00> : vector<80x32xf32>
    %98 = tpu.matmul %97, %86, %cst_93 {dimension_numbers = #tpu.dot_dimension_numbers<[1], [0], [0], [1], [0, 0, 1, 1], [], []>} : vector<80x8xf32>, vector<8x32xf32>, vector<80x32xf32> -> vector<80x32xf32>
    %99 = arith.addf %96, %98 : vector<80x32xf32>
    %c0_94 = arith.constant 0 : index
    %c0_95 = arith.constant 0 : index
    %100 = vector.load %arg21[%c0_94, %c0_95] : memref<80x4xf32, #tpu.memory_space<vmem>>, vector<80x4xf32>
    %cst_96 = arith.constant dense<0.000000e+00> : vector<80x32xf32>
    %101 = tpu.matmul %100, %91, %cst_96 {dimension_numbers = #tpu.dot_dimension_numbers<[1], [0], [0], [1], [0, 0, 1, 1], [], []>} : vector<80x4xf32>, vector<4x32xf32>, vector<80x32xf32> -> vector<80x32xf32>
    %102 = arith.addf %99, %101 : vector<80x32xf32>
    %c0_97 = arith.constant 0 : index
    %c0_98 = arith.constant 0 : index
    %103 = vector.load %arg22[%c0_97, %c0_98] : memref<1x32xf32, #tpu.memory_space<vmem>>, vector<1x32xf32>
    %c0_99 = arith.constant 0 : index
    %c0_100 = arith.constant 0 : index
    %104 = vector.load %arg23[%c0_99, %c0_100] : memref<1x32xf32, #tpu.memory_space<vmem>>, vector<1x32xf32>
    %cst_101 = arith.constant dense<0.000000e+00> : vector<80xf32>
    %105 = vector.multi_reduction <add>, %102, %cst_101 [1] : vector<80x32xf32> to vector<80xf32>
    %106 = vector.shape_cast %105 : vector<80xf32> to vector<80x1xf32>
    %cst_102 = arith.constant 3.200000e+01 : f32
    %107 = vector.broadcast %cst_102 : f32 to vector<80x1xf32>
    %108 = arith.divf %106, %107 : vector<80x1xf32>
    %109 = vector.broadcast %108 : vector<80x1xf32> to vector<80x32xf32>
    %110 = arith.subf %102, %109 : vector<80x32xf32>
    %111 = arith.mulf %110, %110 : vector<80x32xf32>
    %cst_103 = arith.constant dense<0.000000e+00> : vector<80xf32>
    %112 = vector.multi_reduction <add>, %111, %cst_103 [1] : vector<80x32xf32> to vector<80xf32>
    %113 = vector.shape_cast %112 : vector<80xf32> to vector<80x1xf32>
    %cst_104 = arith.constant 3.200000e+01 : f32
    %114 = vector.broadcast %cst_104 : f32 to vector<80x1xf32>
    %115 = arith.divf %113, %114 : vector<80x1xf32>
    %cst_105 = arith.constant 9.99999974E-6 : f32
    %116 = vector.broadcast %cst_105 : f32 to vector<80x1xf32>
    %117 = arith.addf %115, %116 : vector<80x1xf32>
    %118 = math.rsqrt %117 : vector<80x1xf32>
    %119 = vector.broadcast %118 : vector<80x1xf32> to vector<80x32xf32>
    %120 = arith.mulf %110, %119 : vector<80x32xf32>
    %121 = vector.broadcast %103 : vector<1x32xf32> to vector<80x32xf32>
    %122 = arith.mulf %120, %121 : vector<80x32xf32>
    %123 = vector.broadcast %104 : vector<1x32xf32> to vector<80x32xf32>
    %124 = arith.addf %122, %123 : vector<80x32xf32>
    %c0_106 = arith.constant 0 : index
    %c0_107 = arith.constant 0 : index
    %125 = vector.load %arg24[%c0_106, %c0_107] : memref<80x80xf32, #tpu.memory_space<vmem>>, vector<80x80xf32>
    %cst_108 = arith.constant 0.000000e+00 : f32
    %126 = vector.broadcast %cst_108 : f32 to vector<80x32xf32>
    %c0_109 = arith.constant 0 : index
    %c0_110 = arith.constant 0 : index
    %c0_111 = arith.constant 0 : index
    %127 = vector.load %arg25[%c0_109, %c0_110, %c0_111] : memref<4x32x32xf32, #tpu.memory_space<vmem>>, vector<1x32x32xf32>
    %128 = vector.shape_cast %127 : vector<1x32x32xf32> to vector<32x32xf32>
    %cst_112 = arith.constant dense<0.000000e+00> : vector<80x32xf32>
    %129 = tpu.matmul %124, %128, %cst_112 {dimension_numbers = #tpu.dot_dimension_numbers<[1], [0], [0], [1], [0, 0, 1, 1], [], []>} : vector<80x32xf32>, vector<32x32xf32>, vector<80x32xf32> -> vector<80x32xf32>
    %cst_113 = arith.constant dense<0.000000e+00> : vector<80x80xf32>
    %130 = tpu.matmul %129, %124, %cst_113 {dimension_numbers = #tpu.dot_dimension_numbers<[1], [1], [0], [0], [0, 0, 1, 0], [], []>} : vector<80x32xf32>, vector<80x32xf32>, vector<80x80xf32> -> vector<80x80xf32>
    %131 = arith.addf %130, %125 : vector<80x80xf32>
    %cst_114 = arith.constant dense<0xFF800000> : vector<80xf32>
    %132 = vector.multi_reduction <maximumf>, %131, %cst_114 [1] : vector<80x80xf32> to vector<80xf32>
    %133 = vector.shape_cast %132 : vector<80xf32> to vector<80x1xf32>
    %134 = vector.broadcast %133 : vector<80x1xf32> to vector<80x80xf32>
    %135 = arith.subf %131, %134 : vector<80x80xf32>
    %136 = math.exp %135 : vector<80x80xf32>
    %cst_115 = arith.constant dense<0.000000e+00> : vector<80xf32>
    %137 = vector.multi_reduction <add>, %136, %cst_115 [1] : vector<80x80xf32> to vector<80xf32>
    %138 = vector.shape_cast %137 : vector<80xf32> to vector<80x1xf32>
    %139 = tpu.reciprocal %138 {approx = true} : vector<80x1xf32> -> vector<80x1xf32>
    %140 = vector.broadcast %139 : vector<80x1xf32> to vector<80x80xf32>
    %141 = arith.mulf %136, %140 : vector<80x80xf32>
    %c0_116 = arith.constant 0 : index
    %c0_117 = arith.constant 0 : index
    %c0_118 = arith.constant 0 : index
    %142 = vector.load %arg26[%c0_116, %c0_117, %c0_118] : memref<4x32x16xf32, #tpu.memory_space<vmem>>, vector<1x32x16xf32>
    %143 = vector.shape_cast %142 : vector<1x32x16xf32> to vector<32x16xf32>
    %cst_119 = arith.constant dense<0.000000e+00> : vector<80x16xf32>
    %144 = tpu.matmul %124, %143, %cst_119 {dimension_numbers = #tpu.dot_dimension_numbers<[1], [0], [0], [1], [0, 0, 1, 1], [], []>} : vector<80x32xf32>, vector<32x16xf32>, vector<80x16xf32> -> vector<80x16xf32>
    %cst_120 = arith.constant dense<0.000000e+00> : vector<80x16xf32>
    %145 = tpu.matmul %141, %144, %cst_120 {dimension_numbers = #tpu.dot_dimension_numbers<[1], [0], [0], [1], [0, 0, 1, 1], [], []>} : vector<80x80xf32>, vector<80x16xf32>, vector<80x16xf32> -> vector<80x16xf32>
    %c0_121 = arith.constant 0 : index
    %c0_122 = arith.constant 0 : index
    %c0_123 = arith.constant 0 : index
    %146 = vector.load %arg27[%c0_121, %c0_122, %c0_123] : memref<4x16x32xf32, #tpu.memory_space<vmem>>, vector<1x16x32xf32>
    %147 = vector.shape_cast %146 : vector<1x16x32xf32> to vector<16x32xf32>
    %cst_124 = arith.constant dense<0.000000e+00> : vector<80x32xf32>
    %148 = tpu.matmul %145, %147, %cst_124 {dimension_numbers = #tpu.dot_dimension_numbers<[1], [0], [0], [1], [0, 0, 1, 1], [], []>} : vector<80x16xf32>, vector<16x32xf32>, vector<80x32xf32> -> vector<80x32xf32>
    %149 = arith.addf %126, %148 : vector<80x32xf32>
    %c1_125 = arith.constant 1 : index
    %c0_126 = arith.constant 0 : index
    %c0_127 = arith.constant 0 : index
    %150 = vector.load %arg25[%c1_125, %c0_126, %c0_127] : memref<4x32x32xf32, #tpu.memory_space<vmem>>, vector<1x32x32xf32>
    %151 = vector.shape_cast %150 : vector<1x32x32xf32> to vector<32x32xf32>
    %cst_128 = arith.constant dense<0.000000e+00> : vector<80x32xf32>
    %152 = tpu.matmul %124, %151, %cst_128 {dimension_numbers = #tpu.dot_dimension_numbers<[1], [0], [0], [1], [0, 0, 1, 1], [], []>} : vector<80x32xf32>, vector<32x32xf32>, vector<80x32xf32> -> vector<80x32xf32>
    %cst_129 = arith.constant dense<0.000000e+00> : vector<80x80xf32>
    %153 = tpu.matmul %152, %124, %cst_129 {dimension_numbers = #tpu.dot_dimension_numbers<[1], [1], [0], [0], [0, 0, 1, 0], [], []>} : vector<80x32xf32>, vector<80x32xf32>, vector<80x80xf32> -> vector<80x80xf32>
    %154 = arith.addf %153, %125 : vector<80x80xf32>
    %cst_130 = arith.constant dense<0xFF800000> : vector<80xf32>
    %155 = vector.multi_reduction <maximumf>, %154, %cst_130 [1] : vector<80x80xf32> to vector<80xf32>
    %156 = vector.shape_cast %155 : vector<80xf32> to vector<80x1xf32>
    %157 = vector.broadcast %156 : vector<80x1xf32> to vector<80x80xf32>
    %158 = arith.subf %154, %157 : vector<80x80xf32>
    %159 = math.exp %158 : vector<80x80xf32>
    %cst_131 = arith.constant dense<0.000000e+00> : vector<80xf32>
    %160 = vector.multi_reduction <add>, %159, %cst_131 [1] : vector<80x80xf32> to vector<80xf32>
    %161 = vector.shape_cast %160 : vector<80xf32> to vector<80x1xf32>
    %162 = tpu.reciprocal %161 {approx = true} : vector<80x1xf32> -> vector<80x1xf32>
    %163 = vector.broadcast %162 : vector<80x1xf32> to vector<80x80xf32>
    %164 = arith.mulf %159, %163 : vector<80x80xf32>
    %c1_132 = arith.constant 1 : index
    %c0_133 = arith.constant 0 : index
    %c0_134 = arith.constant 0 : index
    %165 = vector.load %arg26[%c1_132, %c0_133, %c0_134] : memref<4x32x16xf32, #tpu.memory_space<vmem>>, vector<1x32x16xf32>
    %166 = vector.shape_cast %165 : vector<1x32x16xf32> to vector<32x16xf32>
    %cst_135 = arith.constant dense<0.000000e+00> : vector<80x16xf32>
    %167 = tpu.matmul %124, %166, %cst_135 {dimension_numbers = #tpu.dot_dimension_numbers<[1], [0], [0], [1], [0, 0, 1, 1], [], []>} : vector<80x32xf32>, vector<32x16xf32>, vector<80x16xf32> -> vector<80x16xf32>
    %cst_136 = arith.constant dense<0.000000e+00> : vector<80x16xf32>
    %168 = tpu.matmul %164, %167, %cst_136 {dimension_numbers = #tpu.dot_dimension_numbers<[1], [0], [0], [1], [0, 0, 1, 1], [], []>} : vector<80x80xf32>, vector<80x16xf32>, vector<80x16xf32> -> vector<80x16xf32>
    %c1_137 = arith.constant 1 : index
    %c0_138 = arith.constant 0 : index
    %c0_139 = arith.constant 0 : index
    %169 = vector.load %arg27[%c1_137, %c0_138, %c0_139] : memref<4x16x32xf32, #tpu.memory_space<vmem>>, vector<1x16x32xf32>
    %170 = vector.shape_cast %169 : vector<1x16x32xf32> to vector<16x32xf32>
    %cst_140 = arith.constant dense<0.000000e+00> : vector<80x32xf32>
    %171 = tpu.matmul %168, %170, %cst_140 {dimension_numbers = #tpu.dot_dimension_numbers<[1], [0], [0], [1], [0, 0, 1, 1], [], []>} : vector<80x16xf32>, vector<16x32xf32>, vector<80x32xf32> -> vector<80x32xf32>
    %172 = arith.addf %149, %171 : vector<80x32xf32>
    %c0_141 = arith.constant 0 : index
    %c0_142 = arith.constant 0 : index
    %c0_143 = arith.constant 0 : index
    %173 = vector.load %arg28[%c0_141, %c0_142, %c0_143] : memref<2x1x32xf32, #tpu.memory_space<vmem>>, vector<1x1x32xf32>
    %174 = vector.shape_cast %173 : vector<1x1x32xf32> to vector<1x32xf32>
    %175 = vector.broadcast %174 : vector<1x32xf32> to vector<80x32xf32>
    %176 = arith.addf %172, %175 : vector<80x32xf32>
    %177 = arith.addf %176, %124 : vector<80x32xf32>
    %c0_144 = arith.constant 0 : index
    %c0_145 = arith.constant 0 : index
    %c0_146 = arith.constant 0 : index
    %178 = vector.load %arg29[%c0_144, %c0_145, %c0_146] : memref<2x1x32xf32, #tpu.memory_space<vmem>>, vector<1x1x32xf32>
    %179 = vector.shape_cast %178 : vector<1x1x32xf32> to vector<1x32xf32>
    %c0_147 = arith.constant 0 : index
    %c0_148 = arith.constant 0 : index
    %c0_149 = arith.constant 0 : index
    %180 = vector.load %arg30[%c0_147, %c0_148, %c0_149] : memref<2x1x32xf32, #tpu.memory_space<vmem>>, vector<1x1x32xf32>
    %181 = vector.shape_cast %180 : vector<1x1x32xf32> to vector<1x32xf32>
    %cst_150 = arith.constant dense<0.000000e+00> : vector<80xf32>
    %182 = vector.multi_reduction <add>, %177, %cst_150 [1] : vector<80x32xf32> to vector<80xf32>
    %183 = vector.shape_cast %182 : vector<80xf32> to vector<80x1xf32>
    %cst_151 = arith.constant 3.200000e+01 : f32
    %184 = vector.broadcast %cst_151 : f32 to vector<80x1xf32>
    %185 = arith.divf %183, %184 : vector<80x1xf32>
    %186 = vector.broadcast %185 : vector<80x1xf32> to vector<80x32xf32>
    %187 = arith.subf %177, %186 : vector<80x32xf32>
    %188 = arith.mulf %187, %187 : vector<80x32xf32>
    %cst_152 = arith.constant dense<0.000000e+00> : vector<80xf32>
    %189 = vector.multi_reduction <add>, %188, %cst_152 [1] : vector<80x32xf32> to vector<80xf32>
    %190 = vector.shape_cast %189 : vector<80xf32> to vector<80x1xf32>
    %cst_153 = arith.constant 3.200000e+01 : f32
    %191 = vector.broadcast %cst_153 : f32 to vector<80x1xf32>
    %192 = arith.divf %190, %191 : vector<80x1xf32>
    %cst_154 = arith.constant 9.99999997E-7 : f32
    %193 = vector.broadcast %cst_154 : f32 to vector<80x1xf32>
    %194 = arith.addf %192, %193 : vector<80x1xf32>
    %195 = math.rsqrt %194 : vector<80x1xf32>
    %196 = vector.broadcast %195 : vector<80x1xf32> to vector<80x32xf32>
    %197 = arith.mulf %187, %196 : vector<80x32xf32>
    %198 = vector.broadcast %179 : vector<1x32xf32> to vector<80x32xf32>
    %199 = arith.mulf %197, %198 : vector<80x32xf32>
    %200 = vector.broadcast %181 : vector<1x32xf32> to vector<80x32xf32>
    %201 = arith.addf %199, %200 : vector<80x32xf32>
    %c0_155 = arith.constant 0 : index
    %c0_156 = arith.constant 0 : index
    %c0_157 = arith.constant 0 : index
    %202 = vector.load %arg31[%c0_155, %c0_156, %c0_157] : memref<2x32x64xf32, #tpu.memory_space<vmem>>, vector<1x32x64xf32>
    %203 = vector.shape_cast %202 : vector<1x32x64xf32> to vector<32x64xf32>
    %cst_158 = arith.constant dense<0.000000e+00> : vector<80x64xf32>
    %204 = tpu.matmul %201, %203, %cst_158 {dimension_numbers = #tpu.dot_dimension_numbers<[1], [0], [0], [1], [0, 0, 1, 1], [], []>} : vector<80x32xf32>, vector<32x64xf32>, vector<80x64xf32> -> vector<80x64xf32>
    %c0_159 = arith.constant 0 : index
    %c0_160 = arith.constant 0 : index
    %c0_161 = arith.constant 0 : index
    %205 = vector.load %arg32[%c0_159, %c0_160, %c0_161] : memref<2x1x64xf32, #tpu.memory_space<vmem>>, vector<1x1x64xf32>
    %206 = vector.shape_cast %205 : vector<1x1x64xf32> to vector<1x64xf32>
    %207 = vector.broadcast %206 : vector<1x64xf32> to vector<80x64xf32>
    %208 = arith.addf %204, %207 : vector<80x64xf32>
    %209 = arith.mulf %208, %208 : vector<80x64xf32>
    %210 = arith.mulf %208, %209 : vector<80x64xf32>
    %cst_162 = arith.constant 4.471500e-02 : f32
    %211 = vector.broadcast %cst_162 : f32 to vector<80x64xf32>
    %212 = arith.mulf %211, %210 : vector<80x64xf32>
    %213 = arith.addf %208, %212 : vector<80x64xf32>
    %cst_163 = arith.constant 0.797884583 : f32
    %214 = vector.broadcast %cst_163 : f32 to vector<80x64xf32>
    %215 = arith.mulf %214, %213 : vector<80x64xf32>
    %216 = math.tanh %215 : vector<80x64xf32>
    %cst_164 = arith.constant 1.000000e+00 : f32
    %217 = vector.broadcast %cst_164 : f32 to vector<80x64xf32>
    %218 = arith.addf %217, %216 : vector<80x64xf32>
    %cst_165 = arith.constant 5.000000e-01 : f32
    %219 = vector.broadcast %cst_165 : f32 to vector<80x64xf32>
    %220 = arith.mulf %219, %218 : vector<80x64xf32>
    %221 = arith.mulf %208, %220 : vector<80x64xf32>
    %c0_166 = arith.constant 0 : index
    %c0_167 = arith.constant 0 : index
    %c0_168 = arith.constant 0 : index
    %222 = vector.load %arg33[%c0_166, %c0_167, %c0_168] : memref<2x64x32xf32, #tpu.memory_space<vmem>>, vector<1x64x32xf32>
    %223 = vector.shape_cast %222 : vector<1x64x32xf32> to vector<64x32xf32>
    %cst_169 = arith.constant dense<0.000000e+00> : vector<80x32xf32>
    %224 = tpu.matmul %221, %223, %cst_169 {dimension_numbers = #tpu.dot_dimension_numbers<[1], [0], [0], [1], [0, 0, 1, 1], [], []>} : vector<80x64xf32>, vector<64x32xf32>, vector<80x32xf32> -> vector<80x32xf32>
    %c0_170 = arith.constant 0 : index
    %c0_171 = arith.constant 0 : index
    %c0_172 = arith.constant 0 : index
    %225 = vector.load %arg34[%c0_170, %c0_171, %c0_172] : memref<2x1x32xf32, #tpu.memory_space<vmem>>, vector<1x1x32xf32>
    %226 = vector.shape_cast %225 : vector<1x1x32xf32> to vector<1x32xf32>
    %227 = vector.broadcast %226 : vector<1x32xf32> to vector<80x32xf32>
    %228 = arith.addf %224, %227 : vector<80x32xf32>
    %229 = arith.addf %228, %201 : vector<80x32xf32>
    %c0_173 = arith.constant 0 : index
    %c0_174 = arith.constant 0 : index
    %c0_175 = arith.constant 0 : index
    %230 = vector.load %arg35[%c0_173, %c0_174, %c0_175] : memref<2x1x32xf32, #tpu.memory_space<vmem>>, vector<1x1x32xf32>
    %231 = vector.shape_cast %230 : vector<1x1x32xf32> to vector<1x32xf32>
    %c0_176 = arith.constant 0 : index
    %c0_177 = arith.constant 0 : index
    %c0_178 = arith.constant 0 : index
    %232 = vector.load %arg36[%c0_176, %c0_177, %c0_178] : memref<2x1x32xf32, #tpu.memory_space<vmem>>, vector<1x1x32xf32>
    %233 = vector.shape_cast %232 : vector<1x1x32xf32> to vector<1x32xf32>
    %cst_179 = arith.constant dense<0.000000e+00> : vector<80xf32>
    %234 = vector.multi_reduction <add>, %229, %cst_179 [1] : vector<80x32xf32> to vector<80xf32>
    %235 = vector.shape_cast %234 : vector<80xf32> to vector<80x1xf32>
    %cst_180 = arith.constant 3.200000e+01 : f32
    %236 = vector.broadcast %cst_180 : f32 to vector<80x1xf32>
    %237 = arith.divf %235, %236 : vector<80x1xf32>
    %238 = vector.broadcast %237 : vector<80x1xf32> to vector<80x32xf32>
    %239 = arith.subf %229, %238 : vector<80x32xf32>
    %240 = arith.mulf %239, %239 : vector<80x32xf32>
    %cst_181 = arith.constant dense<0.000000e+00> : vector<80xf32>
    %241 = vector.multi_reduction <add>, %240, %cst_181 [1] : vector<80x32xf32> to vector<80xf32>
    %242 = vector.shape_cast %241 : vector<80xf32> to vector<80x1xf32>
    %cst_182 = arith.constant 3.200000e+01 : f32
    %243 = vector.broadcast %cst_182 : f32 to vector<80x1xf32>
    %244 = arith.divf %242, %243 : vector<80x1xf32>
    %cst_183 = arith.constant 9.99999997E-7 : f32
    %245 = vector.broadcast %cst_183 : f32 to vector<80x1xf32>
    %246 = arith.addf %244, %245 : vector<80x1xf32>
    %247 = math.rsqrt %246 : vector<80x1xf32>
    %248 = vector.broadcast %247 : vector<80x1xf32> to vector<80x32xf32>
    %249 = arith.mulf %239, %248 : vector<80x32xf32>
    %250 = vector.broadcast %231 : vector<1x32xf32> to vector<80x32xf32>
    %251 = arith.mulf %249, %250 : vector<80x32xf32>
    %252 = vector.broadcast %233 : vector<1x32xf32> to vector<80x32xf32>
    %253 = arith.addf %251, %252 : vector<80x32xf32>
    %cst_184 = arith.constant 0.000000e+00 : f32
    %254 = vector.broadcast %cst_184 : f32 to vector<80x32xf32>
    %c2_185 = arith.constant 2 : index
    %c0_186 = arith.constant 0 : index
    %c0_187 = arith.constant 0 : index
    %255 = vector.load %arg25[%c2_185, %c0_186, %c0_187] : memref<4x32x32xf32, #tpu.memory_space<vmem>>, vector<1x32x32xf32>
    %256 = vector.shape_cast %255 : vector<1x32x32xf32> to vector<32x32xf32>
    %cst_188 = arith.constant dense<0.000000e+00> : vector<80x32xf32>
    %257 = tpu.matmul %253, %256, %cst_188 {dimension_numbers = #tpu.dot_dimension_numbers<[1], [0], [0], [1], [0, 0, 1, 1], [], []>} : vector<80x32xf32>, vector<32x32xf32>, vector<80x32xf32> -> vector<80x32xf32>
    %cst_189 = arith.constant dense<0.000000e+00> : vector<80x80xf32>
    %258 = tpu.matmul %257, %253, %cst_189 {dimension_numbers = #tpu.dot_dimension_numbers<[1], [1], [0], [0], [0, 0, 1, 0], [], []>} : vector<80x32xf32>, vector<80x32xf32>, vector<80x80xf32> -> vector<80x80xf32>
    %259 = arith.addf %258, %125 : vector<80x80xf32>
    %cst_190 = arith.constant dense<0xFF800000> : vector<80xf32>
    %260 = vector.multi_reduction <maximumf>, %259, %cst_190 [1] : vector<80x80xf32> to vector<80xf32>
    %261 = vector.shape_cast %260 : vector<80xf32> to vector<80x1xf32>
    %262 = vector.broadcast %261 : vector<80x1xf32> to vector<80x80xf32>
    %263 = arith.subf %259, %262 : vector<80x80xf32>
    %264 = math.exp %263 : vector<80x80xf32>
    %cst_191 = arith.constant dense<0.000000e+00> : vector<80xf32>
    %265 = vector.multi_reduction <add>, %264, %cst_191 [1] : vector<80x80xf32> to vector<80xf32>
    %266 = vector.shape_cast %265 : vector<80xf32> to vector<80x1xf32>
    %267 = tpu.reciprocal %266 {approx = true} : vector<80x1xf32> -> vector<80x1xf32>
    %268 = vector.broadcast %267 : vector<80x1xf32> to vector<80x80xf32>
    %269 = arith.mulf %264, %268 : vector<80x80xf32>
    %c2_192 = arith.constant 2 : index
    %c0_193 = arith.constant 0 : index
    %c0_194 = arith.constant 0 : index
    %270 = vector.load %arg26[%c2_192, %c0_193, %c0_194] : memref<4x32x16xf32, #tpu.memory_space<vmem>>, vector<1x32x16xf32>
    %271 = vector.shape_cast %270 : vector<1x32x16xf32> to vector<32x16xf32>
    %cst_195 = arith.constant dense<0.000000e+00> : vector<80x16xf32>
    %272 = tpu.matmul %253, %271, %cst_195 {dimension_numbers = #tpu.dot_dimension_numbers<[1], [0], [0], [1], [0, 0, 1, 1], [], []>} : vector<80x32xf32>, vector<32x16xf32>, vector<80x16xf32> -> vector<80x16xf32>
    %cst_196 = arith.constant dense<0.000000e+00> : vector<80x16xf32>
    %273 = tpu.matmul %269, %272, %cst_196 {dimension_numbers = #tpu.dot_dimension_numbers<[1], [0], [0], [1], [0, 0, 1, 1], [], []>} : vector<80x80xf32>, vector<80x16xf32>, vector<80x16xf32> -> vector<80x16xf32>
    %c2_197 = arith.constant 2 : index
    %c0_198 = arith.constant 0 : index
    %c0_199 = arith.constant 0 : index
    %274 = vector.load %arg27[%c2_197, %c0_198, %c0_199] : memref<4x16x32xf32, #tpu.memory_space<vmem>>, vector<1x16x32xf32>
    %275 = vector.shape_cast %274 : vector<1x16x32xf32> to vector<16x32xf32>
    %cst_200 = arith.constant dense<0.000000e+00> : vector<80x32xf32>
    %276 = tpu.matmul %273, %275, %cst_200 {dimension_numbers = #tpu.dot_dimension_numbers<[1], [0], [0], [1], [0, 0, 1, 1], [], []>} : vector<80x16xf32>, vector<16x32xf32>, vector<80x32xf32> -> vector<80x32xf32>
    %277 = arith.addf %254, %276 : vector<80x32xf32>
    %c3 = arith.constant 3 : index
    %c0_201 = arith.constant 0 : index
    %c0_202 = arith.constant 0 : index
    %278 = vector.load %arg25[%c3, %c0_201, %c0_202] : memref<4x32x32xf32, #tpu.memory_space<vmem>>, vector<1x32x32xf32>
    %279 = vector.shape_cast %278 : vector<1x32x32xf32> to vector<32x32xf32>
    %cst_203 = arith.constant dense<0.000000e+00> : vector<80x32xf32>
    %280 = tpu.matmul %253, %279, %cst_203 {dimension_numbers = #tpu.dot_dimension_numbers<[1], [0], [0], [1], [0, 0, 1, 1], [], []>} : vector<80x32xf32>, vector<32x32xf32>, vector<80x32xf32> -> vector<80x32xf32>
    %cst_204 = arith.constant dense<0.000000e+00> : vector<80x80xf32>
    %281 = tpu.matmul %280, %253, %cst_204 {dimension_numbers = #tpu.dot_dimension_numbers<[1], [1], [0], [0], [0, 0, 1, 0], [], []>} : vector<80x32xf32>, vector<80x32xf32>, vector<80x80xf32> -> vector<80x80xf32>
    %282 = arith.addf %281, %125 : vector<80x80xf32>
    %cst_205 = arith.constant dense<0xFF800000> : vector<80xf32>
    %283 = vector.multi_reduction <maximumf>, %282, %cst_205 [1] : vector<80x80xf32> to vector<80xf32>
    %284 = vector.shape_cast %283 : vector<80xf32> to vector<80x1xf32>
    %285 = vector.broadcast %284 : vector<80x1xf32> to vector<80x80xf32>
    %286 = arith.subf %282, %285 : vector<80x80xf32>
    %287 = math.exp %286 : vector<80x80xf32>
    %cst_206 = arith.constant dense<0.000000e+00> : vector<80xf32>
    %288 = vector.multi_reduction <add>, %287, %cst_206 [1] : vector<80x80xf32> to vector<80xf32>
    %289 = vector.shape_cast %288 : vector<80xf32> to vector<80x1xf32>
    %290 = tpu.reciprocal %289 {approx = true} : vector<80x1xf32> -> vector<80x1xf32>
    %291 = vector.broadcast %290 : vector<80x1xf32> to vector<80x80xf32>
    %292 = arith.mulf %287, %291 : vector<80x80xf32>
    %c3_207 = arith.constant 3 : index
    %c0_208 = arith.constant 0 : index
    %c0_209 = arith.constant 0 : index
    %293 = vector.load %arg26[%c3_207, %c0_208, %c0_209] : memref<4x32x16xf32, #tpu.memory_space<vmem>>, vector<1x32x16xf32>
    %294 = vector.shape_cast %293 : vector<1x32x16xf32> to vector<32x16xf32>
    %cst_210 = arith.constant dense<0.000000e+00> : vector<80x16xf32>
    %295 = tpu.matmul %253, %294, %cst_210 {dimension_numbers = #tpu.dot_dimension_numbers<[1], [0], [0], [1], [0, 0, 1, 1], [], []>} : vector<80x32xf32>, vector<32x16xf32>, vector<80x16xf32> -> vector<80x16xf32>
    %cst_211 = arith.constant dense<0.000000e+00> : vector<80x16xf32>
    %296 = tpu.matmul %292, %295, %cst_211 {dimension_numbers = #tpu.dot_dimension_numbers<[1], [0], [0], [1], [0, 0, 1, 1], [], []>} : vector<80x80xf32>, vector<80x16xf32>, vector<80x16xf32> -> vector<80x16xf32>
    %c3_212 = arith.constant 3 : index
    %c0_213 = arith.constant 0 : index
    %c0_214 = arith.constant 0 : index
    %297 = vector.load %arg27[%c3_212, %c0_213, %c0_214] : memref<4x16x32xf32, #tpu.memory_space<vmem>>, vector<1x16x32xf32>
    %298 = vector.shape_cast %297 : vector<1x16x32xf32> to vector<16x32xf32>
    %cst_215 = arith.constant dense<0.000000e+00> : vector<80x32xf32>
    %299 = tpu.matmul %296, %298, %cst_215 {dimension_numbers = #tpu.dot_dimension_numbers<[1], [0], [0], [1], [0, 0, 1, 1], [], []>} : vector<80x16xf32>, vector<16x32xf32>, vector<80x32xf32> -> vector<80x32xf32>
    %300 = arith.addf %277, %299 : vector<80x32xf32>
    %c1_216 = arith.constant 1 : index
    %c0_217 = arith.constant 0 : index
    %c0_218 = arith.constant 0 : index
    %301 = vector.load %arg28[%c1_216, %c0_217, %c0_218] : memref<2x1x32xf32, #tpu.memory_space<vmem>>, vector<1x1x32xf32>
    %302 = vector.shape_cast %301 : vector<1x1x32xf32> to vector<1x32xf32>
    %303 = vector.broadcast %302 : vector<1x32xf32> to vector<80x32xf32>
    %304 = arith.addf %300, %303 : vector<80x32xf32>
    %305 = arith.addf %304, %253 : vector<80x32xf32>
    %c1_219 = arith.constant 1 : index
    %c0_220 = arith.constant 0 : index
    %c0_221 = arith.constant 0 : index
    %306 = vector.load %arg29[%c1_219, %c0_220, %c0_221] : memref<2x1x32xf32, #tpu.memory_space<vmem>>, vector<1x1x32xf32>
    %307 = vector.shape_cast %306 : vector<1x1x32xf32> to vector<1x32xf32>
    %c1_222 = arith.constant 1 : index
    %c0_223 = arith.constant 0 : index
    %c0_224 = arith.constant 0 : index
    %308 = vector.load %arg30[%c1_222, %c0_223, %c0_224] : memref<2x1x32xf32, #tpu.memory_space<vmem>>, vector<1x1x32xf32>
    %309 = vector.shape_cast %308 : vector<1x1x32xf32> to vector<1x32xf32>
    %cst_225 = arith.constant dense<0.000000e+00> : vector<80xf32>
    %310 = vector.multi_reduction <add>, %305, %cst_225 [1] : vector<80x32xf32> to vector<80xf32>
    %311 = vector.shape_cast %310 : vector<80xf32> to vector<80x1xf32>
    %cst_226 = arith.constant 3.200000e+01 : f32
    %312 = vector.broadcast %cst_226 : f32 to vector<80x1xf32>
    %313 = arith.divf %311, %312 : vector<80x1xf32>
    %314 = vector.broadcast %313 : vector<80x1xf32> to vector<80x32xf32>
    %315 = arith.subf %305, %314 : vector<80x32xf32>
    %316 = arith.mulf %315, %315 : vector<80x32xf32>
    %cst_227 = arith.constant dense<0.000000e+00> : vector<80xf32>
    %317 = vector.multi_reduction <add>, %316, %cst_227 [1] : vector<80x32xf32> to vector<80xf32>
    %318 = vector.shape_cast %317 : vector<80xf32> to vector<80x1xf32>
    %cst_228 = arith.constant 3.200000e+01 : f32
    %319 = vector.broadcast %cst_228 : f32 to vector<80x1xf32>
    %320 = arith.divf %318, %319 : vector<80x1xf32>
    %cst_229 = arith.constant 9.99999997E-7 : f32
    %321 = vector.broadcast %cst_229 : f32 to vector<80x1xf32>
    %322 = arith.addf %320, %321 : vector<80x1xf32>
    %323 = math.rsqrt %322 : vector<80x1xf32>
    %324 = vector.broadcast %323 : vector<80x1xf32> to vector<80x32xf32>
    %325 = arith.mulf %315, %324 : vector<80x32xf32>
    %326 = vector.broadcast %307 : vector<1x32xf32> to vector<80x32xf32>
    %327 = arith.mulf %325, %326 : vector<80x32xf32>
    %328 = vector.broadcast %309 : vector<1x32xf32> to vector<80x32xf32>
    %329 = arith.addf %327, %328 : vector<80x32xf32>
    %c1_230 = arith.constant 1 : index
    %c0_231 = arith.constant 0 : index
    %c0_232 = arith.constant 0 : index
    %330 = vector.load %arg31[%c1_230, %c0_231, %c0_232] : memref<2x32x64xf32, #tpu.memory_space<vmem>>, vector<1x32x64xf32>
    %331 = vector.shape_cast %330 : vector<1x32x64xf32> to vector<32x64xf32>
    %cst_233 = arith.constant dense<0.000000e+00> : vector<80x64xf32>
    %332 = tpu.matmul %329, %331, %cst_233 {dimension_numbers = #tpu.dot_dimension_numbers<[1], [0], [0], [1], [0, 0, 1, 1], [], []>} : vector<80x32xf32>, vector<32x64xf32>, vector<80x64xf32> -> vector<80x64xf32>
    %c1_234 = arith.constant 1 : index
    %c0_235 = arith.constant 0 : index
    %c0_236 = arith.constant 0 : index
    %333 = vector.load %arg32[%c1_234, %c0_235, %c0_236] : memref<2x1x64xf32, #tpu.memory_space<vmem>>, vector<1x1x64xf32>
    %334 = vector.shape_cast %333 : vector<1x1x64xf32> to vector<1x64xf32>
    %335 = vector.broadcast %334 : vector<1x64xf32> to vector<80x64xf32>
    %336 = arith.addf %332, %335 : vector<80x64xf32>
    %337 = arith.mulf %336, %336 : vector<80x64xf32>
    %338 = arith.mulf %336, %337 : vector<80x64xf32>
    %cst_237 = arith.constant 4.471500e-02 : f32
    %339 = vector.broadcast %cst_237 : f32 to vector<80x64xf32>
    %340 = arith.mulf %339, %338 : vector<80x64xf32>
    %341 = arith.addf %336, %340 : vector<80x64xf32>
    %cst_238 = arith.constant 0.797884583 : f32
    %342 = vector.broadcast %cst_238 : f32 to vector<80x64xf32>
    %343 = arith.mulf %342, %341 : vector<80x64xf32>
    %344 = math.tanh %343 : vector<80x64xf32>
    %cst_239 = arith.constant 1.000000e+00 : f32
    %345 = vector.broadcast %cst_239 : f32 to vector<80x64xf32>
    %346 = arith.addf %345, %344 : vector<80x64xf32>
    %cst_240 = arith.constant 5.000000e-01 : f32
    %347 = vector.broadcast %cst_240 : f32 to vector<80x64xf32>
    %348 = arith.mulf %347, %346 : vector<80x64xf32>
    %349 = arith.mulf %336, %348 : vector<80x64xf32>
    %c1_241 = arith.constant 1 : index
    %c0_242 = arith.constant 0 : index
    %c0_243 = arith.constant 0 : index
    %350 = vector.load %arg33[%c1_241, %c0_242, %c0_243] : memref<2x64x32xf32, #tpu.memory_space<vmem>>, vector<1x64x32xf32>
    %351 = vector.shape_cast %350 : vector<1x64x32xf32> to vector<64x32xf32>
    %cst_244 = arith.constant dense<0.000000e+00> : vector<80x32xf32>
    %352 = tpu.matmul %349, %351, %cst_244 {dimension_numbers = #tpu.dot_dimension_numbers<[1], [0], [0], [1], [0, 0, 1, 1], [], []>} : vector<80x64xf32>, vector<64x32xf32>, vector<80x32xf32> -> vector<80x32xf32>
    %c1_245 = arith.constant 1 : index
    %c0_246 = arith.constant 0 : index
    %c0_247 = arith.constant 0 : index
    %353 = vector.load %arg34[%c1_245, %c0_246, %c0_247] : memref<2x1x32xf32, #tpu.memory_space<vmem>>, vector<1x1x32xf32>
    %354 = vector.shape_cast %353 : vector<1x1x32xf32> to vector<1x32xf32>
    %355 = vector.broadcast %354 : vector<1x32xf32> to vector<80x32xf32>
    %356 = arith.addf %352, %355 : vector<80x32xf32>
    %357 = arith.addf %356, %329 : vector<80x32xf32>
    %c1_248 = arith.constant 1 : index
    %c0_249 = arith.constant 0 : index
    %c0_250 = arith.constant 0 : index
    %358 = vector.load %arg35[%c1_248, %c0_249, %c0_250] : memref<2x1x32xf32, #tpu.memory_space<vmem>>, vector<1x1x32xf32>
    %359 = vector.shape_cast %358 : vector<1x1x32xf32> to vector<1x32xf32>
    %c1_251 = arith.constant 1 : index
    %c0_252 = arith.constant 0 : index
    %c0_253 = arith.constant 0 : index
    %360 = vector.load %arg36[%c1_251, %c0_252, %c0_253] : memref<2x1x32xf32, #tpu.memory_space<vmem>>, vector<1x1x32xf32>
    %361 = vector.shape_cast %360 : vector<1x1x32xf32> to vector<1x32xf32>
    %cst_254 = arith.constant dense<0.000000e+00> : vector<80xf32>
    %362 = vector.multi_reduction <add>, %357, %cst_254 [1] : vector<80x32xf32> to vector<80xf32>
    %363 = vector.shape_cast %362 : vector<80xf32> to vector<80x1xf32>
    %cst_255 = arith.constant 3.200000e+01 : f32
    %364 = vector.broadcast %cst_255 : f32 to vector<80x1xf32>
    %365 = arith.divf %363, %364 : vector<80x1xf32>
    %366 = vector.broadcast %365 : vector<80x1xf32> to vector<80x32xf32>
    %367 = arith.subf %357, %366 : vector<80x32xf32>
    %368 = arith.mulf %367, %367 : vector<80x32xf32>
    %cst_256 = arith.constant dense<0.000000e+00> : vector<80xf32>
    %369 = vector.multi_reduction <add>, %368, %cst_256 [1] : vector<80x32xf32> to vector<80xf32>
    %370 = vector.shape_cast %369 : vector<80xf32> to vector<80x1xf32>
    %cst_257 = arith.constant 3.200000e+01 : f32
    %371 = vector.broadcast %cst_257 : f32 to vector<80x1xf32>
    %372 = arith.divf %370, %371 : vector<80x1xf32>
    %cst_258 = arith.constant 9.99999997E-7 : f32
    %373 = vector.broadcast %cst_258 : f32 to vector<80x1xf32>
    %374 = arith.addf %372, %373 : vector<80x1xf32>
    %375 = math.rsqrt %374 : vector<80x1xf32>
    %376 = vector.broadcast %375 : vector<80x1xf32> to vector<80x32xf32>
    %377 = arith.mulf %367, %376 : vector<80x32xf32>
    %378 = vector.broadcast %359 : vector<1x32xf32> to vector<80x32xf32>
    %379 = arith.mulf %377, %378 : vector<80x32xf32>
    %380 = vector.broadcast %361 : vector<1x32xf32> to vector<80x32xf32>
    %381 = arith.addf %379, %380 : vector<80x32xf32>
    %382 = vector.extract_strided_slice %381 {offsets = [0, 0], sizes = [16, 32], strides = [1, 1]} : vector<80x32xf32> to vector<16x32xf32>
    %c0_259 = arith.constant 0 : index
    %c0_260 = arith.constant 0 : index
    %c0_261 = arith.constant 0 : index
    %383 = vector.load %arg37[%c0_259, %c0_260, %c0_261] : memref<2x16x32xf32, #tpu.memory_space<vmem>>, vector<1x16x32xf32>
    %384 = vector.shape_cast %383 : vector<1x16x32xf32> to vector<16x32xf32>
    %385 = vector.shape_cast %382 : vector<16x32xf32> to vector<1x16x32xf32>
    tpu.vector_store %arg37[%c0_259, %c0_260, %c0_261], %385 {strides = array<i32>} : memref<2x16x32xf32, #tpu.memory_space<vmem>>, vector<1x16x32xf32>,
    %386 = vector.extract_strided_slice %381 {offsets = [40, 0], sizes = [16, 32], strides = [1, 1]} : vector<80x32xf32> to vector<16x32xf32>
    %c1_262 = arith.constant 1 : index
    %c0_263 = arith.constant 0 : index
    %c0_264 = arith.constant 0 : index
    %387 = vector.load %arg37[%c1_262, %c0_263, %c0_264] : memref<2x16x32xf32, #tpu.memory_space<vmem>>, vector<1x16x32xf32>
    %388 = vector.shape_cast %387 : vector<1x16x32xf32> to vector<16x32xf32>
    %389 = vector.shape_cast %386 : vector<16x32xf32> to vector<1x16x32xf32>
    tpu.vector_store %arg37[%c1_262, %c0_263, %c0_264], %389 {strides = array<i32>} : memref<2x16x32xf32, #tpu.memory_space<vmem>>, vector<1x16x32xf32>,
    return
  }
}

</mosaic_0001>

<bundles_post_ra>
// kernel: encoder_forward.1
= control target key start
LH: loop header
LB: loop body
LE: loop exit
PB: predicated region body
PF: predicated region fallthrough
CT: control target
= control target key end

     0   :  { %s5574_s6 = smov 1   ;;  %s5575_s10 = smov 2   ;;  %s7735_s0 = inlined_call_operand.smem [shape: u32[38], index: -1, kind: input, shape index: {}] }
   0x1   :  { %s5623_s5 = sld [smem:[%s7735_s0]]   ;;  %s5576_s14 = smov 3  }
   0x2   :  { %s5628_s9 = sld [smem:[%s7735_s0 + %s5574_s6]]   ;;  %s5577_s18 = smov 4  }
   0x3   :  { %s5633_s13 = sld [smem:[%s7735_s0 + %s5575_s10]]   ;;  %s5578_s22 = smov 5  }
   0x4   :  { %s5638_s17 = sld [smem:[%s7735_s0 + %s5576_s14]]   ;;  %s5579_s26 = smov 6  }
   0x5   :  { %s5643_s21 = sld [smem:[%s7735_s0 + %s5577_s18]]   ;;  %s5580_s30 = smov 7  }
   0x6   :  { %s5648_s25 = sld [smem:[%s7735_s0 + %s5578_s22]]   ;;  %s5581_s4 = smov 8  }
   0x7   :  { %s5653_s29 = sld [smem:[%s7735_s0 + %s5579_s26]]   ;;  %s5582_s10 = smov 9  }
   0x8   :  { %s5658_s3 = sld [smem:[%s7735_s0 + %s5580_s30]]   ;;  %s5583_s15 = smov 10  }
   0x9   :  { %s5663_s8 = sld [smem:[%s7735_s0 + %s5581_s4]]   ;;  %s5584_s20 = smov 11  }
   0xa   :  { %s5668_s14 = sld [smem:[%s7735_s0 + %s5582_s10]]   ;;  %s5585_s26 = smov 12  }
   0xb   :  { %s5673_s19 = sld [smem:[%s7735_s0 + %s5583_s15]]   ;;  %s5586_s1 = smov 13  }
   0xc   :  { %s5678_s24 = sld [smem:[%s7735_s0 + %s5584_s20]]   ;;  %s5587_s7 = smov 14  }
   0xd   :  { %s5683_s30 = sld [smem:[%s7735_s0 + %s5585_s26]]   ;;  %s5588_s15 = smov 15  }
   0xe   :  { %s5688_s6 = sld [smem:[%s7735_s0 + %s5586_s1]]   ;;  %s5589_s22 = smov 16  }
   0xf   :  { %s5693_s12 = sld [smem:[%s7735_s0 + %s5587_s7]]   ;;  %s5590_s28 = smov 17  }
  0x10   :  { %s5698_s20 = sld [smem:[%s7735_s0 + %s5588_s15]]   ;;  %s5591_s7 = smov 18  }
  0x11   :  { %s5703_s27 = sld [smem:[%s7735_s0 + %s5589_s22]]   ;;  %s5592_s15 = smov 19  }
  0x12   :  { %s5708_s4 = sld [smem:[%s7735_s0 + %s5590_s28]]   ;;  %s5593_s22 = smov 20  }
  0x13   :  { %s5594_s28 = smov 21  }
  0x15   :  { %7751 = sst [smem:[#allocation5_spill]] %s5693_s12 }
  0x16   :  { %7752 = sst [smem:[#allocation6_spill]] %s5698_s20 }
  0x17   :  { %7753 = sst [smem:[#allocation7_spill]] %s5703_s27 }
  0x18   :  { %7754 = sst [smem:[#allocation8_spill]] %s5708_s4 }
  0x19   :  { %s5713_s12 = sld [smem:[%s7735_s0 + %s5591_s7]]   ;;  %s5595_s7 = smov 22  }
  0x1a   :  { %s5718_s20 = sld [smem:[%s7735_s0 + %s5592_s15]]   ;;  %s5596_s15 = smov 23  }
  0x1b   :  { %s5723_s27 = sld [smem:[%s7735_s0 + %s5593_s22]]   ;;  %s5597_s22 = smov 24  }
  0x1c   :  { %s5728_s4 = sld [smem:[%s7735_s0 + %s5594_s28]]   ;;  %s5598_s28 = smov 25  }
  0x1f   :  { %7755 = sst [smem:[#allocation9_spill]] %s5713_s12 }
  0x20   :  { %7756 = sst [smem:[#allocation10_spill]] %s5718_s20 }
  0x21   :  { %7757 = sst [smem:[#allocation11_spill]] %s5723_s27 }
  0x22   :  { %7758 = sst [smem:[#allocation12_spill]] %s5728_s4 }
  0x23   :  { %s5733_s12 = sld [smem:[%s7735_s0 + %s5595_s7]]   ;;  %s5599_s7 = smov 26  }
  0x24   :  { %s5738_s20 = sld [smem:[%s7735_s0 + %s5596_s15]]   ;;  %s5600_s15 = smov 27  }
  0x25   :  { %s5743_s27 = sld [smem:[%s7735_s0 + %s5597_s22]]   ;;  %s5601_s22 = smov 28  }
  0x26   :  { %s5748_s4 = sld [smem:[%s7735_s0 + %s5598_s28]]   ;;  %s5602_s28 = smov 29  }
  0x29   :  { %7759 = sst [smem:[#allocation13_spill]] %s5733_s12 }
  0x2a   :  { %7760 = sst [smem:[#allocation14_spill]] %s5738_s20 }
  0x2b   :  { %7761 = sst [smem:[#allocation15_spill]] %s5743_s27 }
  0x2c   :  { %7762 = sst [smem:[#allocation16_spill]] %s5748_s4 }
  0x2d   :  { %s5753_s12 = sld [smem:[%s7735_s0 + %s5599_s7]]   ;;  %s5603_s7 = smov 30  }
  0x2e   :  { %s5758_s20 = sld [smem:[%s7735_s0 + %s5600_s15]]   ;;  %s5604_s15 = smov 31  }
  0x2f   :  { %s5763_s27 = sld [smem:[%s7735_s0 + %s5601_s22]]   ;;  %s5605_s22 = smov 32  }
  0x30   :  { %s5768_s4 = sld [smem:[%s7735_s0 + %s5602_s28]]   ;;  %s5606_s28 = smov 33  }
  0x33   :  { %7763 = sst [smem:[#allocation17_spill]] %s5753_s12 }
  0x34   :  { %7764 = sst [smem:[#allocation18_spill]] %s5758_s20 }
  0x35   :  { %7765 = sst [smem:[#allocation19_spill]] %s5763_s27 }
  0x36   :  { %7766 = sst [smem:[#allocation20_spill]] %s5768_s4 }
  0x37   :  { %s5773_s12 = sld [smem:[%s7735_s0 + %s5603_s7]]   ;;  %s5607_s7 = smov 34  }
  0x38   :  { %s5778_s20 = sld [smem:[%s7735_s0 + %s5604_s15]]   ;;  %s5608_s15 = smov 35  }
  0x39   :  { %s5783_s27 = sld [smem:[%s7735_s0 + %s5605_s22]]   ;;  %s5609_s22 = smov 36  }
  0x3a   :  { %s5788_s4 = sld [smem:[%s7735_s0 + %s5606_s28]]   ;;  %s5610_s28 = smov 37  }
  0x3d   :  { %7767 = sst [smem:[#allocation21_spill]] %s5773_s12 }
  0x3e   :  { %7768 = sst [smem:[#allocation22_spill]] %s5778_s20 }
  0x3f   :  { %7769 = sst [smem:[#allocation23_spill]] %s5783_s27 }
  0x40   :  { %7770 = sst [smem:[#allocation24_spill]] %s5788_s4 }
  0x41   :  { %s5793_s12 = sld [smem:[%s7735_s0 + %s5607_s7]]  }
  0x42   :  { %s5798_s20 = sld [smem:[%s7735_s0 + %s5608_s15]]  }
  0x43   :  { %s5803_s27 = sld [smem:[%s7735_s0 + %s5609_s22]]  }
  0x44   :  { %s5808_s4 = sld [smem:[%s7735_s0 + %s5610_s28]]  }
  0x45   :  { %v160_v0 = vld [vmem:[%s5633_s13 + $0x8] sm:$0xf]  ;;  %vm179_vm0 = vcmask 1043456   ;;  %v165_v1 = vld [vmem:[%s5638_s17] sm:$0xf]  ;;  %vm166_vm1 = vcmask 31744  }
  0x46   :  { %v159_v2 = vld [vmem:[%s5633_s13] sm:$0xff]  ;;  %4759 = vmatpush.msk.msra.mxu1 %vm179_vm0, %v160_v0  ;;  %4754 = vmatpush.msk.msra.mxu0 %vm179_vm0, %v165_v1  ;;  %vm212_vm2 = vcmask 97280   ;;  %v268_v5 = vld [vmem:[%s5648_s25 + $0x18] sm:$0xff]  ;;  %v162_v6 = vld [vmem:[%s5628_s9 + $0x8] sm:$0xff] }
  0x47   :  { %v161_v3 = vld [vmem:[%s5628_s9] sm:$0xff]  ;;  %298 = vmatpush.msra.mxu2 %v268_v5  ;;  %v156_v7 = vld [vmem:[%s5623_s5 + $0x8] sm:$0xff] }
  0x48   :  { %v155_v4 = vld [vmem:[%s5623_s5] sm:$0xff]  ;;  %4755 = vmatmul.msk.f32.vlgmr.msra.gmra.mxu0 %vm166_vm1, %v161_v3  ;;  %243 = vmatpush.msra.mxu1 %v159_v2 }
  0x49   :  { %4760 = vmatmul.msk.f32.vlgmr.msra.gmra.mxu1 %vm212_vm2, %v155_v4 }
  0x50   :  { %4756 = vmatmul.msk.f32.gmra.mxu0 %vm166_vm1, %v162_v6 }
  0x51   :  { %80 = vsyncpa [#allocation3], 0  ;;  %4761 = vmatmul.msk.f32.gmra.mxu1 %vm212_vm2, %v156_v7  ;;  %v163_v8 = vld [vmem:[%s5628_s9 + $0x10] sm:$0xff]  ;;  %v164_v10 = vld [vmem:[%s5628_s9 + $0x18] sm:$0xff]  ;;  %vm273_vm3 = vcmask 261120   ;;  %vm317_vm4 = vcmask 130048  }
  0x52   :  { %v157_v9 = vld [vmem:[%s5623_s5 + $0x10] sm:$0xff]  ;;  %v158_v11 = vld [vmem:[%s5623_s5 + $0x18] sm:$0xff]  ;;  %v266_v13 = vld [vmem:[%s5648_s25 + $0x8] sm:$0xff]  ;;  %s7771_s0 = sld [smem:[#allocation7_spill]]  ;;  %vm636_vm8 = vcmask 64512   ;;  %s5564_s23 = scalar_lea.hbm %s5808_s4, 32 }
  0x53   :  { %v267_v12 = vld [vmem:[%s5648_s25 + $0x10] sm:$0xff]  ;;  %v265_v14 = vld [vmem:[%s5648_s25] sm:$0xff]  ;;  %v258_v22 = vld [vmem:[%s5643_s21 + $0x8] sm:$0xff]  ;;  %s7772_s5 = sld [smem:[#allocation6_spill]] }
  0x54   :  { %299 = vmatpush.msra.mxu2 %v267_v12  ;;  %v257_v17 = vld [vmem:[%s5643_s21] sm:$0xff]  ;;  %v259_v27 = vld [vmem:[%s5643_s21 + $0x10] sm:$0xff]  ;;  %v260_v32 = vld [vmem:[%s5643_s21 + $0x18] sm:$0xff]  ;;  %s7773_s9 = sld [smem:[#allocation5_spill]] }
  0x55   :  { %v316_v35 = vld [vmem:[%s5658_s3 + $0x8] sm:$0xff]  ;;  %v315_v37 = vld [vmem:[%s5658_s3] sm:$0xff]  ;;  %v4783_v60 = vld [vmem:[%s5658_s3 + $0x18] sm:$0xff]  ;;  %s7774_s13 = sld [smem:[#allocation8_spill]] }
  0x56   :  { %300 = vmatpush.msra.mxu2 %v266_v13  ;;  %v360_v36 = vld [vmem:[%s5663_s8 + $0x8] sm:$0xff]  ;;  %344 = vmatpush.msra.mxu3 %v316_v35  ;;  %v359_v38 = vld [vmem:[%s5663_s8] sm:$0xff]  ;;  %v4787_v61 = vld [vmem:[%s5663_s8 + $0x18] sm:$0xff]  ;;  %s7775_s17 = sld [smem:[#allocation9_spill]] }
  0x57   :  { %375 = vmatpush.msrb.mxu0 %v360_v36  ;;  %v5219_v39 = vld [vmem:[%s5653_s29] ss:$0 sm:$0xff]  ;;  %v393_v58 = vld [vmem:[%s5678_s24 + $0x8] sm:$0xff]  ;;  %v4782_v62 = vld [vmem:[%s5658_s3 + $0x10] sm:$0xff]  ;;  %s7776_s21 = sld [smem:[#allocation10_spill]] }
  0x58   :  { %4757 = vmatmul.msk.f32.gmra.mxu0 %vm166_vm1, %v163_v8  ;;  %301 = vmatpush.msra.mxu2 %v265_v14  ;;  %v392_v55 = vld [vmem:[%s5678_s24] sm:$0xff]  ;;  %v391_v59 = vld [vmem:[%s5673_s19 + $0x8] sm:$0xff]  ;;  %v4786_v63 = vld [vmem:[%s5663_s8 + $0x10] sm:$0xff]  ;;  %s7777_s25 = sld [smem:[#allocation11_spill]] }
  0x59   :  { %4762 = vmatmul.msk.f32.gmra.mxu1 %vm212_vm2, %v157_v9  ;;  %345 = vmatpush.msra.mxu3 %v315_v37  ;;  %v390_v57 = vld [vmem:[%s5673_s19] sm:$0xff]  ;;  %s7778_s29 = sld [smem:[#allocation12_spill]] }
  0x5a   :  { %376 = vmatpush.msrb.mxu0 %v359_v38  ;;  %491 = vmatpush.msrb.mxu2 %v4783_v60  ;;  %v5220_v1 = vld [vmem:[%s5668_s14] ss:$0 sm:$0xff]  ;;  %s7782_s19 = sld [smem:[#allocation14_spill]] }
  0x5b   :  { %s7783_s24 = sld [smem:[#allocation15_spill]] }
  0x5c   :  { %492 = vmatpush.msrb.mxu2 %v4782_v62  ;;  %s7786_s7 = sld [smem:[#allocation22_spill]] }
  0x5d   :  { %v777_v62 = vld [vmem:[%s7776_s21 + $0x8] sm:$0xff]  ;;  %s7787_s10 = sld [smem:[#allocation20_spill]] }
  0x5e   :  { %v940_v60 = vld [vmem:[%s7777_s25] sm:$0xff]  ;;  %s7788_s11 = sld [smem:[#allocation21_spill]] }
  0x5f   :  { %s7789_s15 = sld [smem:[#allocation24_spill]] }
  0x60   :  { %4758 = vmatmul.msk.f32.gmra.mxu0 %vm166_vm1, %v164_v10  ;;  %s7790_s16 = sld [smem:[#allocation23_spill]] }
  0x61   :  { %4763 = vmatmul.msk.f32.gmra.mxu1 %vm212_vm2, %v158_v11 }
  0xc5   :  { %v200_v15 = vpop.f32.mrf.mxu0 }
  0xc6   :  { %v245_v16 = vpop.f32.mrf.mxu1 }
  0xc7   :  { %v246_v18 = vadd.f32 %v245_v16, %v200_v15 }
  0xc9   :  { %v5836_v19 = vadd.f32 %v257_v17, %v246_v18 }
  0xcb   :  { %4764 = vmatmul.msk.f32.vlgmr.msra.gmra.mxu2 %vm273_vm3, %v5836_v19 }
  0xcd   :  { %v203_v20 = vpop.f32.mrf.mxu0 }
  0xce   :  { %v248_v21 = vpop.f32.mrf.mxu1 }
  0xcf   :  { %v249_v23 = vadd.f32 %v248_v21, %v203_v20  ;;  %v527_v21 = vld [vmem:[%s5688_s6] sm:$0xff]  ;;  %s7785_s6 = sld [smem:[#allocation19_spill]] }
  0xd1   :  { %v5841_v24 = vadd.f32 %v258_v22, %v249_v23  ;;  %v526_v23 = vld [vmem:[%s5683_s30] sm:$0xff]  ;;  %s7784_s30 = sld [smem:[#allocation18_spill]] }
  0xd3   :  { %4765 = vmatmul.msk.f32.gmra.mxu2 %vm273_vm3, %v5841_v24 }
  0xd5   :  { %v206_v25 = vpop.f32.mrf.mxu0 }
  0xd6   :  { %v251_v26 = vpop.f32.mrf.mxu1 }
  0xd7   :  { %v252_v28 = vadd.f32 %v251_v26, %v206_v25  ;;  %v4798_v25 = vld [vmem:[%s5663_s8 + $0x28] sm:$0xff]  ;;  %v4797_v26 = vld [vmem:[%s5663_s8 + $0x20] sm:$0xff]  ;;  %s7780_s8 = sld [smem:[#allocation17_spill]] }
  0xd9   :  { %v5846_v29 = vadd.f32 %v259_v27, %v252_v28  ;;  %v4795_v27 = vld [vmem:[%s5658_s3 + $0x28] sm:$0xff] }
  0xda   :  { %v695_v28 = vld [vmem:[%s7771_s0 + $0x8] sm:$0xff] }
  0xdb   :  { %4766 = vmatmul.msk.f32.gmra.mxu2 %vm273_vm3, %v5846_v29 }
  0xdd   :  { %v209_v30 = vpop.f32.mrf.mxu0 }
  0xde   :  { %v254_v31 = vpop.f32.mrf.mxu1 }
  0xdf   :  { %v255_v33 = vadd.f32 %v254_v31, %v209_v30  ;;  %v4794_v30 = vld [vmem:[%s5658_s3 + $0x20] sm:$0xff]  ;;  %s7779_s3 = sld [smem:[#allocation16_spill]] }
  0xe0   :  { %v694_v31 = vld [vmem:[%s7771_s0] sm:$0xff] }
  0xe1   :  { %v5851_v34 = vadd.f32 %v260_v32, %v255_v33  ;;  %v5221_v33 = vld [vmem:[%s5668_s14 + $0x1] ss:$0 sm:$0xff] }
  0xe3   :  { %4767 = vmatmul.msk.f32.gmra.mxu2 %vm273_vm3, %v5851_v34 }
 0x14e   :  { %v303_v40 = vpop.f32.mrf.mxu2 }
 0x14f   :  { %v304_v41 = vadd.f32 %v5219_v39, %v303_v40 }
 0x151   :  { %4768 = vmatmul.msk.f32.vlgmr.msra.gmra.mxu3 %vm317_vm4, %v304_v41  ;;  %4772 = vmatmul.msk.f32.vlgmr.msrb.gmra.mxu0 %vm317_vm4, %v304_v41 }
 0x156   :  { %v306_v42 = vpop.f32.mrf.mxu2 }
 0x157   :  { %v307_v43 = vadd.f32 %v5219_v39, %v306_v42  ;;  %v635_v42 = vld [vmem:[%s7772_s5] sm:$0xf] }
 0x159   :  { %4769 = vmatmul.msk.f32.gmra.mxu3 %vm317_vm4, %v307_v43  ;;  %4773 = vmatmul.msk.f32.gmra.mxu0 %vm317_vm4, %v307_v43  ;;  %v634_v43 = vld [vmem:[%s7773_s9] sm:$0xf] }
 0x15e   :  { %v309_v44 = vpop.f32.mrf.mxu2 }
 0x15f   :  { %v310_v45 = vadd.f32 %v5219_v39, %v309_v44 }
 0x161   :  { %4770 = vmatmul.msk.f32.gmra.mxu3 %vm317_vm4, %v310_v45  ;;  %4774 = vmatmul.msk.f32.gmra.mxu0 %vm317_vm4, %v310_v45 }
 0x166   :  { %v312_v46 = vpop.f32.mrf.mxu2 }
 0x167   :  { %v313_v47 = vadd.f32 %v5219_v39, %v312_v46 }
 0x169   :  { %4771 = vmatmul.msk.f32.gmra.mxu3 %vm317_vm4, %v313_v47  ;;  %4775 = vmatmul.msk.f32.gmra.mxu0 %vm317_vm4, %v313_v47 }
 0x1ce   :  { %v378_v48 = vpop.f32.mrf.mxu0 }
 0x1d4   :  { %v347_v49 = vpop.f32.mrf.mxu3 }
 0x1d6   :  { %v381_v50 = vpop.f32.mrf.mxu0 }
 0x1dc   :  { %v350_v51 = vpop.f32.mrf.mxu3 }
 0x1de   :  { %v384_v52 = vpop.f32.mrf.mxu0 }
 0x1e4   :  { %v353_v53 = vpop.f32.mrf.mxu3 }
 0x1e6   :  { %v387_v54 = vpop.f32.mrf.mxu0 }
 0x1e7   :  { %412 = vmatpush.msrb.mxu1 %v387_v54 }
 0x1e9   :  { %413 = vmatpush.msrb.mxu1 %v384_v52 }
 0x1eb   :  { %414 = vmatpush.msrb.mxu1 %v381_v50 }
 0x1ec   :  { %v356_v56 = vpop.f32.mrf.mxu3 }
 0x1ed   :  { %415 = vmatpush.msrb.mxu1 %v378_v48  ;;  %441 = vmatpush.msrb.mxu3 %v356_v56 }
 0x1ee   :  { %4776 = vmatmul.msk.f32.vlgmr.msrb.gmra.mxu1 %vm273_vm3, %v392_v55 }
 0x1ef   :  { %442 = vmatpush.msrb.mxu3 %v353_v53  ;;  %517 = vmatpush.msra.mxu1 %v4787_v61  ;;  %v767_v61 = vld [vmem:[%s7775_s17 + $0x8] sm:$0xff] }
 0x1f1   :  { %443 = vmatpush.msrb.mxu3 %v350_v51  ;;  %518 = vmatpush.msra.mxu1 %v4786_v63  ;;  %v941_v63 = vld [vmem:[%s7777_s25 + $0x8] sm:$0xff] }
 0x1f3   :  { %444 = vmatpush.msrb.mxu3 %v347_v49  ;;  %v5223_v49 = vld [vmem:[%s5668_s14 + $0x2] ss:$0 sm:$0xff]  ;;  %s7781_s14 = sld [smem:[#allocation13_spill]] }
 0x1f4   :  { %4778 = vmatmul.msk.f32.vlgmr.msrb.gmra.mxu3 %vm273_vm3, %v390_v57 }
 0x1f6   :  { %4777 = vmatmul.msk.f32.gmra.mxu1 %vm273_vm3, %v393_v58  ;;  %v766_v58 = vld [vmem:[%s7775_s17] sm:$0xff] }
 0x1fc   :  { %4779 = vmatmul.msk.f32.gmra.mxu3 %vm273_vm3, %v391_v59  ;;  %v776_v59 = vld [vmem:[%s7776_s21] sm:$0xff] }
 0x26b   :  { %v417_v0 = vpop.f32.mrf.mxu1 }
 0x273   :  { %v420_v6 = vpop.f32.mrf.mxu1 }
 0x277   :  { %v446_v2 = vpop.f32.mrf.mxu3 }
 0x278   :  { %v447_v3 = vadd.f32 %v446_v2, %v417_v0  ;;  %v768_v0 = vld [vmem:[%s7775_s17 + $0x10] sm:$0xff] }
 0x279   :  { %v942_v2 = vld [vmem:[%s7777_s25 + $0x10] sm:$0xff] }
 0x27a   :  { %v456_v4 = vadd.f32 %v5220_v1, %v447_v3  ;;  %v769_v3 = vld [vmem:[%s7775_s17 + $0x18] sm:$0xff] }
 0x27c   :  { %v460_v5 = vmul.f32 1.442695, %v456_v4  ;;  %vm458_vm5 = vcmp.gt.f32.partialorder %v456_v4, 0.0 }
 0x27e   :  { %5240 = vpow2.f32 %v460_v5  ;;  %v943_v5 = vld [vmem:[%s7777_s25 + $0x18] sm:$0xff] }
 0x27f   :  { %v449_v7 = vpop.f32.mrf.mxu3 }
 0x280   :  { %v450_v8 = vadd.f32 %v449_v7, %v420_v6  ;;  %v770_v6 = vld [vmem:[%s7775_s17 + $0x20] sm:$0xff] }
 0x282   :  { %v457_v9 = vadd.f32 %v5220_v1, %v450_v8  ;;  %v778_v1 = vld [vmem:[%s7776_s21 + $0x10] sm:$0xff] }
 0x284   :  { %v5241_v10 = vpop.eup %5240  ;;  %v462_v11 = vmul.f32 1.442695, %v457_v9  ;;  %vm459_vm6 = vcmp.gt.f32.partialorder %v457_v9, 0.0 }
 0x285   :  { %v4780_v12 = vadd.f32 -1.0, %v5241_v10  ;;  %v780_v10 = vld [vmem:[%s7776_s21 + $0x20] sm:$0xff] }
 0x286   :  { %5242 = vpow2.f32 %v462_v11  ;;  %v944_v11 = vld [vmem:[%s7777_s25 + $0x20] sm:$0xff] }
 0x287   :  { %v466_v13 = vsel %vm458_vm5, %v456_v4, %v4780_v12  ;;  %v779_v4 = vld [vmem:[%s7776_s21 + $0x18] sm:$0xff]  ;;  %v771_v12 = vld [vmem:[%s7775_s17 + $0x28] sm:$0xff] }
 0x288   :  { %4784 = vmatmul.msk.f32.vlgmr.msrb.gmra.mxu2 %vm317_vm4, %v466_v13  ;;  %4788 = vmatmul.msk.f32.vlgmr.msra.gmra.mxu1 %vm317_vm4, %v466_v13 }
 0x28c   :  { %v5243_v14 = vpop.eup %5242 }
 0x28d   :  { %v4781_v15 = vadd.f32 -1.0, %v5243_v14  ;;  %v781_v14 = vld [vmem:[%s7776_s21 + $0x28] sm:$0xff] }
 0x28f   :  { %v467_v16 = vsel %vm459_vm6, %v457_v9, %v4781_v15  ;;  %v1037_v9 = vld [vmem:[%s7778_s29] sm:$0xff]  ;;  %v945_v15 = vld [vmem:[%s7777_s25 + $0x28] sm:$0xff] }
 0x290   :  { %4785 = vmatmul.msk.f32.gmra.mxu2 %vm317_vm4, %v467_v16  ;;  %4789 = vmatmul.msk.f32.gmra.mxu1 %vm317_vm4, %v467_v16 }
 0x305   :  { %v520_v17 = vpop.f32.mrf.mxu1 }
 0x30b   :  { %v494_v18 = vpop.f32.mrf.mxu2 }
 0x30d   :  { %v523_v20 = vpop.f32.mrf.mxu1 }
 0x30e   :  { %545 = vmatpush.msra.mxu3 %v523_v20  ;;  %v946_v20 = vld [vmem:[%s7777_s25 + $0x30] sm:$0xff] }
 0x310   :  { %546 = vmatpush.msra.mxu3 %v520_v17  ;;  %v1039_v17 = vld [vmem:[%s7778_s29 + $0x10] sm:$0xff] }
 0x311   :  { %4790 = vmatmul.msk.f32.vlgmr.msra.gmra.mxu3 %vm317_vm4, %v527_v21  ;;  %v1040_v21 = vld [vmem:[%s7778_s29 + $0x18] sm:$0xff] }
 0x312   :  { %605 = vmatpush.msrb.mxu3 %v4795_v27  ;;  %v1044_v27 = vld [vmem:[%s7778_s29 + $0x38] sm:$0xff] }
 0x313   :  { %v497_v22 = vpop.f32.mrf.mxu2 }
 0x314   :  { %568 = vmatpush.msra.mxu2 %v497_v22  ;;  %606 = vmatpush.msrb.mxu3 %v4794_v30  ;;  %v1041_v22 = vld [vmem:[%s7778_s29 + $0x20] sm:$0xff] }
 0x315   :  { %v774_v30 = vld [vmem:[%s7775_s17 + $0x40] sm:$0xff] }
 0x316   :  { %569 = vmatpush.msra.mxu2 %v494_v18  ;;  %714 = vmatpush.msra.mxu3 %v695_v28  ;;  %v782_v18 = vld [vmem:[%s7776_s21 + $0x30] sm:$0xff] }
 0x317   :  { %4791 = vmatmul.msk.f32.vlgmr.msra.gmra.mxu2 %vm317_vm4, %v526_v23  ;;  %v1042_v23 = vld [vmem:[%s7778_s29 + $0x28] sm:$0xff] }
 0x318   :  { %628 = vmatpush.msrb.mxu2 %v4798_v25  ;;  %715 = vmatpush.msra.mxu3 %v694_v31  ;;  %v1043_v25 = vld [vmem:[%s7778_s29 + $0x30] sm:$0xff] }
 0x31a   :  { %629 = vmatpush.msrb.mxu2 %v4797_v26  ;;  %v773_v26 = vld [vmem:[%s7775_s17 + $0x38] sm:$0xff] }
 0x31c   :  { %737 = vmatpush.msra.mxu2 %v695_v28 }
 0x31e   :  { %738 = vmatpush.msra.mxu2 %v694_v31 }
 0x394   :  { %v548_v32 = vpop.f32.mrf.mxu3 }
 0x39a   :  { %v571_v35 = vpop.f32.mrf.mxu2 }
 0x39b   :  { %v572_v36 = vadd.f32 %v571_v35, %v548_v32  ;;  %v1045_v32 = vld [vmem:[%s7778_s29 + $0x40] sm:$0xff] }
 0x39c   :  { %v784_v35 = vld [vmem:[%s7776_s21 + $0x40] sm:$0xff] }
 0x39d   :  { %v579_v37 = vadd.f32 %v5221_v33, %v572_v36  ;;  %v775_v36 = vld [vmem:[%s7775_s17 + $0x48] sm:$0xff] }
 0x39f   :  { %v581_v38 = vmul.f32 1.442695, %v579_v37  ;;  %vm580_vm7 = vcmp.gt.f32.partialorder %v579_v37, 0.0 }
 0x3a1   :  { %5244 = vpow2.f32 %v581_v38 }
 0x3a7   :  { %v5245_v39 = vpop.eup %5244 }
 0x3a8   :  { %v4793_v40 = vadd.f32 -1.0, %v5245_v39 }
 0x3aa   :  { %v584_v41 = vsel %vm580_vm7, %v579_v37, %v4793_v40  ;;  %v948_v37 = vld [vmem:[%s7777_s25 + $0x40] sm:$0xff]  ;;  %v1046_v40 = vld [vmem:[%s7778_s29 + $0x48] sm:$0xff] }
 0x3ab   :  { %4796 = vmatmul.msk.f32.vlgmr.msrb.gmra.mxu3 %vm317_vm4, %v584_v41  ;;  %4799 = vmatmul.msk.f32.vlgmr.msrb.gmra.mxu2 %vm317_vm4, %v584_v41 }
 0x3ac   :  { %905 = vmatpush.msrb.mxu2 %v5851_v34 }
 0x3ae   :  { %906 = vmatpush.msrb.mxu2 %v5846_v29 }
 0x3b0   :  { %907 = vmatpush.msrb.mxu2 %v5841_v24 }
 0x3b2   :  { %908 = vmatpush.msrb.mxu2 %v5836_v19  ;;  %v5222_v19 = vld [vmem:[%s7774_s13] ss:$0 sm:$0xff] }
 0x3b3   :  { %4804 = vmatmul.msk.f32.vlgmr.msra.gmra.mxu3 %vm317_vm4, %v466_v13  ;;  %4806 = vmatmul.msk.f32.vlgmr.msra.gmra.mxu2 %vm317_vm4, %v584_v41  ;;  %v1038_v13 = vld [vmem:[%s7778_s29 + $0x8] sm:$0xff] }
 0x3b4   :  { %v785_v41 = vld [vmem:[%s7776_s21 + $0x48] sm:$0xff] }
 0x3bb   :  { %4805 = vmatmul.msk.f32.gmra.mxu3 %vm317_vm4, %v467_v16  ;;  %4818 = vmatmul.msk.f32.vlgmr.msrb.gmra.mxu2 %vm273_vm3, %v766_v58  ;;  %v772_v16 = vld [vmem:[%s7775_s17 + $0x30] sm:$0xff] }
 0x3c3   :  { %4819 = vmatmul.msk.f32.gmra.mxu2 %vm273_vm3, %v767_v61 }
 0x3cb   :  { %4820 = vmatmul.msk.f32.gmra.mxu2 %vm273_vm3, %v768_v0 }
 0x3d3   :  { %4821 = vmatmul.msk.f32.gmra.mxu2 %vm273_vm3, %v769_v3 }
 0x3db   :  { %4822 = vmatmul.msk.f32.gmra.mxu2 %vm273_vm3, %v770_v6 }
 0x3e3   :  { %4823 = vmatmul.msk.f32.gmra.mxu2 %vm273_vm3, %v771_v12 }
 0x3eb   :  { %4824 = vmatmul.msk.f32.gmra.mxu2 %vm273_vm3, %v772_v16 }
 0x3f3   :  { %4825 = vmatmul.msk.f32.gmra.mxu2 %vm273_vm3, %v773_v26 }
 0x3fb   :  { %4826 = vmatmul.msk.f32.gmra.mxu2 %vm273_vm3, %v774_v30 }
 0x403   :  { %4827 = vmatmul.msk.f32.gmra.mxu2 %vm273_vm3, %v775_v36 }
 0x42e   :  { %v608_v44 = vpop.f32.mrf.mxu3  ;;  %v631_v45 = vpop.f32.mrf.mxu2 }
 0x42f   :  { %655 = vmatpush.msra.mxu0 %v631_v45  ;;  %678 = vmatpush.msrb.mxu1 %v608_v44 }
 0x430   :  { %4800 = vmatmul.msk.f32.vlgmr.msra.gmra.mxu0 %vm636_vm8, %v635_v42  ;;  %4801 = vmatmul.msk.f32.vlgmr.msrb.gmra.mxu1 %vm636_vm8, %v634_v43  ;;  %v949_v42 = vld [vmem:[%s7777_s25 + $0x48] sm:$0xff] }
 0x431   :  { %760 = vmatpush.msrb.mxu0 %v695_v28  ;;  %v783_v28 = vld [vmem:[%s7776_s21 + $0x38] sm:$0xff] }
 0x433   :  { %761 = vmatpush.msrb.mxu0 %v694_v31  ;;  %v947_v31 = vld [vmem:[%s7777_s25 + $0x38] sm:$0xff] }
 0x436   :  { %v717_v24 = vpop.f32.mrf.mxu3  ;;  %v740_v29 = vpop.f32.mrf.mxu2 }
 0x437   :  { %v741_v34 = vadd.f32 %v5222_v19, %v740_v29  ;;  %v718_v48 = vadd.f32 %v5222_v19, %v717_v24 }
 0x439   :  { %995 = vmatpush.msra.mxu0 %v741_v34 }
 0x43e   :  { %v720_v46 = vpop.f32.mrf.mxu3  ;;  %v910_v38 = vpop.f32.mrf.mxu2 }
 0x43f   :  { %v721_v47 = vadd.f32 %v5222_v19, %v720_v46 }
 0x441   :  { %830 = vmatpush.msra.mxu1 %v721_v47 }
 0x443   :  { %831 = vmatpush.msra.mxu1 %v718_v48 }
 0x444   :  { %4808 = vmatmul.msk.f32.vlgmr.msra.gmra.mxu1 %vm317_vm4, %v776_v59 }
 0x446   :  { %v913_v44 = vpop.f32.mrf.mxu2 }
 0x44c   :  { %4809 = vmatmul.msk.f32.gmra.mxu1 %vm317_vm4, %v777_v62 }
 0x44e   :  { %v916_v34 = vpop.f32.mrf.mxu2 }
 0x454   :  { %4810 = vmatmul.msk.f32.gmra.mxu1 %vm317_vm4, %v778_v1 }
 0x45c   :  { %4811 = vmatmul.msk.f32.gmra.mxu1 %vm317_vm4, %v779_v4 }
 0x464   :  { %4812 = vmatmul.msk.f32.gmra.mxu1 %vm317_vm4, %v780_v10 }
 0x46c   :  { %4813 = vmatmul.msk.f32.gmra.mxu1 %vm317_vm4, %v781_v14 }
 0x474   :  { %4814 = vmatmul.msk.f32.gmra.mxu1 %vm317_vm4, %v782_v18 }
 0x47c   :  { %4815 = vmatmul.msk.f32.gmra.mxu1 %vm317_vm4, %v783_v28 }
 0x484   :  { %4816 = vmatmul.msk.f32.gmra.mxu1 %vm317_vm4, %v784_v35 }
 0x48c   :  { %4817 = vmatmul.msk.f32.gmra.mxu1 %vm317_vm4, %v785_v41 }
 0x4ad   :  { %v657_v50 = vpop.f32.mrf.mxu0  ;;  %v680_v51 = vpop.f32.mrf.mxu1 }
 0x4ae   :  { %v681_v52 = vadd.f32 %v680_v51, %v657_v50 }
 0x4b0   :  { %v688_v53 = vadd.f32 %v5223_v49, %v681_v52 }
 0x4b2   :  { %v690_v54 = vmul.f32 1.442695, %v688_v53  ;;  %vm689_vm9 = vcmp.gt.f32.partialorder %v688_v53, 0.0 }
 0x4b4   :  { %5246 = vpow2.f32 %v690_v54  ;;  %v919_v54 = vpop.f32.mrf.mxu2 }
 0x4ba   :  { %v5247_v55 = vpop.eup %5246 }
 0x4bb   :  { %v4803_v56 = vadd.f32 -1.0, %v5247_v55 }
 0x4bc   :  { %v922_v0 = vpop.f32.mrf.mxu2 }
 0x4bd   :  { %v693_v57 = vsel %vm689_vm9, %v688_v53, %v4803_v56 }
 0x4be   :  { %4807 = vmatmul.msk.f32.vlgmr.msrb.gmra.mxu0 %vm317_vm4, %v693_v57 }
 0x4c1   :  { %v833_v33 = vpop.f32.mrf.mxu1 }
 0x4c6   :  { %4828 = vmatmul.msk.f32.vlgmr.msra.gmra.mxu0 %vm636_vm8, %v940_v60 }
 0x4c9   :  { %v836_v43 = vpop.f32.mrf.mxu1 }
 0x4ca   :  { %v914_v47 = vadd.f32 %v913_v44, %v836_v43 }
 0x4ce   :  { %4829 = vmatmul.msk.f32.gmra.mxu0 %vm636_vm8, %v941_v63 }
 0x4d1   :  { %v839_v29 = vpop.f32.mrf.mxu1 }
 0x4d2   :  { %v917_v56 = vadd.f32 %v916_v34, %v839_v29 }
 0x4d6   :  { %4830 = vmatmul.msk.f32.gmra.mxu0 %vm636_vm8, %v942_v2 }
 0x4d9   :  { %v842_v52 = vpop.f32.mrf.mxu1 }
 0x4da   :  { %v920_v61 = vadd.f32 %v919_v54, %v842_v52 }
 0x4de   :  { %4831 = vmatmul.msk.f32.gmra.mxu0 %vm636_vm8, %v943_v5 }
 0x4e1   :  { %v845_v63 = vpop.f32.mrf.mxu1 }
 0x4e2   :  { %v923_v6 = vadd.f32 %v922_v0, %v845_v63 }
 0x4e6   :  { %4832 = vmatmul.msk.f32.gmra.mxu0 %vm636_vm8, %v944_v11 }
 0x4ee   :  { %4833 = vmatmul.msk.f32.gmra.mxu0 %vm636_vm8, %v945_v15 }
 0x4f6   :  { %4834 = vmatmul.msk.f32.gmra.mxu0 %vm636_vm8, %v946_v20 }
 0x4fe   :  { %4835 = vmatmul.msk.f32.gmra.mxu0 %vm636_vm8, %v947_v31  ;;  %v5611_v31 = vmov 32.0  }
 0x4ff   :  { %5248 = vrcp.f32 %v5611_v31 }
 0x506   :  { %4836 = vmatmul.msk.f32.gmra.mxu0 %vm636_vm8, %v948_v37 }
 0x50e   :  { %4837 = vmatmul.msk.f32.gmra.mxu0 %vm636_vm8, %v949_v42 }
 0x53b   :  { %v763_v7 = vpop.f32.mrf.mxu0 }
 0x53c   :  { %v764_v8 = vadd.f32 %v5222_v19, %v763_v7  ;;  %v911_v19 = vadd.f32 %v910_v38, %v833_v33 }
 0x53e   :  { %4838 = vmatpush.msk.msrb.mxu3 %vm179_vm0, %v764_v8  ;;  %v848_v8 = vpop.f32.mrf.mxu1 }
 0x53f   :  { %4839 = vmatmul.msk.f32.vlgmr.msrb.gmra.mxu3 %vm166_vm1, %v1037_v9  ;;  %v925_v9 = vpop.f32.mrf.mxu2 }
 0x543   :  { %v997_v39 = vpop.f32.mrf.mxu0 }
 0x544   :  { %v1027_v24 = vadd.f32 %v997_v39, %v911_v19 }
 0x547   :  { %4840 = vmatmul.msk.f32.gmra.mxu3 %vm166_vm1, %v1038_v13  ;;  %v926_v13 = vadd.f32 %v925_v9, %v848_v8  ;;  %v928_v18 = vpop.f32.mrf.mxu2 }
 0x54b   :  { %v1000_v45 = vpop.f32.mrf.mxu0 }
 0x54c   :  { %v1028_v51 = vadd.f32 %v1000_v45, %v914_v47 }
 0x54f   :  { %4841 = vmatmul.msk.f32.gmra.mxu3 %vm166_vm1, %v1039_v17  ;;  %v851_v17 = vpop.f32.mrf.mxu1  ;;  %v931_v39 = vpop.f32.mrf.mxu2 }
 0x553   :  { %v1003_v49 = vpop.f32.mrf.mxu0 }
 0x554   :  { %v1029_v59 = vadd.f32 %v1003_v49, %v917_v56 }
 0x557   :  { %4842 = vmatmul.msk.f32.gmra.mxu3 %vm166_vm1, %v1040_v21  ;;  %v854_v38 = vpop.f32.mrf.mxu1  ;;  %v934_v29 = vpop.f32.mrf.mxu2 }
 0x558   :  { %v932_v44 = vadd.f32 %v931_v39, %v854_v38  ;;  %v1673_v38 = vld [vmem:[%s7780_s8 + $0x10] sm:$0xff]  ;;  %v1403_v39 = vld [vmem:[%s7779_s3 + $0x8] sm:$0xff] }
 0x55b   :  { %v1006_v58 = vpop.f32.mrf.mxu0 }
 0x55c   :  { %v1030_v2 = vadd.f32 %v1006_v58, %v920_v61 }
 0x55f   :  { %4843 = vmatmul.msk.f32.gmra.mxu3 %vm166_vm1, %v1041_v22  ;;  %v929_v22 = vadd.f32 %v928_v18, %v851_v17 }
 0x563   :  { %v1009_v3 = vpop.f32.mrf.mxu0 }
 0x564   :  { %v1031_v10 = vadd.f32 %v1009_v3, %v923_v6 }
 0x567   :  { %4844 = vmatmul.msk.f32.gmra.mxu3 %vm166_vm1, %v1042_v23 }
 0x56b   :  { %v1012_v12 = vpop.f32.mrf.mxu0 }
 0x56c   :  { %v1032_v16 = vadd.f32 %v1012_v12, %v926_v13 }
 0x56f   :  { %4845 = vmatmul.msk.f32.gmra.mxu3 %vm166_vm1, %v1043_v25 }
 0x573   :  { %v1015_v23 = vpop.f32.mrf.mxu0 }
 0x574   :  { %v1033_v26 = vadd.f32 %v1015_v23, %v929_v22 }
 0x577   :  { %4846 = vmatmul.msk.f32.gmra.mxu3 %vm166_vm1, %v1044_v27 }
 0x57b   :  { %v1018_v41 = vpop.f32.mrf.mxu0 }
 0x57f   :  { %4847 = vmatmul.msk.f32.gmra.mxu3 %vm166_vm1, %v1045_v32  ;;  %v5249_v32 = vpop.eup %5248 }
 0x580   :  { %v1170_v33 = vmul.f32 32.0, %v5249_v32  ;;  %vm1174_vm10 = vweird.f32 %v5249_v32 }
 0x582   :  { %v1171_v35 = vsub.f32 1.0, %v1170_v33 }
 0x584   :  { %v1172_v36 = vmul.f32 %v5249_v32, %v1171_v35  ;;  %v1405_v35 = vld [vmem:[%s7779_s3 + $0x18] sm:$0xff] }
 0x585   :  { %1448 = vmatpush.msrb.mxu1 %v1405_v35 }
 0x586   :  { %v1173_v37 = vadd.f32 %v5249_v32, %v1172_v36  ;;  %v1674_v36 = vld [vmem:[%s7780_s8 + $0x18] sm:$0xff] }
 0x587   :  { %4848 = vmatmul.msk.f32.gmra.mxu3 %vm166_vm1, %v1046_v40  ;;  %1687 = vmatpush.msrb.mxu0 %v1674_v36 }
 0x588   :  { %v6021_v40 = vsel %vm1174_vm10, %v5249_v32, %v1173_v37  ;;  %v1404_v37 = vld [vmem:[%s7779_s3 + $0x10] sm:$0xff] }
 0x589   :  { %1449 = vmatpush.msrb.mxu1 %v1404_v37  ;;  %1688 = vmatpush.msrb.mxu0 %v1673_v38 }
 0x58b   :  { %1450 = vmatpush.msrb.mxu1 %v1403_v39 }
 0x5c2   :  { %v1097_v46 = vpop.f32.mrf.mxu3 }
 0x5c3   :  { %v5993_v48 = vadd.f32 %v1097_v46, %v1027_v24  ;;  %v857_v24 = vpop.f32.mrf.mxu1  ;;  %v1034_v46 = vadd.f32 %v1018_v41, %v932_v44  ;;  %v1672_v41 = vld [vmem:[%s7780_s8 + $0x8] sm:$0xff] }
 0x5c4   :  { %1689 = vmatpush.msrb.mxu0 %v1672_v41 }
 0x5c5   :  { %v1139_v50 = vsel %vm273_vm3, %v5993_v48, 0.0 }
 0x5c6   :  { %1140 = vadd.xlane.f32.xlu0 %v1139_v50  ;;  %v1021_v50 = vpop.f32.mrf.mxu0 }
 0x5ca   :  { %v1100_v53 = vpop.f32.mrf.mxu3 }
 0x5cb   :  { %v5997_v55 = vadd.f32 %v1100_v53, %v1028_v51  ;;  %v935_v53 = vadd.f32 %v934_v29, %v857_v24 }
 0x5cd   :  { %v1142_v57 = vsel %vm273_vm3, %v5997_v55, 0.0  ;;  %v1035_v58 = vadd.f32 %v1021_v50, %v935_v53 }
 0x5ce   :  { %1143 = vadd.xlane.f32.xlu0 %v1142_v57 }
 0x5d2   :  { %v1103_v60 = vpop.f32.mrf.mxu3 }
 0x5d3   :  { %v6001_v62 = vadd.f32 %v1103_v60, %v1029_v59  ;;  %v860_v59 = vpop.f32.mrf.mxu1  ;;  %v937_v60 = vpop.f32.mrf.mxu2 }
 0x5d5   :  { %v1145_v1 = vsel %vm273_vm3, %v6001_v62, 0.0 }
 0x5d6   :  { %1146 = vadd.xlane.f32.xlu1 %v1145_v1 }
 0x5da   :  { %v1106_v4 = vpop.f32.mrf.mxu3 }
 0x5db   :  { %v6005_v5 = vadd.f32 %v1106_v4, %v1030_v2  ;;  %v1024_v2 = vpop.f32.mrf.mxu0 }
 0x5dd   :  { %v1148_v7 = vsel %vm273_vm3, %v6005_v5, 0.0 }
 0x5de   :  { %1149 = vadd.xlane.f32.xlu1 %v1148_v7 }
 0x5e2   :  { %v1109_v11 = vpop.f32.mrf.mxu3 }
 0x5e3   :  { %v6009_v14 = vadd.f32 %v1109_v11, %v1031_v10 }
 0x5e5   :  { %v1151_v15 = vsel %vm273_vm3, %v6009_v14, 0.0 }
 0x5e6   :  { %1152 = vadd.xlane.f32.xlu2 %v1151_v15 }
 0x5ea   :  { %v1112_v20 = vpop.f32.mrf.mxu3 }
 0x5eb   :  { %v6013_v21 = vadd.f32 %v1112_v20, %v1032_v16 }
 0x5ed   :  { %v1154_v25 = vsel %vm273_vm3, %v6013_v21, 0.0 }
 0x5ee   :  { %1155 = vadd.xlane.f32.xlu2 %v1154_v25 }
 0x5f2   :  { %v1115_v27 = vpop.f32.mrf.mxu3 }
 0x5f3   :  { %v6017_v28 = vadd.f32 %v1115_v27, %v1033_v26 }
 0x5f5   :  { %v1157_v30 = vsel %vm273_vm3, %v6017_v28, 0.0 }
 0x5f6   :  { %1158 = vadd.xlane.f32.xlu1 %v1157_v30 }
 0x5fa   :  { %v1118_v45 = vpop.f32.mrf.mxu3 }
 0x5fb   :  { %v6031_v52 = vadd.f32 %v1118_v45, %v1034_v46 }
 0x5fd   :  { %v1160_v57 = vsel %vm273_vm3, %v6031_v52, 0.0 }
 0x639   :  { %v1141_v42 = vpop.xlane.xlu0 %1140 }
 0x63a   :  { %v1176_v43 = vmul.f32 %v6021_v40, %v1141_v42  ;;  %v1671_v42 = vld [vmem:[%s7780_s8] sm:$0xff] }
 0x63b   :  { %1690 = vmatpush.msrb.mxu0 %v1671_v42 }
 0x63c   :  { %v6025_v19 = vsub.f32 %v5993_v48, %v1176_v43  ;;  %v1121_v48 = vpop.f32.mrf.mxu3 }
 0x63d   :  { %v6042_v1 = vadd.f32 %v1121_v48, %v1035_v58 }
 0x63e   :  { %v1196_v34 = vmul.f32 %v6025_v19, %v6025_v19 }
 0x63f   :  { %v1163_v6 = vsel %vm273_vm3, %v6042_v1, 0.0 }
 0x640   :  { %v1206_v47 = vsel %vm273_vm3, %v1196_v34, 0.0 }
 0x641   :  { %1207 = vadd.xlane.f32.xlu0 %v1206_v47  ;;  %v1144_v49 = vpop.xlane.xlu0 %1143 }
 0x642   :  { %v1177_v51 = vmul.f32 %v6021_v40, %v1144_v49 }
 0x644   :  { %v6034_v54 = vsub.f32 %v5997_v55, %v1177_v51  ;;  %v938_v55 = vadd.f32 %v937_v60, %v860_v59  ;;  %v1124_v8 = vpop.f32.mrf.mxu3 }
 0x646   :  { %v1197_v56 = vmul.f32 %v6034_v54, %v6034_v54  ;;  %v1036_v7 = vadd.f32 %v1024_v2, %v938_v55 }
 0x648   :  { %v1209_v61 = vsel %vm273_vm3, %v1197_v56, 0.0  ;;  %v6053_v12 = vadd.f32 %v1124_v8, %v1036_v7 }
 0x649   :  { %v1147_v63 = vpop.xlane.xlu1 %1146  ;;  %1210 = vadd.xlane.f32.xlu2 %v1209_v61  ;;  %1161 = vadd.xlane.f32.xlu0 %v1160_v57 }
 0x64a   :  { %v1178_v0 = vmul.f32 %v6021_v40, %v1147_v63  ;;  %v1166_v15 = vsel %vm273_vm3, %v6053_v12, 0.0 }
 0x64c   :  { %v6045_v3 = vsub.f32 %v6001_v62, %v1178_v0 }
 0x64e   :  { %v1198_v4 = vmul.f32 %v6045_v3, %v6045_v3 }
 0x650   :  { %v1212_v9 = vsel %vm273_vm3, %v1198_v4, 0.0 }
 0x651   :  { %v1150_v10 = vpop.xlane.xlu1 %1149  ;;  %1213 = vadd.xlane.f32.xlu1 %v1212_v9  ;;  %1164 = vadd.xlane.f32.xlu2 %v1163_v6  ;;  %v6107_v6 = vld [vmem:[%s7781_s14] ss:$0 sm:$0xff] }
 0x652   :  { %v1179_v11 = vmul.f32 %v6021_v40, %v1150_v10  ;;  %v6112_v10 = vld [vmem:[%s7782_s19] ss:$0 sm:$0xff] }
 0x654   :  { %v6056_v62 = vsub.f32 %v6005_v5, %v1179_v11 }
 0x656   :  { %v1199_v13 = vmul.f32 %v6056_v62, %v6056_v62 }
 0x658   :  { %v1215_v16 = vsel %vm273_vm3, %v1199_v13, 0.0 }
 0x659   :  { %v1153_v17 = vpop.xlane.xlu2 %1152  ;;  %1216 = vadd.xlane.f32.xlu0 %v1215_v16  ;;  %1167 = vadd.xlane.f32.xlu1 %v1166_v15 }
 0x65a   :  { %v1180_v18 = vmul.f32 %v6021_v40, %v1153_v17 }
 0x65c   :  { %v6065_v20 = vsub.f32 %v6009_v14, %v1180_v18 }
 0x65e   :  { %v1200_v5 = vmul.f32 %v6065_v20, %v6065_v20 }
 0x660   :  { %v1218_v22 = vsel %vm273_vm3, %v1200_v5, 0.0 }
 0x661   :  { %v1156_v23 = vpop.xlane.xlu2 %1155  ;;  %1219 = vadd.xlane.f32.xlu2 %v1218_v22 }
 0x662   :  { %v1181_v25 = vmul.f32 %v6021_v40, %v1156_v23 }
 0x664   :  { %v6072_v26 = vsub.f32 %v6013_v21, %v1181_v25 }
 0x666   :  { %v1201_v14 = vmul.f32 %v6072_v26, %v6072_v26 }
 0x668   :  { %v1221_v27 = vsel %vm273_vm3, %v1201_v14, 0.0 }
 0x669   :  { %v1159_v30 = vpop.xlane.xlu1 %1158  ;;  %1222 = vadd.xlane.f32.xlu0 %v1221_v27 }
 0x66a   :  { %v1182_v31 = vmul.f32 %v6021_v40, %v1159_v30 }
 0x66c   :  { %v6079_v32 = vsub.f32 %v6017_v28, %v1182_v31  ;;  %v1402_v28 = vld [vmem:[%s7779_s3] sm:$0xff] }
 0x66d   :  { %1451 = vmatpush.msrb.mxu1 %v1402_v28 }
 0x66e   :  { %v1202_v33 = vmul.f32 %v6079_v32, %v6079_v32 }
 0x670   :  { %v1224_v21 = vsel %vm273_vm3, %v1202_v33, 0.0 }
 0x671   :  { %1225 = vadd.xlane.f32.xlu1 %v1224_v21 }
 0x6b4   :  { %v1208_v43 = vpop.xlane.xlu0 %1207 }
 0x6b5   :  { %v1236_v44 = vmul.f32 %v1208_v43, %v6021_v40 }
 0x6b7   :  { %v1246_v45 = vadd.f32 1e-05, %v1236_v44 }
 0x6b9   :  { %5250 = vrsqrt.f32 %v1246_v45  ;;  %vm1262_vm12 = vweird.f32 %v1246_v45 }
 0x6bc   :  { %v1211_v24 = vpop.xlane.xlu2 %1210  ;;  %v1162_v29 = vpop.xlane.xlu0 %1161 }
 0x6bd   :  { %v1237_v34 = vmul.f32 %v1211_v24, %v6021_v40  ;;  %v1183_v46 = vmul.f32 %v6021_v40, %v1162_v29 }
 0x6bf   :  { %v5251_v47 = vpop.eup %5250  ;;  %v1247_v49 = vadd.f32 1e-05, %v1237_v34  ;;  %v6096_v50 = vsub.f32 %v6031_v52, %v1183_v46 }
 0x6c0   :  { %v1257_v51 = vmul.f32 %v5251_v47, %v1246_v45  ;;  %vm1263_vm11 = vweird.f32 %v5251_v47 }
 0x6c1   :  { %5252 = vrsqrt.f32 %v1247_v49  ;;  %v1203_v53 = vmul.f32 %v6096_v50, %v6096_v50  ;;  %vm1264_vm13 = vmor %vm1262_vm12, %vm1263_vm11  ;;  %vm1272_vm15 = vweird.f32 %v1247_v49 }
 0x6c2   :  { %v1258_v48 = vmul.f32 %v5251_v47, %v1257_v51 }
 0x6c3   :  { %v1227_v56 = vsel %vm273_vm3, %v1203_v53, 0.0 }
 0x6c4   :  { %v1259_v57 = vmul.f32 0.5, %v1258_v48  ;;  %v1214_v58 = vpop.xlane.xlu1 %1213  ;;  %1228 = vadd.xlane.f32.xlu2 %v1227_v56  ;;  %v1165_v59 = vpop.xlane.xlu2 %1164 }
 0x6c5   :  { %v1238_v60 = vmul.f32 %v1214_v58, %v6021_v40  ;;  %v1184_v61 = vmul.f32 %v6021_v40, %v1165_v59 }
 0x6c6   :  { %v1260_v52 = vsub.f32 1.5, %v1259_v57 }
 0x6c7   :  { %v5253_v63 = vpop.eup %5252  ;;  %v1248_v0 = vadd.f32 1e-05, %v1238_v60  ;;  %v6104_v55 = vsub.f32 %v6042_v1, %v1184_v61 }
 0x6c8   :  { %v1261_v2 = vmul.f32 %v5251_v47, %v1260_v52  ;;  %v1267_v4 = vmul.f32 %v5253_v63, %v1247_v49  ;;  %vm1273_vm14 = vweird.f32 %v5253_v63 }
 0x6c9   :  { %5254 = vrsqrt.f32 %v1248_v0  ;;  %v1204_v7 = vmul.f32 %v6104_v55, %v6104_v55  ;;  %vm1274_vm0 = vmor %vm1272_vm15, %vm1273_vm14  ;;  %vm1282_vm2 = vweird.f32 %v1248_v0 }
 0x6ca   :  { %v1265_v8 = vsel %vm1264_vm13, %v5251_v47, %v1261_v2  ;;  %v1268_v9 = vmul.f32 %v5253_v63, %v1267_v4 }
 0x6cb   :  { %v1356_v11 = vmul.f32 %v1265_v8, %v6025_v19  ;;  %v1230_v13 = vsel %vm273_vm3, %v1204_v7, 0.0 }
 0x6cc   :  { %v1269_v1 = vmul.f32 0.5, %v1268_v9  ;;  %v1217_v15 = vpop.xlane.xlu0 %1216  ;;  %1231 = vadd.xlane.f32.xlu0 %v1230_v13  ;;  %v1168_v16 = vpop.xlane.xlu1 %1167 }
 0x6cd   :  { %v1369_v17 = vmul.f32 %v6107_v6, %v1356_v11  ;;  %v1239_v18 = vmul.f32 %v1217_v15, %v6021_v40  ;;  %v1185_v5 = vmul.f32 %v6021_v40, %v1168_v16 }
 0x6ce   :  { %v1270_v22 = vsub.f32 1.5, %v1269_v1 }
 0x6cf   :  { %v5255_v23 = vpop.eup %5254  ;;  %v6120_v25 = vadd.f32 %v6112_v10, %v1369_v17  ;;  %v1249_v14 = vadd.f32 1e-05, %v1239_v18  ;;  %v6123_v19 = vsub.f32 %v6053_v12, %v1185_v5 }
 0x6d0   :  { %v1271_v27 = vmul.f32 %v5253_v63, %v1270_v22  ;;  %v1277_v30 = vmul.f32 %v5255_v23, %v1248_v0  ;;  %vm1283_vm1 = vweird.f32 %v5255_v23 }
 0x6d1   :  { %5256 = vrsqrt.f32 %v1249_v14  ;;  %4849 = vmatmul.msk.f32.vlgmr.msrb.gmra.mxu1 %vm273_vm3, %v6120_v25  ;;  %4879 = vmatmul.msk.f32.vlgmr.msrb.gmra.mxu0 %vm273_vm3, %v6120_v25  ;;  %v1205_v31 = vmul.f32 %v6123_v19, %v6123_v19  ;;  %vm1284_vm5 = vmor %vm1282_vm2, %vm1283_vm1  ;;  %vm1292_vm7 = vweird.f32 %v1249_v14 }
 0x6d2   :  { %v1275_v33 = vsel %vm1274_vm0, %v5253_v63, %v1271_v27  ;;  %v1278_v21 = vmul.f32 %v5255_v23, %v1277_v30 }
 0x6d3   :  { %v1357_v35 = vmul.f32 %v1275_v33, %v6034_v54  ;;  %v1233_v12 = vsel %vm273_vm3, %v1205_v31, 0.0 }
 0x6d4   :  { %v1279_v36 = vmul.f32 0.5, %v1278_v21  ;;  %v1220_v37 = vpop.xlane.xlu2 %1219  ;;  %1234 = vadd.xlane.f32.xlu1 %v1233_v12 }
 0x6d5   :  { %v1370_v38 = vmul.f32 %v6107_v6, %v1357_v35  ;;  %v1240_v39 = vmul.f32 %v1220_v37, %v6021_v40 }
 0x6d6   :  { %v1280_v41 = vsub.f32 1.5, %v1279_v36 }
 0x6d7   :  { %v5257_v28 = vpop.eup %5256  ;;  %v6136_v42 = vadd.f32 %v6112_v10, %v1370_v38  ;;  %v1250_v43 = vadd.f32 1e-05, %v1240_v39 }
 0x6d8   :  { %v1281_v44 = vmul.f32 %v5255_v23, %v1280_v41  ;;  %v1287_v45 = vmul.f32 %v5257_v28, %v1249_v14  ;;  %vm1293_vm6 = vweird.f32 %v5257_v28 }
 0x6d9   :  { %5258 = vrsqrt.f32 %v1250_v43  ;;  %4850 = vmatmul.msk.f32.gmra.mxu1 %vm273_vm3, %v6136_v42  ;;  %4880 = vmatmul.msk.f32.gmra.mxu0 %vm273_vm3, %v6136_v42  ;;  %vm1294_vm8 = vmor %vm1292_vm7, %vm1293_vm6  ;;  %vm1302_vm10 = vweird.f32 %v1250_v43 }
 0x6da   :  { %v1285_v54 = vsel %vm1284_vm5, %v5255_v23, %v1281_v44  ;;  %v1288_v24 = vmul.f32 %v5257_v28, %v1287_v45 }
 0x6db   :  { %v1358_v29 = vmul.f32 %v1285_v54, %v6045_v3 }
 0x6dc   :  { %v1289_v34 = vmul.f32 0.5, %v1288_v24  ;;  %v1223_v46 = vpop.xlane.xlu0 %1222  ;;  %v4902_v24 = vld [vmem:[%s7779_s3 + $0x38] sm:$0xff] }
 0x6dd   :  { %v1371_v47 = vmul.f32 %v6107_v6, %v1358_v29  ;;  %v1241_v49 = vmul.f32 %v1223_v46, %v6021_v40  ;;  %v4936_v29 = vld [vmem:[%s7780_s8 + $0x38] sm:$0xff]  ;;  %1818 = vmatpush.msra.mxu1 %v4902_v24  ;;  %v4935_v46 = vld [vmem:[%s7780_s8 + $0x30] sm:$0xff] }
 0x6de   :  { %v1290_v51 = vsub.f32 1.5, %v1289_v34  ;;  %2057 = vmatpush.msra.mxu0 %v4936_v29  ;;  %v4901_v34 = vld [vmem:[%s7779_s3 + $0x30] sm:$0xff] }
 0x6df   :  { %v5259_v53 = vpop.eup %5258  ;;  %v6146_v48 = vadd.f32 %v6112_v10, %v1371_v47  ;;  %v1251_v56 = vadd.f32 1e-05, %v1241_v49  ;;  %1819 = vmatpush.msra.mxu1 %v4901_v34 }
 0x6e0   :  { %v1291_v57 = vmul.f32 %v5257_v28, %v1290_v51  ;;  %v1297_v58 = vmul.f32 %v5259_v53, %v1250_v43  ;;  %vm1303_vm9 = vweird.f32 %v5259_v53  ;;  %2058 = vmatpush.msra.mxu0 %v4935_v46 }
 0x6e1   :  { %5260 = vrsqrt.f32 %v1251_v56  ;;  %4851 = vmatmul.msk.f32.gmra.mxu1 %vm273_vm3, %v6146_v48  ;;  %4881 = vmatmul.msk.f32.gmra.mxu0 %vm273_vm3, %v6146_v48  ;;  %vm1304_vm11 = vmor %vm1302_vm10, %vm1303_vm9  ;;  %vm1312_vm13 = vweird.f32 %v1251_v56 }
 0x6e2   :  { %v1295_v3 = vsel %vm1294_vm8, %v5257_v28, %v1291_v57  ;;  %v1298_v59 = vmul.f32 %v5259_v53, %v1297_v58  ;;  %v4899_v58 = vld [vmem:[%s7779_s3 + $0x20] sm:$0xff] }
 0x6e3   :  { %v1359_v60 = vmul.f32 %v1295_v3, %v6056_v62  ;;  %v4933_v3 = vld [vmem:[%s7780_s8 + $0x20] sm:$0xff] }
 0x6e4   :  { %v1299_v61 = vmul.f32 0.5, %v1298_v59  ;;  %v1226_v52 = vpop.xlane.xlu1 %1225 }
 0x6e5   :  { %v1372_v63 = vmul.f32 %v6107_v6, %v1359_v60  ;;  %v1242_v0 = vmul.f32 %v1226_v52, %v6021_v40 }
 0x6e6   :  { %v1300_v2 = vsub.f32 1.5, %v1299_v61 }
 0x6e7   :  { %v5261_v4 = vpop.eup %5260  ;;  %v6156_v7 = vadd.f32 %v6112_v10, %v1372_v63  ;;  %v1252_v8 = vadd.f32 1e-05, %v1242_v0 }
 0x6e8   :  { %v1301_v9 = vmul.f32 %v5259_v53, %v1300_v2  ;;  %v1307_v11 = vmul.f32 %v5261_v4, %v1251_v56  ;;  %vm1313_vm12 = vweird.f32 %v5261_v4  ;;  %v4934_v56 = vld [vmem:[%s7780_s8 + $0x28] sm:$0xff] }
 0x6e9   :  { %5262 = vrsqrt.f32 %v1252_v8  ;;  %4852 = vmatmul.msk.f32.gmra.mxu1 %vm273_vm3, %v6156_v7  ;;  %4882 = vmatmul.msk.f32.gmra.mxu0 %vm273_vm3, %v6156_v7  ;;  %vm1314_vm14 = vmor %vm1312_vm13, %vm1313_vm12  ;;  %vm1322_vm0 = vweird.f32 %v1252_v8  ;;  %vm1560_vm13 = vcmask 654336  }
 0x6ea   :  { %v1305_v62 = vsel %vm1304_vm11, %v5259_v53, %v1301_v9  ;;  %v1308_v13 = vmul.f32 %v5261_v4, %v1307_v11  ;;  %v4900_v53 = vld [vmem:[%s7779_s3 + $0x28] sm:$0xff]  ;;  %2059 = vmatpush.msra.mxu0 %v4934_v56 }
 0x6eb   :  { %v1360_v1 = vmul.f32 %v1305_v62, %v6065_v20  ;;  %1820 = vmatpush.msra.mxu1 %v4900_v53 }
 0x6ec   :  { %v1309_v15 = vmul.f32 0.5, %v1308_v13  ;;  %2060 = vmatpush.msra.mxu0 %v4933_v3 }
 0x6ed   :  { %v1373_v16 = vmul.f32 %v6107_v6, %v1360_v1  ;;  %1821 = vmatpush.msra.mxu1 %v4899_v58 }
 0x6ee   :  { %v1310_v17 = vsub.f32 1.5, %v1309_v15 }
 0x6ef   :  { %v5263_v18 = vpop.eup %5262  ;;  %v6165_v5 = vadd.f32 %v6112_v10, %v1373_v16 }
 0x6f0   :  { %v1311_v22 = vmul.f32 %v5261_v4, %v1310_v17  ;;  %v1317_v23 = vmul.f32 %v5263_v18, %v1252_v8  ;;  %vm1323_vm15 = vweird.f32 %v5263_v18 }
 0x6f1   :  { %4853 = vmatmul.msk.f32.gmra.mxu1 %vm273_vm3, %v6165_v5  ;;  %4883 = vmatmul.msk.f32.gmra.mxu0 %vm273_vm3, %v6165_v5  ;;  %vm1324_vm1 = vmor %vm1322_vm0, %vm1323_vm15 }
 0x6f2   :  { %v1315_v20 = vsel %vm1314_vm14, %v5261_v4, %v1311_v22  ;;  %v1318_v14 = vmul.f32 %v5263_v18, %v1317_v23 }
 0x6f3   :  { %v1361_v27 = vmul.f32 %v1315_v20, %v6072_v26 }
 0x6f4   :  { %v1319_v30 = vmul.f32 0.5, %v1318_v14 }
 0x6f5   :  { %v1374_v31 = vmul.f32 %v6107_v6, %v1361_v27 }
 0x6f6   :  { %v1320_v33 = vsub.f32 1.5, %v1319_v30 }
 0x6f7   :  { %v6174_v21 = vadd.f32 %v6112_v10, %v1374_v31 }
 0x6f8   :  { %v1321_v35 = vmul.f32 %v5263_v18, %v1320_v33 }
 0x6f9   :  { %4854 = vmatmul.msk.f32.gmra.mxu1 %vm273_vm3, %v6174_v21  ;;  %4884 = vmatmul.msk.f32.gmra.mxu0 %vm273_vm3, %v6174_v21 }
 0x6fa   :  { %v1325_v12 = vsel %vm1324_vm1, %v5263_v18, %v1321_v35 }
 0x6fb   :  { %v1362_v26 = vmul.f32 %v1325_v12, %v6079_v32 }
 0x6fd   :  { %v1375_v36 = vmul.f32 %v6107_v6, %v1362_v26 }
 0x6ff   :  { %v6183_v37 = vadd.f32 %v6112_v10, %v1375_v36 }
 0x701   :  { %4855 = vmatmul.msk.f32.gmra.mxu1 %vm273_vm3, %v6183_v37  ;;  %4885 = vmatmul.msk.f32.gmra.mxu0 %vm273_vm3, %v6183_v37 }
 0x737   :  { %v1229_v38 = vpop.xlane.xlu2 %1228 }
 0x738   :  { %v1243_v39 = vmul.f32 %v1229_v38, %v6021_v40 }
 0x73a   :  { %v1253_v41 = vadd.f32 1e-05, %v1243_v39 }
 0x73c   :  { %5264 = vrsqrt.f32 %v1253_v41  ;;  %vm1332_vm5 = vweird.f32 %v1253_v41 }
 0x73f   :  { %v1232_v32 = vpop.xlane.xlu0 %1231 }
 0x740   :  { %v1244_v28 = vmul.f32 %v1232_v32, %v6021_v40 }
 0x742   :  { %v5265_v43 = vpop.eup %5264  ;;  %v1254_v44 = vadd.f32 1e-05, %v1244_v28 }
 0x743   :  { %v1327_v45 = vmul.f32 %v5265_v43, %v1253_v41  ;;  %vm1333_vm2 = vweird.f32 %v5265_v43 }
 0x744   :  { %5266 = vrsqrt.f32 %v1254_v44  ;;  %vm1334_vm6 = vmor %vm1332_vm5, %vm1333_vm2  ;;  %vm1342_vm8 = vweird.f32 %v1254_v44 }
 0x745   :  { %v1328_v54 = vmul.f32 %v5265_v43, %v1327_v45 }
 0x747   :  { %v1329_v47 = vmul.f32 0.5, %v1328_v54  ;;  %v1235_v49 = vpop.xlane.xlu1 %1234 }
 0x748   :  { %v1245_v51 = vmul.f32 %v1235_v49, %v6021_v40 }
 0x749   :  { %v1330_v57 = vsub.f32 1.5, %v1329_v47 }
 0x74a   :  { %v5267_v59 = vpop.eup %5266  ;;  %v1255_v60 = vadd.f32 1e-05, %v1245_v51 }
 0x74b   :  { %v1331_v61 = vmul.f32 %v5265_v43, %v1330_v57  ;;  %v1337_v52 = vmul.f32 %v5267_v59, %v1254_v44  ;;  %vm1343_vm7 = vweird.f32 %v5267_v59 }
 0x74c   :  { %5268 = vrsqrt.f32 %v1255_v60  ;;  %vm1344_vm9 = vmor %vm1342_vm8, %vm1343_vm7  ;;  %vm1352_vm11 = vweird.f32 %v1255_v60 }
 0x74d   :  { %v1335_v63 = vsel %vm1334_vm6, %v5265_v43, %v1331_v61  ;;  %v1338_v0 = vmul.f32 %v5267_v59, %v1337_v52 }
 0x74e   :  { %v1363_v2 = vmul.f32 %v1335_v63, %v6096_v50 }
 0x74f   :  { %v1339_v4 = vmul.f32 0.5, %v1338_v0 }
 0x750   :  { %v1376_v8 = vmul.f32 %v6107_v6, %v1363_v2  ;;  %v6338_v2 = vld [vmem:[%s7783_s24 + $0x8] sm:$0xff] }
 0x751   :  { %v1340_v9 = vsub.f32 1.5, %v1339_v4 }
 0x752   :  { %v5269_v11 = vpop.eup %5268  ;;  %v6203_v62 = vadd.f32 %v6112_v10, %v1376_v8 }
 0x753   :  { %v1341_v13 = vmul.f32 %v5267_v59, %v1340_v9  ;;  %v1347_v1 = vmul.f32 %v5269_v11, %v1255_v60  ;;  %vm1353_vm10 = vweird.f32 %v5269_v11 }
 0x754   :  { %4856 = vmatmul.msk.f32.gmra.mxu1 %vm273_vm3, %v6203_v62  ;;  %4886 = vmatmul.msk.f32.gmra.mxu0 %vm273_vm3, %v6203_v62  ;;  %vm1354_vm12 = vmor %vm1352_vm11, %vm1353_vm10 }
 0x755   :  { %v1345_v50 = vsel %vm1344_vm9, %v5267_v59, %v1341_v13  ;;  %v1348_v15 = vmul.f32 %v5269_v11, %v1347_v1  ;;  %v6329_v59 = vld [vmem:[%s7783_s24] sm:$0xff]  ;;  %v6347_v1 = vld [vmem:[%s7783_s24 + $0x10] sm:$0xff] }
 0x756   :  { %v1364_v16 = vmul.f32 %v1345_v50, %v6104_v55 }
 0x757   :  { %v1349_v17 = vmul.f32 0.5, %v1348_v15 }
 0x758   :  { %v1377_v18 = vmul.f32 %v6107_v6, %v1364_v16 }
 0x759   :  { %v1350_v22 = vsub.f32 1.5, %v1349_v17 }
 0x75a   :  { %v6212_v23 = vadd.f32 %v6112_v10, %v1377_v18 }
 0x75b   :  { %v1351_v20 = vmul.f32 %v5269_v11, %v1350_v22  ;;  %v6356_v22 = vld [vmem:[%s7783_s24 + $0x18] sm:$0xff] }
 0x75c   :  { %4857 = vmatmul.msk.f32.gmra.mxu1 %vm273_vm3, %v6212_v23  ;;  %4887 = vmatmul.msk.f32.gmra.mxu0 %vm273_vm3, %v6212_v23 }
 0x75d   :  { %v1355_v14 = vsel %vm1354_vm12, %v5269_v11, %v1351_v20 }
 0x75e   :  { %v1365_v55 = vmul.f32 %v1355_v14, %v6123_v19  ;;  %v1692_v19 = vpop.f32.mrf.mxu0 }
 0x760   :  { %v1378_v27 = vmul.f32 %v6107_v6, %v1365_v55  ;;  %v1453_v6 = vpop.f32.mrf.mxu1 }
 0x762   :  { %v6221_v30 = vadd.f32 %v6112_v10, %v1378_v27 }
 0x764   :  { %4858 = vmatmul.msk.f32.gmra.mxu1 %vm273_vm3, %v6221_v30  ;;  %4859 = vmatpush.xpose.msk.msra.mxu2 %vm273_vm3, %v6221_v30 }
 0x765   :  { %4888 = vmatmul.msk.f32.gmra.mxu0 %vm273_vm3, %v6221_v30 }
 0x766   :  { %v1695_v33 = vpop.f32.mrf.mxu0 }
 0x768   :  { %4860 = vmatpush.xpose.msk.msra.mxu2 %vm273_vm3, %v6212_v23  ;;  %v1456_v10 = vpop.f32.mrf.mxu1 }
 0x76c   :  { %4861 = vmatpush.xpose.msk.msra.mxu2 %vm273_vm3, %v6203_v62  ;;  %4903 = vmatmul.msk.f32.vlgmr.msra.gmra.mxu1 %vm273_vm3, %v6120_v25 }
 0x76d   :  { %4937 = vmatmul.msk.f32.vlgmr.msra.gmra.mxu0 %vm273_vm3, %v6120_v25 }
 0x76e   :  { %v1698_v12 = vpop.f32.mrf.mxu0 }
 0x770   :  { %4862 = vmatpush.xpose.msk.msra.mxu2 %vm273_vm3, %v6183_v37  ;;  %v1459_v31 = vpop.f32.mrf.mxu1 }
 0x774   :  { %4863 = vmatpush.xpose.msk.msra.mxu2 %vm273_vm3, %v6174_v21  ;;  %4904 = vmatmul.msk.f32.gmra.mxu1 %vm273_vm3, %v6136_v42 }
 0x775   :  { %4938 = vmatmul.msk.f32.gmra.mxu0 %vm273_vm3, %v6136_v42 }
 0x776   :  { %v1701_v36 = vpop.f32.mrf.mxu0 }
 0x778   :  { %4864 = vmatpush.xpose.msk.msra.mxu2 %vm273_vm3, %v6165_v5  ;;  %v1462_v35 = vpop.f32.mrf.mxu1 }
 0x77c   :  { %4865 = vmatpush.xpose.msk.msra.mxu2 %vm273_vm3, %v6156_v7  ;;  %4905 = vmatmul.msk.f32.gmra.mxu1 %vm273_vm3, %v6146_v48 }
 0x77d   :  { %4939 = vmatmul.msk.f32.gmra.mxu0 %vm273_vm3, %v6146_v48 }
 0x77e   :  { %v1704_v39 = vpop.f32.mrf.mxu0 }
 0x780   :  { %4866 = vmatpush.xpose.msk.msra.mxu2 %vm273_vm3, %v6146_v48  ;;  %v1465_v26 = vpop.f32.mrf.mxu1 }
 0x784   :  { %4867 = vmatpush.xpose.msk.msra.mxu2 %vm273_vm3, %v6136_v42  ;;  %4906 = vmatmul.msk.f32.gmra.mxu1 %vm273_vm3, %v6156_v7 }
 0x785   :  { %4940 = vmatmul.msk.f32.gmra.mxu0 %vm273_vm3, %v6156_v7 }
 0x786   :  { %v1707_v32 = vpop.f32.mrf.mxu0 }
 0x788   :  { %4868 = vmatpush.xpose.msk.msra.mxu2 %vm273_vm3, %v6120_v25  ;;  %v1468_v38 = vpop.f32.mrf.mxu1 }
 0x78b   :  { %4869 = vmatmul.msk.f32.vlgmr.msra.gmra.mxu2 %vm273_vm3, %v1453_v6 }
 0x78c   :  { %4913 = vmatpush.xpose.msk.msrb.mxu2 %vm273_vm3, %v6221_v30  ;;  %4907 = vmatmul.msk.f32.gmra.mxu1 %vm273_vm3, %v6165_v5 }
 0x78d   :  { %4941 = vmatmul.msk.f32.gmra.mxu0 %vm273_vm3, %v6165_v5 }
 0x78e   :  { %v1710_v28 = vpop.f32.mrf.mxu0 }
 0x790   :  { %4914 = vmatpush.xpose.msk.msrb.mxu2 %vm273_vm3, %v6212_v23  ;;  %v1471_v41 = vpop.f32.mrf.mxu1 }
 0x793   :  { %4870 = vmatmul.msk.f32.gmra.mxu2 %vm273_vm3, %v1456_v10  ;;  %v6365_v10 = vld [vmem:[%s7783_s24 + $0x20] sm:$0xff] }
 0x794   :  { %4915 = vmatpush.xpose.msk.msrb.mxu2 %vm273_vm3, %v6203_v62  ;;  %4908 = vmatmul.msk.f32.gmra.mxu1 %vm273_vm3, %v6174_v21 }
 0x795   :  { %4942 = vmatmul.msk.f32.gmra.mxu0 %vm273_vm3, %v6174_v21 }
 0x798   :  { %4916 = vmatpush.xpose.msk.msrb.mxu2 %vm273_vm3, %v6183_v37 }
 0x79b   :  { %4871 = vmatmul.msk.f32.gmra.mxu2 %vm273_vm3, %v1459_v31 }
 0x79c   :  { %4917 = vmatpush.xpose.msk.msrb.mxu2 %vm273_vm3, %v6174_v21  ;;  %4909 = vmatmul.msk.f32.gmra.mxu1 %vm273_vm3, %v6183_v37 }
 0x79d   :  { %4943 = vmatmul.msk.f32.gmra.mxu0 %vm273_vm3, %v6183_v37 }
 0x7a0   :  { %4918 = vmatpush.xpose.msk.msrb.mxu2 %vm273_vm3, %v6165_v5 }
 0x7a3   :  { %4872 = vmatmul.msk.f32.gmra.mxu2 %vm273_vm3, %v1462_v35 }
 0x7a4   :  { %4919 = vmatpush.xpose.msk.msrb.mxu2 %vm273_vm3, %v6156_v7  ;;  %4910 = vmatmul.msk.f32.gmra.mxu1 %vm273_vm3, %v6203_v62 }
 0x7a5   :  { %4944 = vmatmul.msk.f32.gmra.mxu0 %vm273_vm3, %v6203_v62 }
 0x7a8   :  { %4920 = vmatpush.xpose.msk.msrb.mxu2 %vm273_vm3, %v6146_v48 }
 0x7ab   :  { %4873 = vmatmul.msk.f32.gmra.mxu2 %vm273_vm3, %v1465_v26  ;;  %v6374_v26 = vld [vmem:[%s7783_s24 + $0x28] sm:$0xff] }
 0x7ac   :  { %4921 = vmatpush.xpose.msk.msrb.mxu2 %vm273_vm3, %v6136_v42  ;;  %4911 = vmatmul.msk.f32.gmra.mxu1 %vm273_vm3, %v6212_v23 }
 0x7ad   :  { %4945 = vmatmul.msk.f32.gmra.mxu0 %vm273_vm3, %v6212_v23 }
 0x7b0   :  { %4922 = vmatpush.xpose.msk.msrb.mxu2 %vm273_vm3, %v6120_v25 }
 0x7b3   :  { %4874 = vmatmul.msk.f32.gmra.mxu2 %vm273_vm3, %v1468_v38 }
 0x7b4   :  { %4912 = vmatmul.msk.f32.gmra.mxu1 %vm273_vm3, %v6221_v30 }
 0x7b5   :  { %4946 = vmatmul.msk.f32.gmra.mxu0 %vm273_vm3, %v6221_v30 }
 0x7bb   :  { %4875 = vmatmul.msk.f32.gmra.mxu2 %vm273_vm3, %v1471_v41  ;;  %v6382_v41 = vld [vmem:[%s7783_s24 + $0x30] sm:$0xff] }
 0x7d1   :  { %v1474_v43 = vpop.f32.mrf.mxu1  ;;  %v1713_v44 = vpop.f32.mrf.mxu0 }
 0x7d2   :  { %4876 = vmatmul.msk.f32.gmra.mxu2 %vm273_vm3, %v1474_v43 }
 0x7d9   :  { %v1477_v45 = vpop.f32.mrf.mxu1  ;;  %v1716_v54 = vpop.f32.mrf.mxu0 }
 0x7da   :  { %4877 = vmatmul.msk.f32.gmra.mxu2 %vm273_vm3, %v1477_v45 }
 0x7e1   :  { %v1480_v24 = vpop.f32.mrf.mxu1 }
 0x7e2   :  { %v1719_v29 = vpop.f32.mrf.mxu0  ;;  %4878 = vmatmul.msk.f32.gmra.mxu2 %vm273_vm3, %v1480_v24 }
 0x7e3   :  { %1758 = vmatpush.msra.mxu3 %v1719_v29 }
 0x7e5   :  { %1759 = vmatpush.msra.mxu3 %v1716_v54 }
 0x7e7   :  { %1760 = vmatpush.msra.mxu3 %v1713_v44  ;;  %v6393_v44 = vld [vmem:[%s7783_s24 + $0x38] sm:$0xff] }
 0x7e9   :  { %1761 = vmatpush.msra.mxu3 %v1710_v28  ;;  %v1823_v34 = vpop.f32.mrf.mxu1 }
 0x7ea   :  { %v6317_v46 = vpop.f32.mrf.mxu0  ;;  %4923 = vmatmul.msk.f32.vlgmr.msrb.gmra.mxu2 %vm273_vm3, %v1823_v34 }
 0x7eb   :  { %1762 = vmatpush.msra.mxu3 %v1707_v32 }
 0x7ed   :  { %1763 = vmatpush.msra.mxu3 %v1704_v39 }
 0x7ef   :  { %1764 = vmatpush.msra.mxu3 %v1701_v36 }
 0x7f1   :  { %1765 = vmatpush.msra.mxu3 %v1698_v12  ;;  %v1826_v47 = vpop.f32.mrf.mxu1 }
 0x7f2   :  { %v6320_v49 = vpop.f32.mrf.mxu0  ;;  %4924 = vmatmul.msk.f32.gmra.mxu2 %vm273_vm3, %v1826_v47 }
 0x7f3   :  { %1766 = vmatpush.msra.mxu3 %v1695_v33 }
 0x7f5   :  { %1767 = vmatpush.msra.mxu3 %v1692_v19 }
 0x7f9   :  { %v1829_v51 = vpop.f32.mrf.mxu1 }
 0x7fa   :  { %v6323_v53 = vpop.f32.mrf.mxu0  ;;  %4925 = vmatmul.msk.f32.gmra.mxu2 %vm273_vm3, %v1829_v51 }
 0x801   :  { %v1832_v56 = vpop.f32.mrf.mxu1 }
 0x802   :  { %v2071_v57 = vpop.f32.mrf.mxu0  ;;  %4926 = vmatmul.msk.f32.gmra.mxu2 %vm273_vm3, %v1832_v56 }
 0x809   :  { %v1835_v58 = vpop.f32.mrf.mxu1 }
 0x80a   :  { %v2074_v3 = vpop.f32.mrf.mxu0  ;;  %4927 = vmatmul.msk.f32.gmra.mxu2 %vm273_vm3, %v1835_v58 }
 0x80e   :  { %v1530_v60 = vpop.f32.mrf.mxu2 }
 0x80f   :  { %v6332_v61 = vadd.f32 %v1530_v60, %v6329_v59 }
 0x811   :  { %v1838_v52 = vpop.f32.mrf.mxu1  ;;  %v1561_v63 = vsel %vm1560_vm13, %v6332_v61, -inf }
 0x812   :  { %v2077_v0 = vpop.f32.mrf.mxu0  ;;  %1562 = vmax.xlane.f32.xlu2 %v1561_v63  ;;  %4928 = vmatmul.msk.f32.gmra.mxu2 %vm273_vm3, %v1838_v52 }
 0x816   :  { %v1533_v4 = vpop.f32.mrf.mxu2 }
 0x817   :  { %v6341_v8 = vadd.f32 %v1533_v4, %v6338_v2 }
 0x819   :  { %v1841_v9 = vpop.f32.mrf.mxu1  ;;  %v1564_v11 = vsel %vm1560_vm13, %v6341_v8, -inf }
 0x81a   :  { %v2080_v13 = vpop.f32.mrf.mxu0  ;;  %1565 = vmax.xlane.f32.xlu0 %v1564_v11  ;;  %4929 = vmatmul.msk.f32.gmra.mxu2 %vm273_vm3, %v1841_v9  ;;  %v6420_v9 = vld [vmem:[%s7783_s24 + $0x48] sm:$0xff] }
 0x81e   :  { %v1536_v50 = vpop.f32.mrf.mxu2 }
 0x81f   :  { %v6350_v15 = vadd.f32 %v1536_v50, %v6347_v1 }
 0x821   :  { %v1844_v16 = vpop.f32.mrf.mxu1  ;;  %v1567_v17 = vsel %vm1560_vm13, %v6350_v15, -inf }
 0x822   :  { %v2083_v18 = vpop.f32.mrf.mxu0  ;;  %1568 = vmax.xlane.f32.xlu1 %v1567_v17  ;;  %4930 = vmatmul.msk.f32.gmra.mxu2 %vm273_vm3, %v1844_v16 }
 0x826   :  { %v1539_v20 = vpop.f32.mrf.mxu2 }
 0x827   :  { %v6359_v14 = vadd.f32 %v1539_v20, %v6356_v22 }
 0x829   :  { %v1847_v55 = vpop.f32.mrf.mxu1  ;;  %v1570_v27 = vsel %vm1560_vm13, %v6359_v14, -inf }
 0x82a   :  { %v2086_v6 = vpop.f32.mrf.mxu0  ;;  %1571 = vmax.xlane.f32.xlu2 %v1570_v27  ;;  %4931 = vmatmul.msk.f32.gmra.mxu2 %vm273_vm3, %v1847_v55 }
 0x82e   :  { %v1542_v19 = vpop.f32.mrf.mxu2 }
 0x82f   :  { %v6368_v31 = vadd.f32 %v1542_v19, %v6365_v10 }
 0x831   :  { %v1850_v33 = vpop.f32.mrf.mxu1  ;;  %v1573_v35 = vsel %vm1560_vm13, %v6368_v31, -inf }
 0x832   :  { %v2089_v12 = vpop.f32.mrf.mxu0  ;;  %1574 = vmax.xlane.f32.xlu0 %v1573_v35  ;;  %4932 = vmatmul.msk.f32.gmra.mxu2 %vm273_vm3, %v1850_v33 }
 0x833   :  { %2128 = vmatpush.msrb.mxu3 %v2089_v12 }
 0x835   :  { %2129 = vmatpush.msrb.mxu3 %v2086_v6 }
 0x836   :  { %v1545_v36 = vpop.f32.mrf.mxu2 }
 0x837   :  { %v6377_v38 = vadd.f32 %v1545_v36, %v6374_v26  ;;  %2130 = vmatpush.msrb.mxu3 %v2083_v18 }
 0x839   :  { %2131 = vmatpush.msrb.mxu3 %v2080_v13  ;;  %v1576_v39 = vsel %vm1560_vm13, %v6377_v38, -inf }
 0x83a   :  { %1577 = vmax.xlane.f32.xlu1 %v1576_v39 }
 0x83b   :  { %2132 = vmatpush.msrb.mxu3 %v2077_v0 }
 0x83d   :  { %2133 = vmatpush.msrb.mxu3 %v2074_v3  ;;  %v6407_v3 = vld [vmem:[%s7783_s24 + $0x40] sm:$0xff] }
 0x83e   :  { %v1548_v32 = vpop.f32.mrf.mxu2 }
 0x83f   :  { %v6385_v28 = vadd.f32 %v1548_v32, %v6382_v41  ;;  %2134 = vmatpush.msrb.mxu3 %v2071_v57 }
 0x841   :  { %2135 = vmatpush.msrb.mxu3 %v6323_v53  ;;  %v1579_v43 = vsel %vm1560_vm13, %v6385_v28, -inf }
 0x842   :  { %1580 = vmax.xlane.f32.xlu2 %v1579_v43 }
 0x843   :  { %2136 = vmatpush.msrb.mxu3 %v6320_v49 }
 0x845   :  { %2137 = vmatpush.msrb.mxu3 %v6317_v46 }
 0x855   :  { %v1551_v45 = vpop.f32.mrf.mxu2 }
 0x856   :  { %v6396_v54 = vadd.f32 %v1551_v45, %v6393_v44 }
 0x858   :  { %v1582_v24 = vsel %vm1560_vm13, %v6396_v54, -inf }
 0x859   :  { %1583 = vmax.xlane.f32.xlu1 %v1582_v24 }
 0x85d   :  { %v1554_v34 = vpop.f32.mrf.mxu2 }
 0x85e   :  { %v6410_v60 = vadd.f32 %v1554_v34, %v6407_v3 }
 0x865   :  { %v1557_v56 = vpop.f32.mrf.mxu2 }
 0x866   :  { %v6423_v13 = vadd.f32 %v1557_v56, %v6420_v9 }
 0x868   :  { %v1588_v20 = vsel %vm1560_vm13, %v6423_v13, -inf }
 0x86d   :  { %v1900_v11 = vpop.f32.mrf.mxu2 }
 0x86e   :  { %v6433_v27 = vadd.f32 %v1900_v11, %v6329_v59 }
 0x870   :  { %v1930_v12 = vsel %vm1560_vm13, %v6433_v27, -inf }
 0x875   :  { %v1903_v55 = vpop.f32.mrf.mxu2 }
 0x876   :  { %v6443_v36 = vadd.f32 %v1903_v55, %v6338_v2 }
 0x878   :  { %v1933_v45 = vsel %vm1560_vm13, %v6443_v36, -inf }
 0x87d   :  { %v1906_v39 = vpop.f32.mrf.mxu2 }
 0x885   :  { %v1563_v29 = vpop.xlane.xlu2 %1562 }
 0x886   :  { %v1591_v47 = vsub.f32 %v6332_v61, %v1563_v29  ;;  %v6453_v29 = vadd.f32 %v1906_v39, %v6347_v1 }
 0x888   :  { %v1601_v51 = vmul.f32 1.442695, %v1591_v47 }
 0x88a   :  { %5270 = vpow2.f32 %v1601_v51 }
 0x88d   :  { %v1566_v49 = vpop.xlane.xlu0 %1565 }
 0x88e   :  { %v1592_v46 = vsub.f32 %v6341_v8, %v1566_v49  ;;  %v1585_v8 = vsel %vm1560_vm13, %v6410_v60, -inf }
 0x890   :  { %v6402_v53 = vpop.eup %5270  ;;  %v1603_v57 = vmul.f32 1.442695, %v1592_v46  ;;  %v1936_v46 = vsel %vm1560_vm13, %v6453_v29, -inf }
 0x891   :  { %v1621_v58 = vsel %vm1560_vm13, %v6402_v53, 0.0 }
 0x892   :  { %5272 = vpow2.f32 %v1603_v57  ;;  %1622 = vadd.xlane.f32.xlu0 %v1621_v58 }
 0x895   :  { %v1569_v61 = vpop.xlane.xlu1 %1568 }
 0x896   :  { %v1593_v52 = vsub.f32 %v6350_v15, %v1569_v61 }
 0x898   :  { %v6413_v63 = vpop.eup %5272  ;;  %v1605_v0 = vmul.f32 1.442695, %v1593_v52 }
 0x899   :  { %v1624_v4 = vsel %vm1560_vm13, %v6413_v63, 0.0 }
 0x89a   :  { %5274 = vpow2.f32 %v1605_v0  ;;  %1625 = vadd.xlane.f32.xlu2 %v1624_v4  ;;  %1586 = vmax.xlane.f32.xlu0 %v1585_v8 }
 0x89d   :  { %v1572_v50 = vpop.xlane.xlu2 %1571 }
 0x89e   :  { %v1594_v15 = vsub.f32 %v6359_v14, %v1572_v50 }
 0x8a0   :  { %v6426_v16 = vpop.eup %5274  ;;  %v1607_v17 = vmul.f32 1.442695, %v1594_v15 }
 0x8a1   :  { %v1627_v18 = vsel %vm1560_vm13, %v6426_v16, 0.0 }
 0x8a2   :  { %5276 = vpow2.f32 %v1607_v17  ;;  %1628 = vadd.xlane.f32.xlu1 %v1627_v18  ;;  %1589 = vmax.xlane.f32.xlu2 %v1588_v20 }
 0x8a5   :  { %v1575_v6 = vpop.xlane.xlu0 %1574 }
 0x8a6   :  { %v1595_v19 = vsub.f32 %v6368_v31, %v1575_v6 }
 0x8a8   :  { %v6436_v14 = vpop.eup %5276  ;;  %v1609_v33 = vmul.f32 1.442695, %v1595_v19 }
 0x8a9   :  { %v1630_v35 = vsel %vm1560_vm13, %v6436_v14, 0.0 }
 0x8aa   :  { %5278 = vpow2.f32 %v1609_v33  ;;  %1631 = vadd.xlane.f32.xlu0 %v1630_v35  ;;  %1931 = vmax.xlane.f32.xlu1 %v1930_v12 }
 0x8ad   :  { %v1578_v59 = vpop.xlane.xlu1 %1577 }
 0x8ae   :  { %v1596_v32 = vsub.f32 %v6377_v38, %v1578_v59  ;;  %v1909_v38 = vpop.f32.mrf.mxu2 }
 0x8af   :  { %v6463_v56 = vadd.f32 %v1909_v38, %v6356_v22 }
 0x8b0   :  { %v6446_v31 = vpop.eup %5278  ;;  %v1611_v43 = vmul.f32 1.442695, %v1596_v32 }
 0x8b1   :  { %v1633_v24 = vsel %vm1560_vm13, %v6446_v31, 0.0  ;;  %v1939_v57 = vsel %vm1560_vm13, %v6463_v56, -inf }
 0x8b2   :  { %5280 = vpow2.f32 %v1611_v43  ;;  %1934 = vmax.xlane.f32.xlu0 %v1933_v45  ;;  %1634 = vadd.xlane.f32.xlu2 %v1633_v24 }
 0x8b5   :  { %v1581_v2 = vpop.xlane.xlu2 %1580 }
 0x8b6   :  { %v1597_v34 = vsub.f32 %v6385_v28, %v1581_v2  ;;  %v1912_v58 = vpop.f32.mrf.mxu2 }
 0x8b7   :  { %v6472_v61 = vadd.f32 %v1912_v58, %v6365_v10 }
 0x8b8   :  { %v6456_v47 = vpop.eup %5280  ;;  %v1613_v51 = vmul.f32 1.442695, %v1597_v34 }
 0x8b9   :  { %v1636_v49 = vsel %vm1560_vm13, %v6456_v47, 0.0  ;;  %v1942_v52 = vsel %vm1560_vm13, %v6472_v61, -inf }
 0x8ba   :  { %5282 = vpow2.f32 %v1613_v51  ;;  %1637 = vadd.xlane.f32.xlu1 %v1636_v49  ;;  %1937 = vmax.xlane.f32.xlu2 %v1936_v46 }
 0x8be   :  { %v1915_v50 = vpop.f32.mrf.mxu2 }
 0x8bf   :  { %v6482_v15 = vadd.f32 %v1915_v50, %v6374_v26 }
 0x8c0   :  { %v6465_v1 = vpop.eup %5282 }
 0x8c1   :  { %v1639_v28 = vsel %vm1560_vm13, %v6465_v1, 0.0  ;;  %v1945_v10 = vsel %vm1560_vm13, %v6482_v15, -inf }
 0x8c2   :  { %1640 = vadd.xlane.f32.xlu0 %v1639_v28  ;;  %1940 = vmax.xlane.f32.xlu1 %v1939_v57 }
 0x8c6   :  { %v1918_v33 = vpop.f32.mrf.mxu2 }
 0x8c7   :  { %v6497_v45 = vadd.f32 %v1918_v33, %v6382_v41 }
 0x8c9   :  { %v1948_v49 = vsel %vm1560_vm13, %v6497_v45, -inf }
 0x8ca   :  { %1943 = vmax.xlane.f32.xlu0 %v1942_v52 }
 0x8cc   :  { %v1584_v22 = vpop.xlane.xlu1 %1583 }
 0x8cd   :  { %v1598_v0 = vsub.f32 %v6396_v54, %v1584_v22 }
 0x8ce   :  { %v1921_v34 = vpop.f32.mrf.mxu2 }
 0x8cf   :  { %v1615_v4 = vmul.f32 1.442695, %v1598_v0 }
 0x8d1   :  { %5284 = vpow2.f32 %v1615_v4 }
 0x8d6   :  { %v1924_v22 = vpop.f32.mrf.mxu2 }
 0x8d7   :  { %v6477_v8 = vpop.eup %5284 }
 0x8d8   :  { %v1642_v11 = vsel %vm1560_vm13, %v6477_v8, 0.0 }
 0x8d9   :  { %1643 = vadd.xlane.f32.xlu2 %v1642_v11 }
 0x8e1   :  { %1946 = vmax.xlane.f32.xlu2 %v1945_v10 }
 0x905   :  { %v1623_v17 = vpop.xlane.xlu0 %1622 }
 0x906   :  { %5286 = vrcp.f32 %v1623_v17 }
 0x90c   :  { %v5287_v18 = vpop.eup %5286 }
 0x90d   :  { %v1661_v54 = vmul.f32 %v5287_v18, %v6402_v53  ;;  %v1587_v20 = vpop.xlane.xlu0 %1586  ;;  %v1626_v55 = vpop.xlane.xlu2 %1625 }
 0x90e   :  { %v1599_v6 = vsub.f32 %v6410_v60, %v1587_v20  ;;  %5288 = vrcp.f32 %v1626_v55 }
 0x90f   :  { %4889 = vmatmul.msk.f32.vlgmr.msra.gmra.mxu3 %vm1560_vm13, %v1661_v54 }
 0x910   :  { %v1617_v19 = vmul.f32 1.442695, %v1599_v6 }
 0x912   :  { %5290 = vpow2.f32 %v1617_v19 }
 0x914   :  { %v5289_v26 = vpop.eup %5288 }
 0x915   :  { %v1629_v35 = vpop.xlane.xlu1 %1628  ;;  %v1590_v12 = vpop.xlane.xlu2 %1589  ;;  %v1662_v59 = vmul.f32 %v5289_v26, %v6413_v63 }
 0x916   :  { %5292 = vrcp.f32 %v1629_v35  ;;  %v1600_v39 = vsub.f32 %v6423_v13, %v1590_v12 }
 0x917   :  { %4890 = vmatmul.msk.f32.gmra.mxu3 %vm1560_vm13, %v1662_v59 }
 0x918   :  { %v6492_v53 = vpop.eup %5290  ;;  %v1619_v32 = vmul.f32 1.442695, %v1600_v39 }
 0x919   :  { %v1645_v60 = vsel %vm1560_vm13, %v6492_v53, 0.0 }
 0x91a   :  { %5294 = vpow2.f32 %v1619_v32  ;;  %1646 = vadd.xlane.f32.xlu1 %v1645_v60 }
 0x91c   :  { %v5293_v43 = vpop.eup %5292 }
 0x91d   :  { %v1632_v24 = vpop.xlane.xlu0 %1631  ;;  %v1932_v2 = vpop.xlane.xlu1 %1931  ;;  %v1663_v63 = vmul.f32 %v5293_v43, %v6426_v16  ;;  %v6509_v16 = vadd.f32 %v1921_v34, %v6393_v44 }
 0x91e   :  { %5296 = vrcp.f32 %v1632_v24  ;;  %v1960_v13 = vsub.f32 %v6433_v27, %v1932_v2 }
 0x91f   :  { %4891 = vmatmul.msk.f32.gmra.mxu3 %vm1560_vm13, %v1663_v63  ;;  %v1951_v44 = vsel %vm1560_vm13, %v6509_v16, -inf }
 0x920   :  { %v6502_v38 = vpop.eup %5294  ;;  %v1970_v51 = vmul.f32 1.442695, %v1960_v13 }
 0x921   :  { %v1648_v41 = vsel %vm1560_vm13, %v6502_v38, 0.0 }
 0x922   :  { %5298 = vpow2.f32 %v1970_v51  ;;  %1949 = vmax.xlane.f32.xlu1 %v1948_v49  ;;  %1649 = vadd.xlane.f32.xlu0 %v1648_v41 }
 0x924   :  { %v5297_v46 = vpop.eup %5296 }
 0x925   :  { %v1935_v28 = vpop.xlane.xlu0 %1934  ;;  %v1635_v27 = vpop.xlane.xlu2 %1634  ;;  %v1664_v57 = vmul.f32 %v5297_v46, %v6436_v14  ;;  %v6521_v14 = vadd.f32 %v1924_v22, %v6407_v3 }
 0x926   :  { %v1961_v58 = vsub.f32 %v6443_v36, %v1935_v28  ;;  %5300 = vrcp.f32 %v1635_v27  ;;  %v1927_v3 = vpop.f32.mrf.mxu2  ;;  %v1800_v28 = vld [vmem:[%s7784_s30 + $0x8] sm:$0xff]  ;;  %v1799_v27 = vld [vmem:[%s7784_s30] sm:$0xff] }
 0x927   :  { %4892 = vmatmul.msk.f32.gmra.mxu3 %vm1560_vm13, %v1664_v57  ;;  %v1954_v55 = vsel %vm1560_vm13, %v6521_v14, -inf  ;;  %2293 = vmatpush.msra.mxu2 %v1800_v28 }
 0x928   :  { %v6514_v52 = vpop.eup %5298  ;;  %v1972_v0 = vmul.f32 1.442695, %v1961_v58 }
 0x929   :  { %v1990_v4 = vsel %vm1560_vm13, %v6514_v52, 0.0  ;;  %2294 = vmatpush.msra.mxu2 %v1799_v27 }
 0x92a   :  { %5302 = vpow2.f32 %v1972_v0  ;;  %1991 = vadd.xlane.f32.xlu2 %v1990_v4  ;;  %1952 = vmax.xlane.f32.xlu0 %v1951_v44 }
 0x92c   :  { %v5301_v11 = vpop.eup %5300 }
 0x92d   :  { %v1638_v36 = vpop.xlane.xlu1 %1637  ;;  %v1938_v50 = vpop.xlane.xlu2 %1937  ;;  %v1665_v10 = vmul.f32 %v5301_v11, %v6446_v31  ;;  %v6533_v31 = vadd.f32 %v1927_v3, %v6420_v9 }
 0x92e   :  { %5304 = vrcp.f32 %v1638_v36  ;;  %v1962_v17 = vsub.f32 %v6453_v29, %v1938_v50 }
 0x92f   :  { %4893 = vmatmul.msk.f32.gmra.mxu3 %vm1560_vm13, %v1665_v10  ;;  %v1957_v59 = vsel %vm1560_vm13, %v6533_v31, -inf }
 0x930   :  { %v6526_v18 = vpop.eup %5302  ;;  %v1974_v54 = vmul.f32 1.442695, %v1962_v17 }
 0x931   :  { %v1993_v20 = vsel %vm1560_vm13, %v6526_v18, 0.0 }
 0x932   :  { %5306 = vpow2.f32 %v1974_v54  ;;  %1994 = vadd.xlane.f32.xlu1 %v1993_v20  ;;  %1955 = vmax.xlane.f32.xlu2 %v1954_v55 }
 0x934   :  { %v5305_v6 = vpop.eup %5304 }
 0x935   :  { %v1641_v29 = vpop.xlane.xlu0 %1640  ;;  %v1941_v19 = vpop.xlane.xlu1 %1940  ;;  %v1666_v26 = vmul.f32 %v5305_v6, %v6456_v47 }
 0x936   :  { %5308 = vrcp.f32 %v1641_v29  ;;  %v1963_v33 = vsub.f32 %v6463_v56, %v1941_v19 }
 0x937   :  { %4894 = vmatmul.msk.f32.gmra.mxu3 %vm1560_vm13, %v1666_v26 }
 0x938   :  { %v6538_v35 = vpop.eup %5306  ;;  %v1976_v12 = vmul.f32 1.442695, %v1963_v33 }
 0x939   :  { %v1996_v39 = vsel %vm1560_vm13, %v6538_v35, 0.0 }
 0x93a   :  { %5310 = vpow2.f32 %v1976_v12  ;;  %1958 = vmax.xlane.f32.xlu1 %v1957_v59  ;;  %1997 = vadd.xlane.f32.xlu0 %v1996_v39 }
 0x93c   :  { %v5309_v9 = vpop.eup %5308 }
 0x93d   :  { %v1944_v32 = vpop.xlane.xlu0 %1943  ;;  %v1667_v47 = vmul.f32 %v5309_v9, %v6465_v1 }
 0x93e   :  { %v1964_v56 = vsub.f32 %v6472_v61, %v1944_v32 }
 0x93f   :  { %4895 = vmatmul.msk.f32.gmra.mxu3 %vm1560_vm13, %v1667_v47 }
 0x940   :  { %v6547_v60 = vpop.eup %5310  ;;  %v1978_v43 = vmul.f32 1.442695, %v1964_v56 }
 0x941   :  { %v1999_v24 = vsel %vm1560_vm13, %v6547_v60, 0.0 }
 0x942   :  { %5312 = vpow2.f32 %v1978_v43  ;;  %2000 = vadd.xlane.f32.xlu2 %v1999_v24 }
 0x948   :  { %v6551_v2 = vpop.eup %5312 }
 0x949   :  { %v2002_v63 = vsel %vm1560_vm13, %v6551_v2, 0.0 }
 0x94a   :  { %2003 = vadd.xlane.f32.xlu0 %v2002_v63 }
 0x94c   :  { %v1644_v1 = vpop.xlane.xlu2 %1643 }
 0x94d   :  { %5314 = vrcp.f32 %v1644_v1 }
 0x953   :  { %v5315_v61 = vpop.eup %5314 }
 0x954   :  { %v1947_v34 = vpop.xlane.xlu2 %1946  ;;  %v1668_v13 = vmul.f32 %v5315_v61, %v6477_v8 }
 0x955   :  { %v1965_v51 = vsub.f32 %v6482_v15, %v1947_v34 }
 0x956   :  { %4896 = vmatmul.msk.f32.gmra.mxu3 %vm1560_vm13, %v1668_v13 }
 0x957   :  { %v1980_v49 = vmul.f32 1.442695, %v1965_v51 }
 0x959   :  { %5316 = vpow2.f32 %v1980_v49  ;;  %v4958_v49 = vld [vmem:[%s7784_s30 + $0x18] sm:$0xff] }
 0x95a   :  { %2216 = vmatpush.msrb.mxu1 %v4958_v49 }
 0x95f   :  { %v6558_v41 = vpop.eup %5316 }
 0x960   :  { %v2005_v46 = vsel %vm1560_vm13, %v6558_v41, 0.0 }
 0x961   :  { %2006 = vadd.xlane.f32.xlu1 %v2005_v46 }
 0x98d   :  { %v1647_v57 = vpop.xlane.xlu1 %1646 }
 0x98e   :  { %5318 = vrcp.f32 %v1647_v57 }
 0x992   :  { %v1769_v58 = vpop.f32.mrf.mxu3 }
 0x993   :  { %4969 = vmatmul.msk.f32.vlgmr.msra.gmra.mxu2 %vm317_vm4, %v1769_v58 }
 0x994   :  { %v5319_v8 = vpop.eup %5318 }
 0x995   :  { %v1950_v15 = vpop.xlane.xlu1 %1949  ;;  %v1650_v22 = vpop.xlane.xlu0 %1649  ;;  %v1669_v0 = vmul.f32 %v5319_v8, %v6492_v53  ;;  %v4957_v8 = vld [vmem:[%s7784_s30 + $0x10] sm:$0xff] }
 0x996   :  { %v1966_v4 = vsub.f32 %v6497_v45, %v1950_v15  ;;  %5320 = vrcp.f32 %v1650_v22  ;;  %2217 = vmatpush.msrb.mxu1 %v4957_v8 }
 0x997   :  { %4897 = vmatmul.msk.f32.gmra.mxu3 %vm1560_vm13, %v1669_v0 }
 0x998   :  { %v1982_v44 = vmul.f32 1.442695, %v1966_v4 }
 0x99a   :  { %5322 = vpow2.f32 %v1982_v44  ;;  %v1772_v11 = vpop.f32.mrf.mxu3 }
 0x99b   :  { %4970 = vmatmul.msk.f32.gmra.mxu2 %vm317_vm4, %v1772_v11 }
 0x99c   :  { %v5321_v36 = vpop.eup %5320 }
 0x99d   :  { %v1953_v50 = vpop.xlane.xlu0 %1952  ;;  %v1992_v10 = vpop.xlane.xlu2 %1991  ;;  %v1670_v17 = vmul.f32 %v5321_v36, %v6502_v38 }
 0x99e   :  { %v1967_v54 = vsub.f32 %v6509_v16, %v1953_v50  ;;  %5324 = vrcp.f32 %v1992_v10 }
 0x99f   :  { %4898 = vmatmul.msk.f32.gmra.mxu3 %vm1560_vm13, %v1670_v17 }
 0x9a0   :  { %v6572_v53 = vpop.eup %5322  ;;  %v1984_v45 = vmul.f32 1.442695, %v1967_v54 }
 0x9a1   :  { %v2008_v20 = vsel %vm1560_vm13, %v6572_v53, 0.0 }
 0x9a2   :  { %5326 = vpow2.f32 %v1984_v45  ;;  %v1775_v55 = vpop.f32.mrf.mxu3  ;;  %2009 = vadd.xlane.f32.xlu2 %v2008_v20 }
 0x9a3   :  { %4971 = vmatmul.msk.f32.gmra.mxu2 %vm317_vm4, %v1775_v55 }
 0x9a4   :  { %v5325_v3 = vpop.eup %5324 }
 0x9a5   :  { %v2030_v6 = vmul.f32 %v5325_v3, %v6514_v52  ;;  %v1995_v38 = vpop.xlane.xlu1 %1994  ;;  %v1956_v29 = vpop.xlane.xlu2 %1955 }
 0x9a6   :  { %5328 = vrcp.f32 %v1995_v38  ;;  %v1968_v16 = vsub.f32 %v6521_v14, %v1956_v29 }
 0x9a7   :  { %4947 = vmatmul.msk.f32.vlgmr.msrb.gmra.mxu3 %vm1560_vm13, %v2030_v6 }
 0x9a8   :  { %v6580_v19 = vpop.eup %5326  ;;  %v1986_v26 = vmul.f32 1.442695, %v1968_v16 }
 0x9a9   :  { %v2011_v33 = vsel %vm1560_vm13, %v6580_v19, 0.0 }
 0x9aa   :  { %5330 = vpow2.f32 %v1986_v26  ;;  %v1778_v12 = vpop.f32.mrf.mxu3  ;;  %2012 = vadd.xlane.f32.xlu0 %v2011_v33 }
 0x9ab   :  { %4972 = vmatmul.msk.f32.gmra.mxu2 %vm317_vm4, %v1778_v12 }
 0x9ac   :  { %v5329_v59 = vpop.eup %5328 }
 0x9ad   :  { %v1959_v52 = vpop.xlane.xlu1 %1958  ;;  %v1998_v39 = vpop.xlane.xlu0 %1997  ;;  %v2031_v9 = vmul.f32 %v5329_v59, %v6526_v18 }
 0x9ae   :  { %v1969_v14 = vsub.f32 %v6533_v31, %v1959_v52  ;;  %5332 = vrcp.f32 %v1998_v39 }
 0x9af   :  { %4948 = vmatmul.msk.f32.gmra.mxu3 %vm1560_vm13, %v2031_v9 }
 0x9b0   :  { %v5331_v32 = vpop.eup %5330  ;;  %v1988_v47 = vmul.f32 1.442695, %v1969_v14 }
 0x9b1   :  { %v2014_v56 = vsel %vm1560_vm13, %v5331_v32, 0.0 }
 0x9b2   :  { %5334 = vpow2.f32 %v1988_v47  ;;  %v1781_v43 = vpop.f32.mrf.mxu3  ;;  %2015 = vadd.xlane.f32.xlu1 %v2014_v56 }
 0x9b3   :  { %4973 = vmatmul.msk.f32.gmra.mxu2 %vm317_vm4, %v1781_v43 }
 0x9b4   :  { %v5333_v24 = vpop.eup %5332 }
 0x9b5   :  { %v2001_v63 = vpop.xlane.xlu2 %2000  ;;  %v2032_v1 = vmul.f32 %v5333_v24, %v6538_v35 }
 0x9b6   :  { %5336 = vrcp.f32 %v2001_v63 }
 0x9b7   :  { %4949 = vmatmul.msk.f32.gmra.mxu3 %vm1560_vm13, %v2032_v1 }
 0x9b8   :  { %v5335_v18 = vpop.eup %5334 }
 0x9b9   :  { %v2017_v31 = vsel %vm1560_vm13, %v5335_v18, 0.0 }
 0x9ba   :  { %2018 = vadd.xlane.f32.xlu2 %v2017_v31  ;;  %v1784_v61 = vpop.f32.mrf.mxu3 }
 0x9bb   :  { %4974 = vmatmul.msk.f32.gmra.mxu2 %vm317_vm4, %v1784_v61 }
 0x9bc   :  { %v5337_v34 = vpop.eup %5336 }
 0x9bd   :  { %v2004_v13 = vpop.xlane.xlu0 %2003  ;;  %v2033_v51 = vmul.f32 %v5337_v34, %v6547_v60 }
 0x9be   :  { %5338 = vrcp.f32 %v2004_v13 }
 0x9bf   :  { %4950 = vmatmul.msk.f32.gmra.mxu3 %vm1560_vm13, %v2033_v51 }
 0x9c2   :  { %v1787_v35 = vpop.f32.mrf.mxu3 }
 0x9c3   :  { %4975 = vmatmul.msk.f32.gmra.mxu2 %vm317_vm4, %v1787_v35 }
 0x9c4   :  { %v5339_v46 = vpop.eup %5338 }
 0x9c5   :  { %v2034_v28 = vmul.f32 %v5339_v46, %v6551_v2 }
 0x9c7   :  { %4951 = vmatmul.msk.f32.gmra.mxu3 %vm1560_vm13, %v2034_v28 }
 0x9d4   :  { %v2007_v27 = vpop.xlane.xlu1 %2006 }
 0x9d5   :  { %5340 = vrcp.f32 %v2007_v27 }
 0x9d9   :  { %v1790_v57 = vpop.f32.mrf.mxu3 }
 0x9da   :  { %4976 = vmatmul.msk.f32.gmra.mxu2 %vm317_vm4, %v1790_v57 }
 0x9db   :  { %v5341_v60 = vpop.eup %5340 }
 0x9dc   :  { %v2035_v58 = vmul.f32 %v5341_v60, %v6558_v41 }
 0x9de   :  { %4952 = vmatmul.msk.f32.gmra.mxu3 %vm1560_vm13, %v2035_v58 }
 0xa15   :  { %v2010_v15 = vpop.xlane.xlu2 %2009 }
 0xa16   :  { %5342 = vrcp.f32 %v2010_v15  ;;  %v2296_v29 = vpop.f32.mrf.mxu2 }
 0xa1a   :  { %v1793_v22 = vpop.f32.mrf.mxu3 }
 0xa1b   :  { %4977 = vmatmul.msk.f32.gmra.mxu2 %vm317_vm4, %v1793_v22 }
 0xa1c   :  { %v5343_v2 = vpop.eup %5342 }
 0xa1d   :  { %v2013_v0 = vpop.xlane.xlu0 %2012  ;;  %v2036_v4 = vmul.f32 %v5343_v2, %v6572_v53 }
 0xa1e   :  { %5344 = vrcp.f32 %v2013_v0  ;;  %v2299_v12 = vpop.f32.mrf.mxu2 }
 0xa1f   :  { %4953 = vmatmul.msk.f32.gmra.mxu3 %vm1560_vm13, %v2036_v4 }
 0xa22   :  { %v1796_v44 = vpop.f32.mrf.mxu3 }
 0xa23   :  { %4978 = vmatmul.msk.f32.gmra.mxu2 %vm317_vm4, %v1796_v44 }
 0xa24   :  { %v5345_v41 = vpop.eup %5344 }
 0xa25   :  { %v2016_v11 = vpop.xlane.xlu1 %2015  ;;  %v2037_v36 = vmul.f32 %v5345_v41, %v6580_v19  ;;  %v6620_v19 = vld [vmem:[%s7785_s6] ss:$0 sm:$0xff] }
 0xa26   :  { %5346 = vrcp.f32 %v2016_v11  ;;  %v2302_v43 = vpop.f32.mrf.mxu2 }
 0xa27   :  { %4954 = vmatmul.msk.f32.gmra.mxu3 %vm1560_vm13, %v2037_v36 }
 0xa2a   :  { %v2139_v50 = vpop.f32.mrf.mxu3 }
 0xa2b   :  { %4959 = vmatmul.msk.f32.vlgmr.msrb.gmra.mxu1 %vm317_vm4, %v2139_v50 }
 0xa2c   :  { %v5347_v10 = vpop.eup %5346 }
 0xa2d   :  { %v2019_v17 = vpop.xlane.xlu2 %2018  ;;  %v2038_v54 = vmul.f32 %v5347_v10, %v5331_v32 }
 0xa2e   :  { %5348 = vrcp.f32 %v2019_v17  ;;  %v2305_v34 = vpop.f32.mrf.mxu2 }
 0xa2f   :  { %4955 = vmatmul.msk.f32.gmra.mxu3 %vm1560_vm13, %v2038_v54 }
 0xa32   :  { %v2142_v53 = vpop.f32.mrf.mxu3 }
 0xa33   :  { %4960 = vmatmul.msk.f32.gmra.mxu1 %vm317_vm4, %v2142_v53 }
 0xa34   :  { %v5349_v45 = vpop.eup %5348 }
 0xa35   :  { %v2039_v20 = vmul.f32 %v5349_v45, %v5335_v18 }
 0xa36   :  { %v2308_v28 = vpop.f32.mrf.mxu2 }
 0xa37   :  { %4956 = vmatmul.msk.f32.gmra.mxu3 %vm1560_vm13, %v2039_v20 }
 0xa3a   :  { %v2145_v55 = vpop.f32.mrf.mxu3 }
 0xa3b   :  { %4961 = vmatmul.msk.f32.gmra.mxu1 %vm317_vm4, %v2145_v55 }
 0xa3e   :  { %v2311_v8 = vpop.f32.mrf.mxu2 }
 0xa42   :  { %v2148_v3 = vpop.f32.mrf.mxu3 }
 0xa43   :  { %4962 = vmatmul.msk.f32.gmra.mxu1 %vm317_vm4, %v2148_v3 }
 0xa46   :  { %v2314_v4 = vpop.f32.mrf.mxu2 }
 0xa4a   :  { %v2151_v6 = vpop.f32.mrf.mxu3 }
 0xa4b   :  { %4963 = vmatmul.msk.f32.gmra.mxu1 %vm317_vm4, %v2151_v6 }
 0xa5d   :  { %v2317_v10 = vpop.f32.mrf.mxu2 }
 0xa61   :  { %v2154_v38 = vpop.f32.mrf.mxu3 }
 0xa62   :  { %4964 = vmatmul.msk.f32.gmra.mxu1 %vm317_vm4, %v2154_v38 }
 0xa9e   :  { %v2320_v6 = vpop.f32.mrf.mxu2 }
 0xaa2   :  { %v2157_v16 = vpop.f32.mrf.mxu3 }
 0xaa3   :  { %4965 = vmatmul.msk.f32.gmra.mxu1 %vm317_vm4, %v2157_v16 }
 0xaa8   :  { %v2219_v26 = vpop.f32.mrf.mxu1 }
 0xaa9   :  { %v2297_v33 = vadd.f32 %v2296_v29, %v2219_v26 }
 0xaaa   :  { %v2160_v59 = vpop.f32.mrf.mxu3 }
 0xaab   :  { %v2330_v52 = vadd.f32 %v6620_v19, %v2297_v33  ;;  %4966 = vmatmul.msk.f32.gmra.mxu1 %vm317_vm4, %v2160_v59 }
 0xaad   :  { %v2340_v39 = vadd.f32 %v2330_v52, %v6120_v25 }
 0xaaf   :  { %v2352_v9 = vsel %vm273_vm3, %v2340_v39, 0.0 }
 0xab0   :  { %2353 = vadd.xlane.f32.xlu0 %v2352_v9  ;;  %v2222_v14 = vpop.f32.mrf.mxu1 }
 0xab1   :  { %v2300_v32 = vadd.f32 %v2299_v12, %v2222_v14 }
 0xab2   :  { %v2163_v47 = vpop.f32.mrf.mxu3 }
 0xab3   :  { %v2331_v56 = vadd.f32 %v6620_v19, %v2300_v32  ;;  %4967 = vmatmul.msk.f32.gmra.mxu1 %vm317_vm4, %v2163_v47  ;;  %v2323_v32 = vpop.f32.mrf.mxu2 }
 0xab5   :  { %v2341_v24 = vadd.f32 %v2331_v56, %v6136_v42 }
 0xab7   :  { %v2355_v63 = vsel %vm273_vm3, %v2341_v24, 0.0 }
 0xab8   :  { %v2225_v1 = vpop.f32.mrf.mxu1  ;;  %2356 = vadd.xlane.f32.xlu1 %v2355_v63 }
 0xab9   :  { %v2303_v18 = vadd.f32 %v2302_v43, %v2225_v1 }
 0xaba   :  { %v2166_v31 = vpop.f32.mrf.mxu3 }
 0xabb   :  { %v2332_v25 = vadd.f32 %v6620_v19, %v2303_v18  ;;  %4968 = vmatmul.msk.f32.gmra.mxu1 %vm317_vm4, %v2166_v31 }
 0xabd   :  { %v2342_v61 = vadd.f32 %v2332_v25, %v6146_v48 }
 0xabf   :  { %v2358_v13 = vsel %vm273_vm3, %v2342_v61, 0.0 }
 0xac0   :  { %2359 = vadd.xlane.f32.xlu2 %v2358_v13  ;;  %v2228_v51 = vpop.f32.mrf.mxu1 }
 0xac1   :  { %v2306_v49 = vadd.f32 %v2305_v34, %v2228_v51  ;;  %v2601_v51 = vld [vmem:[%s7786_s7 + $0x18] sm:$0xff] }
 0xac2   :  { %2648 = vmatpush.msrb.mxu0 %v2601_v51 }
 0xac3   :  { %v2333_v42 = vadd.f32 %v6620_v19, %v2306_v49 }
 0xac5   :  { %v2343_v35 = vadd.f32 %v2333_v42, %v6156_v7 }
 0xac7   :  { %v2361_v46 = vsel %vm273_vm3, %v2343_v35, 0.0 }
 0xac8   :  { %2362 = vadd.xlane.f32.xlu0 %v2361_v46  ;;  %v2231_v27 = vpop.f32.mrf.mxu1 }
 0xac9   :  { %v2309_v57 = vadd.f32 %v2308_v28, %v2231_v27 }
 0xacb   :  { %v2334_v60 = vadd.f32 %v6620_v19, %v2309_v57 }
 0xacd   :  { %v6639_v48 = vadd.f32 %v2334_v60, %v6165_v5 }
 0xacf   :  { %v2364_v58 = vsel %vm273_vm3, %v6639_v48, 0.0 }
 0xad0   :  { %2365 = vadd.xlane.f32.xlu1 %v2364_v58  ;;  %v2599_v58 = vld [vmem:[%s7786_s7 + $0x8] sm:$0xff] }
 0xadf   :  { %v2234_v15 = vpop.f32.mrf.mxu1 }
 0xae0   :  { %v2312_v22 = vadd.f32 %v2311_v8, %v2234_v15  ;;  %v2598_v8 = vld [vmem:[%s7786_s7] sm:$0xff] }
 0xae2   :  { %v2335_v7 = vadd.f32 %v6620_v19, %v2312_v22 }
 0xae4   :  { %v6645_v2 = vadd.f32 %v2335_v7, %v6174_v21 }
 0xae6   :  { %v2367_v0 = vsel %vm273_vm3, %v6645_v2, 0.0 }
 0xae7   :  { %2368 = vadd.xlane.f32.xlu2 %v2367_v0 }
 0xb20   :  { %v2237_v44 = vpop.f32.mrf.mxu1 }
 0xb21   :  { %v2315_v5 = vadd.f32 %v2314_v4, %v2237_v44 }
 0xb23   :  { %v2336_v41 = vadd.f32 %v6620_v19, %v2315_v5  ;;  %v2354_v11 = vpop.xlane.xlu0 %2353 }
 0xb24   :  { %v2382_v36 = vmul.f32 %v2354_v11, %v6021_v40 }
 0xb25   :  { %v6652_v50 = vadd.f32 %v2336_v41, %v6183_v37 }
 0xb26   :  { %v6654_v17 = vsub.f32 %v2340_v39, %v2382_v36 }
 0xb27   :  { %v2370_v21 = vsel %vm273_vm3, %v6652_v50, 0.0 }
 0xb28   :  { %2371 = vadd.xlane.f32.xlu1 %v2370_v21  ;;  %v2240_v54 = vpop.f32.mrf.mxu1  ;;  %v2402_v53 = vmul.f32 %v6654_v17, %v6654_v17 }
 0xb29   :  { %v2318_v45 = vadd.f32 %v2317_v10, %v2240_v54 }
 0xb2a   :  { %v2412_v20 = vsel %vm273_vm3, %v2402_v53, 0.0 }
 0xb2b   :  { %v2337_v55 = vadd.f32 %v6620_v19, %v2318_v45  ;;  %v2357_v3 = vpop.xlane.xlu1 %2356  ;;  %2413 = vadd.xlane.f32.xlu0 %v2412_v20 }
 0xb2c   :  { %v2383_v37 = vmul.f32 %v2357_v3, %v6021_v40 }
 0xb2d   :  { %v6666_v29 = vadd.f32 %v2337_v55, %v6203_v62 }
 0xb2e   :  { %v6663_v38 = vsub.f32 %v2341_v24, %v2383_v37 }
 0xb2f   :  { %v2373_v59 = vsel %vm273_vm3, %v6666_v29, 0.0 }
 0xb30   :  { %v2243_v16 = vpop.f32.mrf.mxu1  ;;  %v2403_v26 = vmul.f32 %v6663_v38, %v6663_v38 }
 0xb31   :  { %v2321_v33 = vadd.f32 %v2320_v6, %v2243_v16 }
 0xb32   :  { %v2415_v12 = vsel %vm273_vm3, %v2403_v26, 0.0 }
 0xb33   :  { %v2338_v52 = vadd.f32 %v6620_v19, %v2321_v33  ;;  %2416 = vadd.xlane.f32.xlu2 %v2415_v12  ;;  %2374 = vadd.xlane.f32.xlu0 %v2373_v59  ;;  %v2360_v39 = vpop.xlane.xlu2 %2359 }
 0xb34   :  { %v2384_v9 = vmul.f32 %v2360_v39, %v6021_v40 }
 0xb35   :  { %v6678_v62 = vadd.f32 %v2338_v52, %v6212_v23 }
 0xb36   :  { %v6675_v14 = vsub.f32 %v2342_v61, %v2384_v9  ;;  %v6737_v9 = vld [vmem:[%s7787_s10] ss:$0 sm:$0xff] }
 0xb37   :  { %v2376_v24 = vsel %vm273_vm3, %v6678_v62, 0.0 }
 0xb38   :  { %v2246_v47 = vpop.f32.mrf.mxu1  ;;  %v2404_v56 = vmul.f32 %v6675_v14, %v6675_v14 }
 0xb39   :  { %v2324_v43 = vadd.f32 %v2323_v32, %v2246_v47 }
 0xb3a   :  { %v2418_v63 = vsel %vm273_vm3, %v2404_v56, 0.0 }
 0xb3b   :  { %v2339_v1 = vadd.f32 %v6620_v19, %v2324_v43  ;;  %v2363_v18 = vpop.xlane.xlu0 %2362  ;;  %2377 = vadd.xlane.f32.xlu2 %v2376_v24  ;;  %2419 = vadd.xlane.f32.xlu1 %v2418_v63  ;;  %v6742_v43 = vld [vmem:[%s7788_s11] ss:$0 sm:$0xff] }
 0xb3c   :  { %v2385_v23 = vmul.f32 %v2363_v18, %v6021_v40 }
 0xb3d   :  { %v6690_v25 = vadd.f32 %v2339_v1, %v6221_v30 }
 0xb3e   :  { %v6687_v31 = vsub.f32 %v2343_v35, %v2385_v23 }
 0xb3f   :  { %v2379_v13 = vsel %vm273_vm3, %v6690_v25, 0.0 }
 0xb40   :  { %v2405_v61 = vmul.f32 %v6687_v31, %v6687_v31 }
 0xb42   :  { %v2421_v34 = vsel %vm273_vm3, %v2405_v61, 0.0 }
 0xb43   :  { %v2366_v19 = vpop.xlane.xlu1 %2365  ;;  %2422 = vadd.xlane.f32.xlu0 %v2421_v34  ;;  %2380 = vadd.xlane.f32.xlu1 %v2379_v13 }
 0xb44   :  { %v2386_v49 = vmul.f32 %v2366_v19, %v6021_v40 }
 0xb46   :  { %v6700_v30 = vsub.f32 %v6639_v48, %v2386_v49  ;;  %v2600_v48 = vld [vmem:[%s7786_s7 + $0x10] sm:$0xff] }
 0xb47   :  { %2649 = vmatpush.msrb.mxu0 %v2600_v48 }
 0xb48   :  { %v2406_v42 = vmul.f32 %v6700_v30, %v6700_v30 }
 0xb49   :  { %2650 = vmatpush.msrb.mxu0 %v2599_v58 }
 0xb4a   :  { %v2424_v35 = vsel %vm273_vm3, %v2406_v42, 0.0 }
 0xb4b   :  { %2425 = vadd.xlane.f32.xlu2 %v2424_v35  ;;  %2651 = vmatpush.msrb.mxu0 %v2598_v8 }
 0xb5a   :  { %v2369_v46 = vpop.xlane.xlu2 %2368 }
 0xb5b   :  { %v2387_v28 = vmul.f32 %v2369_v46, %v6021_v40 }
 0xb5d   :  { %v6707_v27 = vsub.f32 %v6645_v2, %v2387_v28 }
 0xb5f   :  { %v2407_v57 = vmul.f32 %v6707_v27, %v6707_v27 }
 0xb61   :  { %v2427_v60 = vsel %vm273_vm3, %v2407_v57, 0.0 }
 0xb62   :  { %2428 = vadd.xlane.f32.xlu0 %v2427_v60 }
 0xb9b   :  { %v2372_v15 = vpop.xlane.xlu1 %2371 }
 0xb9c   :  { %v2388_v22 = vmul.f32 %v2372_v15, %v6021_v40 }
 0xb9e   :  { %v6717_v7 = vsub.f32 %v6652_v50, %v2388_v22  ;;  %v2414_v2 = vpop.xlane.xlu0 %2413 }
 0xb9f   :  { %v2442_v0 = vmul.f32 %v2414_v2, %v6021_v40 }
 0xba0   :  { %v2408_v4 = vmul.f32 %v6717_v7, %v6717_v7 }
 0xba1   :  { %v2452_v44 = vadd.f32 1e-06, %v2442_v0 }
 0xba2   :  { %v2430_v5 = vsel %vm273_vm3, %v2408_v4, 0.0 }
 0xba3   :  { %5350 = vrsqrt.f32 %v2452_v44  ;;  %2431 = vadd.xlane.f32.xlu1 %v2430_v5  ;;  %vm2468_vm15 = vweird.f32 %v2452_v44 }
 0xba6   :  { %v2375_v41 = vpop.xlane.xlu0 %2374  ;;  %v2417_v11 = vpop.xlane.xlu2 %2416 }
 0xba7   :  { %v2389_v36 = vmul.f32 %v2375_v41, %v6021_v40  ;;  %v2443_v10 = vmul.f32 %v2417_v11, %v6021_v40 }
 0xba9   :  { %v5351_v21 = vpop.eup %5350  ;;  %v6726_v50 = vsub.f32 %v6666_v29, %v2389_v36  ;;  %v2453_v54 = vadd.f32 1e-06, %v2443_v10 }
 0xbaa   :  { %v2463_v53 = vmul.f32 %v5351_v21, %v2452_v44  ;;  %vm2469_vm14 = vweird.f32 %v5351_v21 }
 0xbab   :  { %5352 = vrsqrt.f32 %v2453_v54  ;;  %v2409_v45 = vmul.f32 %v6726_v50, %v6726_v50  ;;  %vm2470_vm0 = vmor %vm2468_vm15, %vm2469_vm14  ;;  %vm2478_vm2 = vweird.f32 %v2453_v54 }
 0xbac   :  { %v2464_v20 = vmul.f32 %v5351_v21, %v2463_v53 }
 0xbad   :  { %v2433_v55 = vsel %vm273_vm3, %v2409_v45, 0.0 }
 0xbae   :  { %v2465_v3 = vmul.f32 0.5, %v2464_v20  ;;  %2434 = vadd.xlane.f32.xlu2 %v2433_v55  ;;  %v2420_v37 = vpop.xlane.xlu1 %2419  ;;  %v2378_v6 = vpop.xlane.xlu2 %2377 }
 0xbaf   :  { %v2444_v16 = vmul.f32 %v2420_v37, %v6021_v40  ;;  %v2390_v29 = vmul.f32 %v2378_v6, %v6021_v40 }
 0xbb0   :  { %v2466_v26 = vsub.f32 1.5, %v2465_v3 }
 0xbb1   :  { %v5353_v33 = vpop.eup %5352  ;;  %v2454_v12 = vadd.f32 1e-06, %v2444_v16  ;;  %v6734_v59 = vsub.f32 %v6678_v62, %v2390_v29 }
 0xbb2   :  { %v2467_v52 = vmul.f32 %v5351_v21, %v2466_v26  ;;  %v2473_v39 = vmul.f32 %v5353_v33, %v2453_v54  ;;  %vm2479_vm1 = vweird.f32 %v5353_v33 }
 0xbb3   :  { %5354 = vrsqrt.f32 %v2454_v12  ;;  %v2410_v32 = vmul.f32 %v6734_v59, %v6734_v59  ;;  %vm2480_vm5 = vmor %vm2478_vm2, %vm2479_vm1  ;;  %vm2488_vm7 = vweird.f32 %v2454_v12 }
 0xbb4   :  { %v2471_v47 = vsel %vm2470_vm0, %v5351_v21, %v2467_v52  ;;  %v2474_v56 = vmul.f32 %v5353_v33, %v2473_v39 }
 0xbb5   :  { %v2562_v24 = vmul.f32 %v2471_v47, %v6654_v17  ;;  %v2436_v63 = vsel %vm273_vm3, %v2410_v32, 0.0 }
 0xbb6   :  { %v2475_v62 = vmul.f32 0.5, %v2474_v56  ;;  %v2423_v1 = vpop.xlane.xlu0 %2422  ;;  %v2381_v18 = vpop.xlane.xlu1 %2380  ;;  %2437 = vadd.xlane.f32.xlu0 %v2436_v63 }
 0xbb7   :  { %v2575_v23 = vmul.f32 %v6737_v9, %v2562_v24  ;;  %v2445_v61 = vmul.f32 %v2423_v1, %v6021_v40  ;;  %v2391_v34 = vmul.f32 %v2381_v18, %v6021_v40 }
 0xbb8   :  { %v2476_v13 = vsub.f32 1.5, %v2475_v62 }
 0xbb9   :  { %v5355_v51 = vpop.eup %5354  ;;  %v6750_v19 = vadd.f32 %v6742_v43, %v2575_v23  ;;  %v2455_v49 = vadd.f32 1e-06, %v2445_v61  ;;  %v6753_v17 = vsub.f32 %v6690_v25, %v2391_v34 }
 0xbba   :  { %v2477_v42 = vmul.f32 %v5353_v33, %v2476_v13  ;;  %v2483_v35 = vmul.f32 %v5355_v51, %v2454_v12  ;;  %vm2489_vm6 = vweird.f32 %v5355_v51 }
 0xbbb   :  { %5356 = vrsqrt.f32 %v2455_v49  ;;  %4979 = vmatmul.msk.f32.vlgmr.msrb.gmra.mxu0 %vm273_vm3, %v6750_v19  ;;  %v2411_v46 = vmul.f32 %v6753_v17, %v6753_v17  ;;  %vm2490_vm8 = vmor %vm2488_vm7, %vm2489_vm6  ;;  %vm2498_vm10 = vweird.f32 %v2455_v49 }
 0xbbc   :  { %v2481_v28 = vsel %vm2480_vm5, %v5353_v33, %v2477_v42  ;;  %v2484_v57 = vmul.f32 %v5355_v51, %v2483_v35  ;;  %v2780_v42 = vld [vmem:[%s7789_s15 + $0x38] sm:$0xff] }
 0xbbd   :  { %v2563_v60 = vmul.f32 %v2481_v28, %v6663_v38  ;;  %v2439_v48 = vsel %vm273_vm3, %v2411_v46, 0.0  ;;  %2824 = vmatpush.msra.mxu3 %v2780_v42 }
 0xbbe   :  { %v2485_v58 = vmul.f32 0.5, %v2484_v57  ;;  %2440 = vadd.xlane.f32.xlu1 %v2439_v48  ;;  %v2426_v25 = vpop.xlane.xlu2 %2425  ;;  %v2779_v48 = vld [vmem:[%s7789_s15 + $0x30] sm:$0xff] }
 0xbbf   :  { %v2446_v8 = vmul.f32 %v2426_v25, %v6021_v40  ;;  %v2576_v15 = vmul.f32 %v6737_v9, %v2563_v60  ;;  %2825 = vmatpush.msra.mxu3 %v2779_v48  ;;  %v2778_v25 = vld [vmem:[%s7789_s15 + $0x28] sm:$0xff] }
 0xbc0   :  { %v2486_v22 = vsub.f32 1.5, %v2485_v58 }
 0xbc1   :  { %v5357_v2 = vpop.eup %5356  ;;  %v2456_v0 = vadd.f32 1e-06, %v2446_v8  ;;  %v6764_v4 = vadd.f32 %v6742_v43, %v2576_v15  ;;  %2826 = vmatpush.msra.mxu3 %v2778_v25 }
 0xbc2   :  { %v2487_v44 = vmul.f32 %v5355_v51, %v2486_v22  ;;  %v2493_v5 = vmul.f32 %v5357_v2, %v2455_v49  ;;  %vm2499_vm9 = vweird.f32 %v5357_v2  ;;  %v2777_v22 = vld [vmem:[%s7789_s15 + $0x20] sm:$0xff] }
 0xbc3   :  { %5358 = vrsqrt.f32 %v2456_v0  ;;  %4980 = vmatmul.msk.f32.gmra.mxu0 %vm273_vm3, %v6764_v4  ;;  %vm2500_vm11 = vmor %vm2498_vm10, %vm2499_vm9  ;;  %vm2508_vm14 = vweird.f32 %v2456_v0  ;;  %2827 = vmatpush.msra.mxu3 %v2777_v22 }
 0xbc4   :  { %v2491_v38 = vsel %vm2490_vm8, %v5355_v51, %v2487_v44  ;;  %v2494_v41 = vmul.f32 %v5357_v2, %v2493_v5  ;;  %v2776_v44 = vld [vmem:[%s7789_s15 + $0x18] sm:$0xff] }
 0xbc5   :  { %v2564_v11 = vmul.f32 %v2491_v38, %v6675_v14  ;;  %2828 = vmatpush.msra.mxu3 %v2776_v44 }
 0xbc6   :  { %v2495_v36 = vmul.f32 0.5, %v2494_v41 }
 0xbc7   :  { %v2577_v10 = vmul.f32 %v6737_v9, %v2564_v11 }
 0xbc8   :  { %v2496_v21 = vsub.f32 1.5, %v2495_v36 }
 0xbc9   :  { %v5359_v54 = vpop.eup %5358  ;;  %v6771_v53 = vadd.f32 %v6742_v43, %v2577_v10  ;;  %v2775_v10 = vld [vmem:[%s7789_s15 + $0x10] sm:$0xff] }
 0xbca   :  { %v2497_v45 = vmul.f32 %v5357_v2, %v2496_v21  ;;  %v2503_v20 = vmul.f32 %v5359_v54, %v2456_v0  ;;  %vm2509_vm12 = vweird.f32 %v5359_v54  ;;  %2829 = vmatpush.msra.mxu3 %v2775_v10 }
 0xbcb   :  { %4981 = vmatmul.msk.f32.gmra.mxu0 %vm273_vm3, %v6771_v53  ;;  %vm2510_vm15 = vmor %vm2508_vm14, %vm2509_vm12 }
 0xbcc   :  { %v2501_v55 = vsel %vm2500_vm11, %v5357_v2, %v2497_v45  ;;  %v2504_v3 = vmul.f32 %v5359_v54, %v2503_v20  ;;  %v2774_v45 = vld [vmem:[%s7789_s15 + $0x8] sm:$0xff] }
 0xbcd   :  { %v2565_v14 = vmul.f32 %v2501_v55, %v6687_v31  ;;  %2830 = vmatpush.msra.mxu3 %v2774_v45 }
 0xbce   :  { %v2505_v37 = vmul.f32 0.5, %v2504_v3 }
 0xbcf   :  { %v2578_v6 = vmul.f32 %v6737_v9, %v2565_v14  ;;  %v2773_v14 = vld [vmem:[%s7789_s15] sm:$0xff] }
 0xbd0   :  { %v2506_v16 = vsub.f32 1.5, %v2505_v37  ;;  %2831 = vmatpush.msra.mxu3 %v2773_v14 }
 0xbd1   :  { %v6778_v29 = vadd.f32 %v6742_v43, %v2578_v6 }
 0xbd2   :  { %v2507_v26 = vmul.f32 %v5359_v54, %v2506_v16 }
 0xbd3   :  { %4982 = vmatmul.msk.f32.gmra.mxu0 %vm273_vm3, %v6778_v29 }
 0xbd4   :  { %v2511_v33 = vsel %vm2510_vm15, %v5359_v54, %v2507_v26 }
 0xbd5   :  { %v2566_v12 = vmul.f32 %v2511_v33, %v6700_v30  ;;  %v2429_v52 = vpop.xlane.xlu0 %2428 }
 0xbd6   :  { %v2447_v31 = vmul.f32 %v2429_v52, %v6021_v40 }
 0xbd7   :  { %v2579_v39 = vmul.f32 %v6737_v9, %v2566_v12  ;;  %v6817_v12 = vld [vmem:[%s7790_s16] ss:$0 sm:$0xff] }
 0xbd8   :  { %v2457_v32 = vadd.f32 1e-06, %v2447_v31 }
 0xbd9   :  { %v6786_v47 = vadd.f32 %v6742_v43, %v2579_v39 }
 0xbda   :  { %5360 = vrsqrt.f32 %v2457_v32  ;;  %vm2518_vm1 = vweird.f32 %v2457_v32 }
 0xbdb   :  { %4983 = vmatmul.msk.f32.gmra.mxu0 %vm273_vm3, %v6786_v47 }
 0xbe0   :  { %v5361_v56 = vpop.eup %5360 }
 0xbe1   :  { %v2513_v24 = vmul.f32 %v5361_v56, %v2457_v32  ;;  %vm2519_vm0 = vweird.f32 %v5361_v56 }
 0xbe2   :  { %vm2520_vm2 = vmor %vm2518_vm1, %vm2519_vm0 }
 0xbe3   :  { %v2514_v63 = vmul.f32 %v5361_v56, %v2513_v24 }
 0xbe5   :  { %v2515_v62 = vmul.f32 0.5, %v2514_v63 }
 0xbe7   :  { %v2516_v1 = vsub.f32 1.5, %v2515_v62 }
 0xbe9   :  { %v2517_v30 = vmul.f32 %v5361_v56, %v2516_v1 }
 0xbeb   :  { %v2521_v18 = vsel %vm2520_vm2, %v5361_v56, %v2517_v30  ;;  %vm2785_vm2 = vcmask 523264  }
 0xbec   :  { %v2567_v23 = vmul.f32 %v2521_v18, %v6707_v27 }
 0xbee   :  { %v2580_v61 = vmul.f32 %v6737_v9, %v2567_v23 }
 0xbf0   :  { %v6793_v34 = vadd.f32 %v6742_v43, %v2580_v61 }
 0xbf2   :  { %4984 = vmatmul.msk.f32.gmra.mxu0 %vm273_vm3, %v6793_v34 }
 0xc16   :  { %v2432_v13 = vpop.xlane.xlu1 %2431 }
 0xc17   :  { %v2448_v51 = vmul.f32 %v2432_v13, %v6021_v40 }
 0xc19   :  { %v2458_v49 = vadd.f32 1e-06, %v2448_v51 }
 0xc1b   :  { %5362 = vrsqrt.f32 %v2458_v49  ;;  %vm2528_vm6 = vweird.f32 %v2458_v49 }
 0xc21   :  { %v5363_v35 = vpop.eup %5362  ;;  %v2435_v46 = vpop.xlane.xlu2 %2434 }
 0xc22   :  { %v2523_v27 = vmul.f32 %v5363_v35, %v2458_v49  ;;  %v2449_v28 = vmul.f32 %v2435_v46, %v6021_v40  ;;  %vm2529_vm5 = vweird.f32 %v5363_v35 }
 0xc23   :  { %vm2530_vm7 = vmor %vm2528_vm6, %vm2529_vm5 }
 0xc24   :  { %v2524_v57 = vmul.f32 %v5363_v35, %v2523_v27  ;;  %v2459_v60 = vadd.f32 1e-06, %v2449_v28 }
 0xc26   :  { %v2525_v58 = vmul.f32 0.5, %v2524_v57  ;;  %5364 = vrsqrt.f32 %v2459_v60  ;;  %vm2538_vm9 = vweird.f32 %v2459_v60 }
 0xc28   :  { %v2526_v8 = vsub.f32 1.5, %v2525_v58 }
 0xc29   :  { %v2438_v15 = vpop.xlane.xlu0 %2437 }
 0xc2a   :  { %v2527_v2 = vmul.f32 %v5363_v35, %v2526_v8  ;;  %v2450_v0 = vmul.f32 %v2438_v15, %v6021_v40 }
 0xc2c   :  { %v5365_v5 = vpop.eup %5364  ;;  %v2531_v38 = vsel %vm2530_vm7, %v5363_v35, %v2527_v2  ;;  %v2460_v41 = vadd.f32 1e-06, %v2450_v0 }
 0xc2d   :  { %v2568_v11 = vmul.f32 %v2531_v38, %v6717_v7  ;;  %v2533_v36 = vmul.f32 %v5365_v5, %v2459_v60  ;;  %vm2539_vm8 = vweird.f32 %v5365_v5 }
 0xc2e   :  { %5366 = vrsqrt.f32 %v2460_v41  ;;  %vm2540_vm10 = vmor %vm2538_vm9, %vm2539_vm8  ;;  %vm2548_vm12 = vweird.f32 %v2460_v41 }
 0xc2f   :  { %v2534_v21 = vmul.f32 %v5365_v5, %v2533_v36  ;;  %v2581_v54 = vmul.f32 %v6737_v9, %v2568_v11 }
 0xc31   :  { %v2535_v20 = vmul.f32 0.5, %v2534_v21  ;;  %v2441_v55 = vpop.xlane.xlu1 %2440  ;;  %v6810_v3 = vadd.f32 %v6742_v43, %v2581_v54 }
 0xc32   :  { %v2451_v37 = vmul.f32 %v2441_v55, %v6021_v40 }
 0xc33   :  { %v2536_v7 = vsub.f32 1.5, %v2535_v20  ;;  %4985 = vmatmul.msk.f32.gmra.mxu0 %vm273_vm3, %v6810_v3 }
 0xc34   :  { %v5367_v6 = vpop.eup %5366  ;;  %v2461_v16 = vadd.f32 1e-06, %v2451_v37 }
 0xc35   :  { %v2537_v26 = vmul.f32 %v5365_v5, %v2536_v7  ;;  %v2543_v33 = vmul.f32 %v5367_v6, %v2460_v41  ;;  %vm2549_vm11 = vweird.f32 %v5367_v6 }
 0xc36   :  { %5368 = vrsqrt.f32 %v2461_v16  ;;  %vm2550_vm14 = vmor %vm2548_vm12, %vm2549_vm11  ;;  %vm2558_vm0 = vweird.f32 %v2461_v16 }
 0xc37   :  { %v2541_v52 = vsel %vm2540_vm10, %v5365_v5, %v2537_v26  ;;  %v2544_v31 = vmul.f32 %v5367_v6, %v2543_v33 }
 0xc38   :  { %v2569_v39 = vmul.f32 %v2541_v52, %v6726_v50  ;;  %v2653_v32 = vpop.f32.mrf.mxu0 }
 0xc39   :  { %v2545_v56 = vmul.f32 0.5, %v2544_v31  ;;  %v2654_v24 = vadd.f32 %v6817_v12, %v2653_v32 }
 0xc3a   :  { %v2582_v63 = vmul.f32 %v6737_v9, %v2569_v39 }
 0xc3b   :  { %v2546_v62 = vsub.f32 1.5, %v2545_v56  ;;  %v2683_v1 = vmul.f32 %v2654_v24, %v2654_v24 }
 0xc3c   :  { %v5369_v30 = vpop.eup %5368  ;;  %v6823_v18 = vadd.f32 %v6742_v43, %v2582_v63 }
 0xc3d   :  { %v2547_v23 = vmul.f32 %v5367_v6, %v2546_v62  ;;  %v2553_v61 = vmul.f32 %v5369_v30, %v2461_v16  ;;  %v2693_v13 = vmul.f32 %v2683_v1, %v2654_v24  ;;  %vm2559_vm15 = vweird.f32 %v5369_v30 }
 0xc3e   :  { %4986 = vmatmul.msk.f32.gmra.mxu0 %vm273_vm3, %v6823_v18  ;;  %vm2560_vm1 = vmor %vm2558_vm0, %vm2559_vm15 }
 0xc3f   :  { %v2551_v50 = vsel %vm2550_vm14, %v5367_v6, %v2547_v23  ;;  %v2554_v51 = vmul.f32 %v5369_v30, %v2553_v61  ;;  %v2703_v49 = vmul.f32 0.044715, %v2693_v13 }
 0xc40   :  { %v2570_v42 = vmul.f32 %v2551_v50, %v6734_v59  ;;  %v2656_v35 = vpop.f32.mrf.mxu0 }
 0xc41   :  { %v2555_v46 = vmul.f32 0.5, %v2554_v51  ;;  %v2713_v27 = vadd.f32 %v2703_v49, %v2654_v24  ;;  %v2657_v28 = vadd.f32 %v6817_v12, %v2656_v35 }
 0xc42   :  { %v2583_v57 = vmul.f32 %v6737_v9, %v2570_v42 }
 0xc43   :  { %v2556_v60 = vsub.f32 1.5, %v2555_v46  ;;  %v2723_v48 = vmul.f32 0.7978846, %v2713_v27  ;;  %v2684_v58 = vmul.f32 %v2657_v28, %v2657_v28 }
 0xc44   :  { %v6831_v25 = vadd.f32 %v6742_v43, %v2583_v57 }
 0xc45   :  { %v2557_v8 = vmul.f32 %v5369_v30, %v2556_v60  ;;  %5370 = vtanh.f32 %v2723_v48  ;;  %v2694_v15 = vmul.f32 %v2684_v58, %v2657_v28 }
 0xc46   :  { %4987 = vmatmul.msk.f32.gmra.mxu0 %vm273_vm3, %v6831_v25 }
 0xc47   :  { %v2561_v59 = vsel %vm2560_vm1, %v5369_v30, %v2557_v8  ;;  %v2704_v22 = vmul.f32 0.044715, %v2694_v15 }
 0xc48   :  { %v2571_v2 = vmul.f32 %v2561_v59, %v6753_v17  ;;  %v2659_v0 = vpop.f32.mrf.mxu0 }
 0xc49   :  { %v2714_v44 = vadd.f32 %v2704_v22, %v2657_v28  ;;  %v2660_v5 = vadd.f32 %v6817_v12, %v2659_v0 }
 0xc4a   :  { %v2584_v38 = vmul.f32 %v6737_v9, %v2571_v2 }
 0xc4b   :  { %v5371_v41 = vpop.eup %5370  ;;  %v2724_v11 = vmul.f32 0.7978846, %v2714_v44  ;;  %v2685_v36 = vmul.f32 %v2660_v5, %v2660_v5 }
 0xc4c   :  { %v2743_v10 = vadd.f32 1.0, %v5371_v41  ;;  %v6839_v21 = vadd.f32 %v6742_v43, %v2584_v38 }
 0xc4d   :  { %5372 = vtanh.f32 %v2724_v11  ;;  %v2695_v54 = vmul.f32 %v2685_v36, %v2660_v5 }
 0xc4e   :  { %v2753_v45 = vmul.f32 0.5, %v2743_v10  ;;  %4988 = vmatmul.msk.f32.gmra.mxu0 %vm273_vm3, %v6839_v21 }
 0xc4f   :  { %v2705_v17 = vmul.f32 0.044715, %v2695_v54 }
 0xc50   :  { %v2763_v20 = vmul.f32 %v2753_v45, %v2654_v24  ;;  %v2662_v55 = vpop.f32.mrf.mxu0 }
 0xc51   :  { %v2715_v14 = vadd.f32 %v2705_v17, %v2660_v5  ;;  %v2663_v9 = vadd.f32 %v6817_v12, %v2662_v55 }
 0xc52   :  { %4989 = vmatmul.msk.f32.vlgmr.msra.gmra.mxu3 %vm2785_vm2, %v2763_v20 }
 0xc53   :  { %v5373_v37 = vpop.eup %5372  ;;  %v2725_v7 = vmul.f32 0.7978846, %v2715_v14  ;;  %v2686_v6 = vmul.f32 %v2663_v9, %v2663_v9 }
 0xc54   :  { %v2744_v43 = vadd.f32 1.0, %v5373_v37 }
 0xc55   :  { %5374 = vtanh.f32 %v2725_v7  ;;  %v2696_v16 = vmul.f32 %v2686_v6, %v2663_v9 }
 0xc56   :  { %v2754_v26 = vmul.f32 0.5, %v2744_v43 }
 0xc57   :  { %v2706_v33 = vmul.f32 0.044715, %v2696_v16 }
 0xc58   :  { %v2665_v52 = vpop.f32.mrf.mxu0  ;;  %v2764_v31 = vmul.f32 %v2754_v26, %v2657_v28 }
 0xc59   :  { %v2716_v39 = vadd.f32 %v2706_v33, %v2663_v9  ;;  %v2666_v32 = vadd.f32 %v6817_v12, %v2665_v52 }
 0xc5a   :  { %4990 = vmatmul.msk.f32.gmra.mxu3 %vm2785_vm2, %v2764_v31 }
 0xc5b   :  { %v5375_v56 = vpop.eup %5374  ;;  %v2726_v24 = vmul.f32 0.7978846, %v2716_v39  ;;  %v2687_v63 = vmul.f32 %v2666_v32, %v2666_v32 }
 0xc5c   :  { %v2745_v62 = vadd.f32 1.0, %v5375_v56 }
 0xc5d   :  { %5376 = vtanh.f32 %v2726_v24  ;;  %v2697_v1 = vmul.f32 %v2687_v63, %v2666_v32 }
 0xc5e   :  { %v2755_v30 = vmul.f32 0.5, %v2745_v62 }
 0xc5f   :  { %v2707_v23 = vmul.f32 0.044715, %v2697_v1 }
 0xc60   :  { %v2765_v61 = vmul.f32 %v2755_v30, %v2660_v5 }
 0xc61   :  { %v2717_v13 = vadd.f32 %v2707_v23, %v2666_v32 }
 0xc62   :  { %4991 = vmatmul.msk.f32.gmra.mxu3 %vm2785_vm2, %v2765_v61 }
 0xc63   :  { %v5377_v50 = vpop.eup %5376  ;;  %v2727_v51 = vmul.f32 0.7978846, %v2717_v13 }
 0xc64   :  { %v2746_v49 = vadd.f32 1.0, %v5377_v50 }
 0xc65   :  { %5378 = vtanh.f32 %v2727_v51  ;;  %v6858_v51 = vld [vmem:[%s5793_s12] ss:$0 sm:$0xff] }
 0xc66   :  { %v2756_v42 = vmul.f32 0.5, %v2746_v49 }
 0xc68   :  { %v2766_v35 = vmul.f32 %v2756_v42, %v2663_v9 }
 0xc6a   :  { %4992 = vmatmul.msk.f32.gmra.mxu3 %vm2785_vm2, %v2766_v35 }
 0xc6b   :  { %v5379_v46 = vpop.eup %5378 }
 0xc6c   :  { %v2747_v27 = vadd.f32 1.0, %v5379_v46 }
 0xc6e   :  { %v2757_v28 = vmul.f32 0.5, %v2747_v27 }
 0xc6f   :  { %v2668_v57 = vpop.f32.mrf.mxu0 }
 0xc70   :  { %v2669_v60 = vadd.f32 %v6817_v12, %v2668_v57  ;;  %v2767_v48 = vmul.f32 %v2757_v28, %v2666_v32 }
 0xc72   :  { %v2688_v58 = vmul.f32 %v2669_v60, %v2669_v60  ;;  %4993 = vmatmul.msk.f32.gmra.mxu3 %vm2785_vm2, %v2767_v48 }
 0xc74   :  { %v2698_v8 = vmul.f32 %v2688_v58, %v2669_v60 }
 0xc76   :  { %v2708_v15 = vmul.f32 0.044715, %v2698_v8 }
 0xc78   :  { %v2718_v59 = vadd.f32 %v2708_v15, %v2669_v60 }
 0xc7a   :  { %v2728_v22 = vmul.f32 0.7978846, %v2718_v59 }
 0xc7c   :  { %5380 = vtanh.f32 %v2728_v22 }
 0xc82   :  { %v5381_v2 = vpop.eup %5380 }
 0xc83   :  { %v2748_v0 = vadd.f32 1.0, %v5381_v2 }
 0xc85   :  { %v2758_v44 = vmul.f32 0.5, %v2748_v0 }
 0xc87   :  { %v2768_v5 = vmul.f32 %v2758_v44, %v2669_v60 }
 0xc89   :  { %4994 = vmatmul.msk.f32.gmra.mxu3 %vm2785_vm2, %v2768_v5 }
 0xcb0   :  { %v2671_v38 = vpop.f32.mrf.mxu0 }
 0xcb1   :  { %v2672_v41 = vadd.f32 %v6817_v12, %v2671_v38 }
 0xcb3   :  { %v2689_v11 = vmul.f32 %v2672_v41, %v2672_v41 }
 0xcb5   :  { %v2699_v36 = vmul.f32 %v2689_v11, %v2672_v41 }
 0xcb7   :  { %v2709_v10 = vmul.f32 0.044715, %v2699_v36 }
 0xcb9   :  { %v2719_v54 = vadd.f32 %v2709_v10, %v2672_v41 }
 0xcbb   :  { %v2729_v45 = vmul.f32 0.7978846, %v2719_v54  ;;  %v2674_v17 = vpop.f32.mrf.mxu0 }
 0xcbc   :  { %v2675_v20 = vadd.f32 %v6817_v12, %v2674_v17 }
 0xcbd   :  { %5382 = vtanh.f32 %v2729_v45 }
 0xcbe   :  { %v2690_v55 = vmul.f32 %v2675_v20, %v2675_v20 }
 0xcc0   :  { %v2700_v14 = vmul.f32 %v2690_v55, %v2675_v20 }
 0xcc2   :  { %v2710_v9 = vmul.f32 0.044715, %v2700_v14 }
 0xcc3   :  { %v5383_v37 = vpop.eup %5382  ;;  %v2677_v7 = vpop.f32.mrf.mxu0 }
 0xcc4   :  { %v2720_v6 = vadd.f32 %v2710_v9, %v2675_v20  ;;  %v2678_v43 = vadd.f32 %v6817_v12, %v2677_v7  ;;  %v2749_v16 = vadd.f32 1.0, %v5383_v37 }
 0xcc6   :  { %v2730_v26 = vmul.f32 0.7978846, %v2720_v6  ;;  %v2691_v33 = vmul.f32 %v2678_v43, %v2678_v43  ;;  %v2759_v52 = vmul.f32 0.5, %v2749_v16 }
 0xcc8   :  { %5384 = vtanh.f32 %v2730_v26  ;;  %v2701_v31 = vmul.f32 %v2691_v33, %v2678_v43  ;;  %v2769_v39 = vmul.f32 %v2759_v52, %v2672_v41 }
 0xcca   :  { %v2711_v32 = vmul.f32 0.044715, %v2701_v31  ;;  %4995 = vmatmul.msk.f32.gmra.mxu3 %vm2785_vm2, %v2769_v39 }
 0xccb   :  { %v2680_v56 = vpop.f32.mrf.mxu0 }
 0xccc   :  { %v2721_v24 = vadd.f32 %v2711_v32, %v2678_v43  ;;  %v2681_v63 = vadd.f32 %v6817_v12, %v2680_v56 }
 0xcce   :  { %v5385_v62 = vpop.eup %5384  ;;  %v2731_v1 = vmul.f32 0.7978846, %v2721_v24  ;;  %v2692_v30 = vmul.f32 %v2681_v63, %v2681_v63 }
 0xccf   :  { %v2750_v23 = vadd.f32 1.0, %v5385_v62 }
 0xcd0   :  { %5386 = vtanh.f32 %v2731_v1  ;;  %v2702_v61 = vmul.f32 %v2692_v30, %v2681_v63 }
 0xcd1   :  { %v2760_v13 = vmul.f32 0.5, %v2750_v23 }
 0xcd2   :  { %v2712_v50 = vmul.f32 0.044715, %v2702_v61 }
 0xcd3   :  { %v2770_v49 = vmul.f32 %v2760_v13, %v2675_v20 }
 0xcd4   :  { %v2722_v42 = vadd.f32 %v2712_v50, %v2681_v63 }
 0xcd5   :  { %v2833_v35 = vpop.f32.mrf.mxu3  ;;  %4996 = vmatmul.msk.f32.gmra.mxu3 %vm2785_vm2, %v2770_v49 }
 0xcd6   :  { %v5387_v46 = vpop.eup %5386  ;;  %v2732_v27 = vmul.f32 0.7978846, %v2722_v42  ;;  %v2834_v28 = vadd.f32 %v6858_v51, %v2833_v35 }
 0xcd7   :  { %v2751_v12 = vadd.f32 1.0, %v5387_v46 }
 0xcd8   :  { %5388 = vtanh.f32 %v2732_v27  ;;  %v2863_v57 = vadd.f32 %v2834_v28, %v6750_v19 }
 0xcd9   :  { %v2761_v60 = vmul.f32 0.5, %v2751_v12 }
 0xcda   :  { %v2875_v48 = vsel %vm273_vm3, %v2863_v57, 0.0 }
 0xcdb   :  { %2876 = vadd.xlane.f32.xlu2 %v2875_v48  ;;  %v2771_v58 = vmul.f32 %v2761_v60, %v2678_v43 }
 0xcdd   :  { %v2836_v8 = vpop.f32.mrf.mxu3  ;;  %4997 = vmatmul.msk.f32.gmra.mxu3 %vm2785_vm2, %v2771_v58 }
 0xcde   :  { %v5389_v15 = vpop.eup %5388  ;;  %v2837_v59 = vadd.f32 %v6858_v51, %v2836_v8 }
 0xcdf   :  { %v2752_v22 = vadd.f32 1.0, %v5389_v15 }
 0xce0   :  { %v2864_v2 = vadd.f32 %v2837_v59, %v6764_v4 }
 0xce1   :  { %v2762_v0 = vmul.f32 0.5, %v2752_v22 }
 0xce2   :  { %v2878_v44 = vsel %vm273_vm3, %v2864_v2, 0.0 }
 0xce3   :  { %2879 = vadd.xlane.f32.xlu0 %v2878_v44  ;;  %v2772_v5 = vmul.f32 %v2762_v0, %v2681_v63 }
 0xce5   :  { %v2839_v19 = vpop.f32.mrf.mxu3  ;;  %4998 = vmatmul.msk.f32.gmra.mxu3 %vm2785_vm2, %v2772_v5  ;;  %v5002_v5 = vld [vmem:[%s7779_s3 + $0x58] sm:$0xff] }
 0xce6   :  { %v2840_v38 = vadd.f32 %v6858_v51, %v2839_v19  ;;  %v5036_v19 = vld [vmem:[%s7780_s8 + $0x58] sm:$0xff]  ;;  %3168 = vmatpush.msra.mxu1 %v5002_v5 }
 0xce7   :  { %3407 = vmatpush.msra.mxu0 %v5036_v19 }
 0xce8   :  { %v2865_v41 = vadd.f32 %v2840_v38, %v6771_v53  ;;  %v5001_v38 = vld [vmem:[%s7779_s3 + $0x50] sm:$0xff] }
 0xce9   :  { %3169 = vmatpush.msra.mxu1 %v5001_v38 }
 0xcea   :  { %v2881_v11 = vsel %vm273_vm3, %v2865_v41, 0.0 }
 0xceb   :  { %2882 = vadd.xlane.f32.xlu1 %v2881_v11  ;;  %v5000_v11 = vld [vmem:[%s7779_s3 + $0x48] sm:$0xff] }
 0xcec   :  { %3170 = vmatpush.msra.mxu1 %v5000_v11 }
 0xced   :  { %v2842_v36 = vpop.f32.mrf.mxu3 }
 0xcee   :  { %v2843_v10 = vadd.f32 %v6858_v51, %v2842_v36  ;;  %v5034_v36 = vld [vmem:[%s7780_s8 + $0x48] sm:$0xff] }
 0xcf0   :  { %v2866_v4 = vadd.f32 %v2843_v10, %v6778_v29  ;;  %v4999_v10 = vld [vmem:[%s7779_s3 + $0x40] sm:$0xff] }
 0xcf1   :  { %3171 = vmatpush.msra.mxu1 %v4999_v10 }
 0xcf2   :  { %v2884_v54 = vsel %vm273_vm3, %v2866_v4, 0.0 }
 0xcf3   :  { %2885 = vadd.xlane.f32.xlu2 %v2884_v54 }
 0xcf5   :  { %v2845_v45 = vpop.f32.mrf.mxu3 }
 0xcf6   :  { %v2846_v17 = vadd.f32 %v6858_v51, %v2845_v45 }
 0xcf8   :  { %v2867_v20 = vadd.f32 %v2846_v17, %v6786_v47 }
 0xcfa   :  { %v2887_v55 = vsel %vm273_vm3, %v2867_v20, 0.0 }
 0xcfb   :  { %2888 = vadd.xlane.f32.xlu0 %v2887_v55 }
 0xd0c   :  { %v2848_v53 = vpop.f32.mrf.mxu3 }
 0xd0d   :  { %v2849_v14 = vadd.f32 %v6858_v51, %v2848_v53 }
 0xd0f   :  { %v2868_v9 = vadd.f32 %v2849_v14, %v6793_v34 }
 0xd11   :  { %v2890_v37 = vsel %vm273_vm3, %v2868_v9, 0.0 }
 0xd12   :  { %2891 = vadd.xlane.f32.xlu1 %v2890_v37 }
 0xd4d   :  { %v2851_v29 = vpop.f32.mrf.mxu3 }
 0xd4e   :  { %v2852_v7 = vadd.f32 %v6858_v51, %v2851_v29  ;;  %v2877_v6 = vpop.xlane.xlu2 %2876 }
 0xd4f   :  { %v2905_v43 = vmul.f32 %v2877_v6, %v6021_v40 }
 0xd50   :  { %v6884_v16 = vadd.f32 %v2852_v7, %v6810_v3 }
 0xd51   :  { %v6886_v47 = vsub.f32 %v2863_v57, %v2905_v43 }
 0xd52   :  { %v2893_v26 = vsel %vm273_vm3, %v6884_v16, 0.0 }
 0xd53   :  { %2894 = vadd.xlane.f32.xlu0 %v2893_v26  ;;  %v2925_v34 = vmul.f32 %v6886_v47, %v6886_v47 }
 0xd55   :  { %v2935_v33 = vsel %vm273_vm3, %v2925_v34, 0.0 }
 0xd56   :  { %v2880_v52 = vpop.xlane.xlu0 %2879  ;;  %2936 = vadd.xlane.f32.xlu2 %v2935_v33 }
 0xd57   :  { %v2906_v31 = vmul.f32 %v2880_v52, %v6021_v40 }
 0xd58   :  { %v2854_v39 = vpop.f32.mrf.mxu3 }
 0xd59   :  { %v6894_v32 = vsub.f32 %v2864_v2, %v2906_v31  ;;  %v2855_v3 = vadd.f32 %v6858_v51, %v2854_v39 }
 0xd5b   :  { %v2926_v56 = vmul.f32 %v6894_v32, %v6894_v32  ;;  %v6900_v24 = vadd.f32 %v2855_v3, %v6823_v18 }
 0xd5d   :  { %v2938_v63 = vsel %vm273_vm3, %v2926_v56, 0.0  ;;  %v2896_v62 = vsel %vm273_vm3, %v6900_v24, 0.0 }
 0xd5e   :  { %v2883_v1 = vpop.xlane.xlu1 %2882  ;;  %2939 = vadd.xlane.f32.xlu1 %v2938_v63  ;;  %2897 = vadd.xlane.f32.xlu2 %v2896_v62 }
 0xd5f   :  { %v2907_v30 = vmul.f32 %v2883_v1, %v6021_v40 }
 0xd60   :  { %v2857_v23 = vpop.f32.mrf.mxu3 }
 0xd61   :  { %v6906_v61 = vsub.f32 %v2865_v41, %v2907_v30  ;;  %v2858_v13 = vadd.f32 %v6858_v51, %v2857_v23  ;;  %v5035_v41 = vld [vmem:[%s7780_s8 + $0x50] sm:$0xff] }
 0xd62   :  { %3408 = vmatpush.msra.mxu0 %v5035_v41 }
 0xd63   :  { %v2927_v50 = vmul.f32 %v6906_v61, %v6906_v61  ;;  %v6912_v18 = vadd.f32 %v2858_v13, %v6831_v25 }
 0xd64   :  { %3409 = vmatpush.msra.mxu0 %v5034_v36 }
 0xd65   :  { %v2941_v49 = vsel %vm273_vm3, %v2927_v50, 0.0  ;;  %v2899_v42 = vsel %vm273_vm3, %v6912_v18, 0.0 }
 0xd66   :  { %2942 = vadd.xlane.f32.xlu0 %v2941_v49  ;;  %2900 = vadd.xlane.f32.xlu1 %v2899_v42  ;;  %v2886_v35 = vpop.xlane.xlu2 %2885  ;;  %v6971_v49 = vld [vmem:[%s5798_s20] ss:$0 sm:$0xff] }
 0xd67   :  { %v2908_v46 = vmul.f32 %v2886_v35, %v6021_v40 }
 0xd68   :  { %v2860_v27 = vpop.f32.mrf.mxu3 }
 0xd69   :  { %v6918_v28 = vsub.f32 %v2866_v4, %v2908_v46  ;;  %v2861_v12 = vadd.f32 %v6858_v51, %v2860_v27  ;;  %v5033_v4 = vld [vmem:[%s7780_s8 + $0x40] sm:$0xff] }
 0xd6a   :  { %3410 = vmatpush.msra.mxu0 %v5033_v4  ;;  %v6976_v27 = vld [vmem:[%s5803_s27] ss:$0 sm:$0xff] }
 0xd6b   :  { %v6922_v57 = vadd.f32 %v2861_v12, %v6839_v21  ;;  %v2928_v25 = vmul.f32 %v6918_v28, %v6918_v28 }
 0xd6d   :  { %v2902_v60 = vsel %vm273_vm3, %v6922_v57, 0.0  ;;  %v2944_v48 = vsel %vm273_vm3, %v2928_v25, 0.0 }
 0xd6e   :  { %v2889_v58 = vpop.xlane.xlu0 %2888  ;;  %2903 = vadd.xlane.f32.xlu0 %v2902_v60  ;;  %2945 = vadd.xlane.f32.xlu2 %v2944_v48 }
 0xd6f   :  { %v2909_v8 = vmul.f32 %v2889_v58, %v6021_v40 }
 0xd71   :  { %v6930_v51 = vsub.f32 %v2867_v20, %v2909_v8 }
 0xd73   :  { %v2929_v21 = vmul.f32 %v6930_v51, %v6930_v51 }
 0xd75   :  { %v2947_v15 = vsel %vm273_vm3, %v2929_v21, 0.0 }
 0xd76   :  { %2948 = vadd.xlane.f32.xlu1 %v2947_v15 }
 0xd85   :  { %v2892_v59 = vpop.xlane.xlu1 %2891 }
 0xd86   :  { %v2910_v22 = vmul.f32 %v2892_v59, %v6021_v40 }
 0xd88   :  { %v6936_v2 = vsub.f32 %v2868_v9, %v2910_v22 }
 0xd8a   :  { %v2930_v0 = vmul.f32 %v6936_v2, %v6936_v2 }
 0xd8c   :  { %v2950_v44 = vsel %vm273_vm3, %v2930_v0, 0.0 }
 0xd8d   :  { %2951 = vadd.xlane.f32.xlu2 %v2950_v44 }
 0xdc6   :  { %v2895_v54 = vpop.xlane.xlu0 %2894 }
 0xdc7   :  { %v2911_v45 = vmul.f32 %v2895_v54, %v6021_v40 }
 0xdc9   :  { %v6951_v17 = vsub.f32 %v6884_v16, %v2911_v45  ;;  %v2937_v20 = vpop.xlane.xlu2 %2936 }
 0xdca   :  { %v2965_v55 = vmul.f32 %v2937_v20, %v6021_v40 }
 0xdcb   :  { %v2931_v53 = vmul.f32 %v6951_v17, %v6951_v17 }
 0xdcc   :  { %v2975_v14 = vadd.f32 1e-06, %v2965_v55 }
 0xdcd   :  { %v2953_v9 = vsel %vm273_vm3, %v2931_v53, 0.0 }
 0xdce   :  { %5390 = vrsqrt.f32 %v2975_v14  ;;  %2954 = vadd.xlane.f32.xlu0 %v2953_v9  ;;  %vm2991_vm6 = vweird.f32 %v2975_v14 }
 0xdd1   :  { %v2940_v37 = vpop.xlane.xlu1 %2939  ;;  %v2898_v29 = vpop.xlane.xlu2 %2897 }
 0xdd2   :  { %v2966_v7 = vmul.f32 %v2940_v37, %v6021_v40  ;;  %v2912_v6 = vmul.f32 %v2898_v29, %v6021_v40 }
 0xdd4   :  { %v5391_v43 = vpop.eup %5390  ;;  %v2976_v16 = vadd.f32 1e-06, %v2966_v7  ;;  %v6960_v26 = vsub.f32 %v6900_v24, %v2912_v6 }
 0xdd5   :  { %v2986_v34 = vmul.f32 %v5391_v43, %v2975_v14  ;;  %vm2992_vm5 = vweird.f32 %v5391_v43 }
 0xdd6   :  { %5392 = vrsqrt.f32 %v2976_v16  ;;  %v2932_v33 = vmul.f32 %v6960_v26, %v6960_v26  ;;  %vm2993_vm7 = vmor %vm2991_vm6, %vm2992_vm5  ;;  %vm3001_vm9 = vweird.f32 %v2976_v16 }
 0xdd7   :  { %v2987_v52 = vmul.f32 %v5391_v43, %v2986_v34 }
 0xdd8   :  { %v2956_v31 = vsel %vm273_vm3, %v2932_v33, 0.0 }
 0xdd9   :  { %v2988_v39 = vmul.f32 0.5, %v2987_v52  ;;  %v2943_v3 = vpop.xlane.xlu0 %2942  ;;  %v2901_v56 = vpop.xlane.xlu1 %2900  ;;  %2957 = vadd.xlane.f32.xlu1 %v2956_v31 }
 0xdda   :  { %v2967_v63 = vmul.f32 %v2943_v3, %v6021_v40  ;;  %v2913_v62 = vmul.f32 %v2901_v56, %v6021_v40 }
 0xddb   :  { %v2989_v24 = vsub.f32 1.5, %v2988_v39 }
 0xddc   :  { %v5393_v1 = vpop.eup %5392  ;;  %v2977_v30 = vadd.f32 1e-06, %v2967_v63  ;;  %v6968_v23 = vsub.f32 %v6912_v18, %v2913_v62 }
 0xddd   :  { %v2990_v13 = vmul.f32 %v5391_v43, %v2989_v24  ;;  %v2996_v50 = vmul.f32 %v5393_v1, %v2976_v16  ;;  %vm3002_vm8 = vweird.f32 %v5393_v1 }
 0xdde   :  { %5394 = vrsqrt.f32 %v2977_v30  ;;  %v2933_v42 = vmul.f32 %v6968_v23, %v6968_v23  ;;  %vm3003_vm10 = vmor %vm3001_vm9, %vm3002_vm8  ;;  %vm3011_vm12 = vweird.f32 %v2977_v30 }
 0xddf   :  { %v2994_v35 = vsel %vm2993_vm7, %v5391_v43, %v2990_v13  ;;  %v2997_v46 = vmul.f32 %v5393_v1, %v2996_v50 }
 0xde0   :  { %v3085_v12 = vmul.f32 %v2994_v35, %v6886_v47  ;;  %v2959_v25 = vsel %vm273_vm3, %v2933_v42, 0.0 }
 0xde1   :  { %v2998_v18 = vmul.f32 0.5, %v2997_v46  ;;  %v2904_v60 = vpop.xlane.xlu0 %2903  ;;  %2960 = vadd.xlane.f32.xlu2 %v2959_v25  ;;  %v2946_v48 = vpop.xlane.xlu2 %2945 }
 0xde2   :  { %v3098_v58 = vmul.f32 %v6971_v49, %v3085_v12  ;;  %v2914_v8 = vmul.f32 %v2904_v60, %v6021_v40  ;;  %v2968_v21 = vmul.f32 %v2946_v48, %v6021_v40 }
 0xde3   :  { %v2999_v15 = vsub.f32 1.5, %v2998_v18 }
 0xde4   :  { %v5395_v59 = vpop.eup %5394  ;;  %v6984_v22 = vadd.f32 %v6976_v27, %v3098_v58  ;;  %v6987_v47 = vsub.f32 %v6922_v57, %v2914_v8  ;;  %v2978_v0 = vadd.f32 1e-06, %v2968_v21 }
 0xde5   :  { %v3000_v44 = vmul.f32 %v5393_v1, %v2999_v15  ;;  %v3006_v5 = vmul.f32 %v5395_v59, %v2977_v30  ;;  %vm3012_vm11 = vweird.f32 %v5395_v59 }
 0xde6   :  { %5396 = vrsqrt.f32 %v2978_v0  ;;  %5003 = vmatmul.msk.f32.vlgmr.msra.gmra.mxu1 %vm273_vm3, %v6984_v22  ;;  %5037 = vmatmul.msk.f32.vlgmr.msra.gmra.mxu0 %vm273_vm3, %v6984_v22  ;;  %v2934_v19 = vmul.f32 %v6987_v47, %v6987_v47  ;;  %vm3013_vm14 = vmor %vm3011_vm12, %vm3012_vm11  ;;  %vm3021_vm0 = vweird.f32 %v2978_v0 }
 0xde7   :  { %v3004_v38 = vsel %vm3003_vm10, %v5393_v1, %v3000_v44  ;;  %v3007_v41 = vmul.f32 %v5395_v59, %v3006_v5 }
 0xde8   :  { %v3086_v57 = vmul.f32 %v3004_v38, %v6894_v32  ;;  %v2962_v11 = vsel %vm273_vm3, %v2934_v19, 0.0 }
 0xde9   :  { %v3008_v36 = vmul.f32 0.5, %v3007_v41  ;;  %2963 = vadd.xlane.f32.xlu0 %v2962_v11  ;;  %v2949_v10 = vpop.xlane.xlu1 %2948 }
 0xdea   :  { %v3099_v4 = vmul.f32 %v6971_v49, %v3086_v57  ;;  %v2969_v54 = vmul.f32 %v2949_v10, %v6021_v40 }
 0xdeb   :  { %v3009_v45 = vsub.f32 1.5, %v3008_v36 }
 0xdec   :  { %v5397_v20 = vpop.eup %5396  ;;  %v7000_v55 = vadd.f32 %v6976_v27, %v3099_v4  ;;  %v2979_v53 = vadd.f32 1e-06, %v2969_v54 }
 0xded   :  { %v3010_v14 = vmul.f32 %v5395_v59, %v3009_v45  ;;  %v3016_v9 = vmul.f32 %v5397_v20, %v2978_v0  ;;  %vm3022_vm15 = vweird.f32 %v5397_v20 }
 0xdee   :  { %5398 = vrsqrt.f32 %v2979_v53  ;;  %5004 = vmatmul.msk.f32.gmra.mxu1 %vm273_vm3, %v7000_v55  ;;  %5038 = vmatmul.msk.f32.gmra.mxu0 %vm273_vm3, %v7000_v55  ;;  %vm3023_vm1 = vmor %vm3021_vm0, %vm3022_vm15  ;;  %vm3031_vm6 = vweird.f32 %v2979_v53 }
 0xdef   :  { %v3014_v32 = vsel %vm3013_vm14, %v5395_v59, %v3010_v14  ;;  %v3017_v37 = vmul.f32 %v5397_v20, %v3016_v9 }
 0xdf0   :  { %v3087_v29 = vmul.f32 %v3014_v32, %v6906_v61 }
 0xdf1   :  { %v3018_v7 = vmul.f32 0.5, %v3017_v37  ;;  %v5062_v37 = vld [vmem:[%s7779_s3 + $0x78] sm:$0xff] }
 0xdf2   :  { %v3100_v6 = vmul.f32 %v6971_v49, %v3087_v29  ;;  %v5096_v29 = vld [vmem:[%s7780_s8 + $0x78] sm:$0xff]  ;;  %3539 = vmatpush.msrb.mxu1 %v5062_v37 }
 0xdf3   :  { %v3019_v43 = vsub.f32 1.5, %v3018_v7  ;;  %3778 = vmatpush.msrb.mxu0 %v5096_v29  ;;  %v5061_v7 = vld [vmem:[%s7779_s3 + $0x70] sm:$0xff] }
 0xdf4   :  { %v5399_v16 = vpop.eup %5398  ;;  %v7009_v34 = vadd.f32 %v6976_v27, %v3100_v6  ;;  %v5095_v6 = vld [vmem:[%s7780_s8 + $0x70] sm:$0xff]  ;;  %3540 = vmatpush.msrb.mxu1 %v5061_v7 }
 0xdf5   :  { %v3020_v33 = vmul.f32 %v5397_v20, %v3019_v43  ;;  %v3026_v52 = vmul.f32 %v5399_v16, %v2979_v53  ;;  %vm3032_vm5 = vweird.f32 %v5399_v16  ;;  %3779 = vmatpush.msrb.mxu0 %v5095_v6 }
 0xdf6   :  { %5005 = vmatmul.msk.f32.gmra.mxu1 %vm273_vm3, %v7009_v34  ;;  %5039 = vmatmul.msk.f32.gmra.mxu0 %vm273_vm3, %v7009_v34  ;;  %vm3033_vm7 = vmor %vm3031_vm6, %vm3032_vm5 }
 0xdf7   :  { %v3024_v61 = vsel %vm3023_vm1, %v5397_v20, %v3020_v33  ;;  %v3027_v31 = vmul.f32 %v5399_v16, %v3026_v52  ;;  %v5060_v52 = vld [vmem:[%s7779_s3 + $0x68] sm:$0xff] }
 0xdf8   :  { %v3088_v39 = vmul.f32 %v3024_v61, %v6918_v28  ;;  %v5094_v61 = vld [vmem:[%s7780_s8 + $0x68] sm:$0xff]  ;;  %3541 = vmatpush.msrb.mxu1 %v5060_v52 }
 0xdf9   :  { %v3028_v3 = vmul.f32 0.5, %v3027_v31  ;;  %3780 = vmatpush.msrb.mxu0 %v5094_v61 }
 0xdfa   :  { %v3101_v56 = vmul.f32 %v6971_v49, %v3088_v39  ;;  %v5059_v39 = vld [vmem:[%s7779_s3 + $0x60] sm:$0xff] }
 0xdfb   :  { %v3029_v63 = vsub.f32 1.5, %v3028_v3  ;;  %v5093_v3 = vld [vmem:[%s7780_s8 + $0x60] sm:$0xff]  ;;  %3542 = vmatpush.msrb.mxu1 %v5059_v39 }
 0xdfc   :  { %v7018_v62 = vadd.f32 %v6976_v27, %v3101_v56  ;;  %3781 = vmatpush.msrb.mxu0 %v5093_v3 }
 0xdfd   :  { %v3030_v24 = vmul.f32 %v5399_v16, %v3029_v63 }
 0xdfe   :  { %5006 = vmatmul.msk.f32.gmra.mxu1 %vm273_vm3, %v7018_v62  ;;  %5040 = vmatmul.msk.f32.gmra.mxu0 %vm273_vm3, %v7018_v62 }
 0xdff   :  { %v3034_v1 = vsel %vm3033_vm7, %v5399_v16, %v3030_v24 }
 0xe00   :  { %v3089_v28 = vmul.f32 %v3034_v1, %v6930_v51  ;;  %v2952_v30 = vpop.xlane.xlu2 %2951 }
 0xe01   :  { %v2970_v13 = vmul.f32 %v2952_v30, %v6021_v40 }
 0xe02   :  { %v3102_v50 = vmul.f32 %v6971_v49, %v3089_v28 }
 0xe03   :  { %v2980_v42 = vadd.f32 1e-06, %v2970_v13 }
 0xe04   :  { %v7028_v35 = vadd.f32 %v6976_v27, %v3102_v50 }
 0xe05   :  { %5400 = vrsqrt.f32 %v2980_v42  ;;  %vm3041_vm9 = vweird.f32 %v2980_v42 }
 0xe06   :  { %5007 = vmatmul.msk.f32.gmra.mxu1 %vm273_vm3, %v7028_v35  ;;  %5041 = vmatmul.msk.f32.gmra.mxu0 %vm273_vm3, %v7028_v35 }
 0xe0b   :  { %v5401_v46 = vpop.eup %5400 }
 0xe0c   :  { %v3036_v12 = vmul.f32 %v5401_v46, %v2980_v42  ;;  %vm3042_vm8 = vweird.f32 %v5401_v46 }
 0xe0d   :  { %vm3043_vm10 = vmor %vm3041_vm9, %vm3042_vm8 }
 0xe0e   :  { %v3037_v25 = vmul.f32 %v5401_v46, %v3036_v12 }
 0xe10   :  { %v3038_v51 = vmul.f32 0.5, %v3037_v25 }
 0xe12   :  { %v3039_v18 = vsub.f32 1.5, %v3038_v51 }
 0xe14   :  { %v3040_v60 = vmul.f32 %v5401_v46, %v3039_v18 }
 0xe16   :  { %v3044_v48 = vsel %vm3043_vm10, %v5401_v46, %v3040_v60 }
 0xe17   :  { %v3090_v58 = vmul.f32 %v3044_v48, %v6936_v2 }
 0xe19   :  { %v3103_v8 = vmul.f32 %v6971_v49, %v3090_v58 }
 0xe1b   :  { %v7037_v21 = vadd.f32 %v6976_v27, %v3103_v8 }
 0xe1d   :  { %5008 = vmatmul.msk.f32.gmra.mxu1 %vm273_vm3, %v7037_v21  ;;  %5042 = vmatmul.msk.f32.gmra.mxu0 %vm273_vm3, %v7037_v21 }
 0xe41   :  { %v2955_v15 = vpop.xlane.xlu0 %2954 }
 0xe42   :  { %v2971_v59 = vmul.f32 %v2955_v15, %v6021_v40 }
 0xe44   :  { %v2981_v0 = vadd.f32 1e-06, %v2971_v59 }
 0xe46   :  { %5402 = vrsqrt.f32 %v2981_v0  ;;  %vm3051_vm12 = vweird.f32 %v2981_v0 }
 0xe4c   :  { %v5403_v44 = vpop.eup %5402  ;;  %v2958_v5 = vpop.xlane.xlu1 %2957 }
 0xe4d   :  { %v3046_v19 = vmul.f32 %v5403_v44, %v2981_v0  ;;  %v2972_v2 = vmul.f32 %v2958_v5, %v6021_v40  ;;  %vm3052_vm11 = vweird.f32 %v5403_v44 }
 0xe4e   :  { %vm3053_vm14 = vmor %vm3051_vm12, %vm3052_vm11 }
 0xe4f   :  { %v3047_v38 = vmul.f32 %v5403_v44, %v3046_v19  ;;  %v2982_v41 = vadd.f32 1e-06, %v2972_v2 }
 0xe51   :  { %v3048_v57 = vmul.f32 0.5, %v3047_v38  ;;  %5404 = vrsqrt.f32 %v2982_v41  ;;  %vm3061_vm0 = vweird.f32 %v2982_v41 }
 0xe53   :  { %v3049_v11 = vsub.f32 1.5, %v3048_v57 }
 0xe54   :  { %v2961_v36 = vpop.xlane.xlu2 %2960 }
 0xe55   :  { %v3050_v10 = vmul.f32 %v5403_v44, %v3049_v11  ;;  %v2973_v4 = vmul.f32 %v2961_v36, %v6021_v40 }
 0xe57   :  { %v5405_v54 = vpop.eup %5404  ;;  %v3054_v45 = vsel %vm3053_vm14, %v5403_v44, %v3050_v10  ;;  %v2983_v20 = vadd.f32 1e-06, %v2973_v4 }
 0xe58   :  { %v3091_v53 = vmul.f32 %v3054_v45, %v6951_v17  ;;  %v3056_v14 = vmul.f32 %v5405_v54, %v2982_v41  ;;  %vm3062_vm15 = vweird.f32 %v5405_v54 }
 0xe59   :  { %5406 = vrsqrt.f32 %v2983_v20  ;;  %vm3063_vm1 = vmor %vm3061_vm0, %vm3062_vm15  ;;  %vm3071_vm6 = vweird.f32 %v2983_v20 }
 0xe5a   :  { %v3104_v9 = vmul.f32 %v6971_v49, %v3091_v53  ;;  %v3057_v32 = vmul.f32 %v5405_v54, %v3056_v14 }
 0xe5c   :  { %v7053_v43 = vadd.f32 %v6976_v27, %v3104_v9  ;;  %v3058_v16 = vmul.f32 0.5, %v3057_v32  ;;  %v2964_v17 = vpop.xlane.xlu0 %2963 }
 0xe5d   :  { %v2974_v33 = vmul.f32 %v2964_v17, %v6021_v40 }
 0xe5e   :  { %v3059_v31 = vsub.f32 1.5, %v3058_v16  ;;  %5009 = vmatmul.msk.f32.gmra.mxu1 %vm273_vm3, %v7053_v43  ;;  %5043 = vmatmul.msk.f32.gmra.mxu0 %vm273_vm3, %v7053_v43 }
 0xe5f   :  { %v5407_v56 = vpop.eup %5406  ;;  %v2984_v63 = vadd.f32 1e-06, %v2974_v33 }
 0xe60   :  { %v3060_v24 = vmul.f32 %v5405_v54, %v3059_v31  ;;  %v3066_v1 = vmul.f32 %v5407_v56, %v2983_v20  ;;  %vm3072_vm5 = vweird.f32 %v5407_v56 }
 0xe61   :  { %5408 = vrsqrt.f32 %v2984_v63  ;;  %vm3073_vm7 = vmor %vm3071_vm6, %vm3072_vm5  ;;  %vm3081_vm9 = vweird.f32 %v2984_v63 }
 0xe62   :  { %v3064_v28 = vsel %vm3063_vm1, %v5405_v54, %v3060_v24  ;;  %v3067_v30 = vmul.f32 %v5407_v56, %v3066_v1 }
 0xe63   :  { %v3092_v13 = vmul.f32 %v3064_v28, %v6960_v26 }
 0xe64   :  { %v3068_v50 = vmul.f32 0.5, %v3067_v30 }
 0xe65   :  { %v3105_v42 = vmul.f32 %v6971_v49, %v3092_v13 }
 0xe66   :  { %v3069_v46 = vsub.f32 1.5, %v3068_v50  ;;  %v7200_v50 = vld [vmem:[%s7783_s24 + $0x8] sm:$0xff] }
 0xe67   :  { %v5409_v12 = vpop.eup %5408  ;;  %v7067_v25 = vadd.f32 %v6976_v27, %v3105_v42 }
 0xe68   :  { %v3070_v51 = vmul.f32 %v5407_v56, %v3069_v46  ;;  %v3076_v18 = vmul.f32 %v5409_v12, %v2984_v63  ;;  %vm3082_vm8 = vweird.f32 %v5409_v12  ;;  %v7191_v63 = vld [vmem:[%s7783_s24] sm:$0xff] }
 0xe69   :  { %5010 = vmatmul.msk.f32.gmra.mxu1 %vm273_vm3, %v7067_v25  ;;  %5044 = vmatmul.msk.f32.gmra.mxu0 %vm273_vm3, %v7067_v25  ;;  %vm3083_vm10 = vmor %vm3081_vm9, %vm3082_vm8 }
 0xe6a   :  { %v3074_v26 = vsel %vm3073_vm7, %v5407_v56, %v3070_v51  ;;  %v3077_v60 = vmul.f32 %v5409_v12, %v3076_v18 }
 0xe6b   :  { %v3093_v48 = vmul.f32 %v3074_v26, %v6968_v23  ;;  %v7209_v26 = vld [vmem:[%s7783_s24 + $0x10] sm:$0xff] }
 0xe6c   :  { %v3078_v58 = vmul.f32 0.5, %v3077_v60 }
 0xe6d   :  { %v3106_v8 = vmul.f32 %v6971_v49, %v3093_v48 }
 0xe6e   :  { %v3079_v15 = vsub.f32 1.5, %v3078_v58 }
 0xe6f   :  { %v7076_v59 = vadd.f32 %v6976_v27, %v3106_v8 }
 0xe70   :  { %v3080_v0 = vmul.f32 %v5409_v12, %v3079_v15 }
 0xe71   :  { %5011 = vmatmul.msk.f32.gmra.mxu1 %vm273_vm3, %v7076_v59  ;;  %5045 = vmatmul.msk.f32.gmra.mxu0 %vm273_vm3, %v7076_v59 }
 0xe72   :  { %v3084_v44 = vsel %vm3083_vm10, %v5409_v12, %v3080_v0  ;;  %v7218_v0 = vld [vmem:[%s7783_s24 + $0x18] sm:$0xff] }
 0xe73   :  { %v3094_v23 = vmul.f32 %v3084_v44, %v6987_v47  ;;  %v3412_v47 = vpop.f32.mrf.mxu0 }
 0xe75   :  { %v3107_v5 = vmul.f32 %v6971_v49, %v3094_v23  ;;  %v3173_v49 = vpop.f32.mrf.mxu1 }
 0xe77   :  { %v7085_v19 = vadd.f32 %v6976_v27, %v3107_v5 }
 0xe79   :  { %5012 = vmatmul.msk.f32.gmra.mxu1 %vm273_vm3, %v7085_v19  ;;  %5013 = vmatpush.xpose.msk.msrb.mxu2 %vm273_vm3, %v7085_v19 }
 0xe7a   :  { %5046 = vmatmul.msk.f32.gmra.mxu0 %vm273_vm3, %v7085_v19 }
 0xe7b   :  { %v3415_v38 = vpop.f32.mrf.mxu0 }
 0xe7d   :  { %5014 = vmatpush.xpose.msk.msrb.mxu2 %vm273_vm3, %v7076_v59  ;;  %v3176_v27 = vpop.f32.mrf.mxu1 }
 0xe81   :  { %5015 = vmatpush.xpose.msk.msrb.mxu2 %vm273_vm3, %v7067_v25  ;;  %5063 = vmatmul.msk.f32.vlgmr.msrb.gmra.mxu1 %vm273_vm3, %v6984_v22 }
 0xe82   :  { %5097 = vmatmul.msk.f32.vlgmr.msrb.gmra.mxu0 %vm273_vm3, %v6984_v22 }
 0xe83   :  { %v3418_v57 = vpop.f32.mrf.mxu0 }
 0xe85   :  { %5016 = vmatpush.xpose.msk.msrb.mxu2 %vm273_vm3, %v7053_v43  ;;  %v3179_v2 = vpop.f32.mrf.mxu1 }
 0xe89   :  { %5017 = vmatpush.xpose.msk.msrb.mxu2 %vm273_vm3, %v7037_v21  ;;  %5064 = vmatmul.msk.f32.gmra.mxu1 %vm273_vm3, %v7000_v55 }
 0xe8a   :  { %5098 = vmatmul.msk.f32.gmra.mxu0 %vm273_vm3, %v7000_v55 }
 0xe8b   :  { %v3421_v36 = vpop.f32.mrf.mxu0 }
 0xe8d   :  { %5018 = vmatpush.xpose.msk.msrb.mxu2 %vm273_vm3, %v7028_v35  ;;  %v3182_v41 = vpop.f32.mrf.mxu1 }
 0xe91   :  { %5019 = vmatpush.xpose.msk.msrb.mxu2 %vm273_vm3, %v7018_v62  ;;  %5065 = vmatmul.msk.f32.gmra.mxu1 %vm273_vm3, %v7009_v34 }
 0xe92   :  { %5099 = vmatmul.msk.f32.gmra.mxu0 %vm273_vm3, %v7009_v34 }
 0xe93   :  { %v3424_v4 = vpop.f32.mrf.mxu0 }
 0xe95   :  { %5020 = vmatpush.xpose.msk.msrb.mxu2 %vm273_vm3, %v7009_v34  ;;  %v3185_v11 = vpop.f32.mrf.mxu1 }
 0xe99   :  { %5021 = vmatpush.xpose.msk.msrb.mxu2 %vm273_vm3, %v7000_v55  ;;  %5066 = vmatmul.msk.f32.gmra.mxu1 %vm273_vm3, %v7018_v62 }
 0xe9a   :  { %5100 = vmatmul.msk.f32.gmra.mxu0 %vm273_vm3, %v7018_v62 }
 0xe9b   :  { %v3427_v54 = vpop.f32.mrf.mxu0 }
 0xe9d   :  { %5022 = vmatpush.xpose.msk.msrb.mxu2 %vm273_vm3, %v6984_v22  ;;  %v3188_v10 = vpop.f32.mrf.mxu1 }
 0xea0   :  { %5023 = vmatmul.msk.f32.vlgmr.msrb.gmra.mxu2 %vm273_vm3, %v3173_v49 }
 0xea1   :  { %5073 = vmatpush.xpose.msk.msra.mxu2 %vm273_vm3, %v7085_v19  ;;  %5067 = vmatmul.msk.f32.gmra.mxu1 %vm273_vm3, %v7028_v35 }
 0xea2   :  { %5101 = vmatmul.msk.f32.gmra.mxu0 %vm273_vm3, %v7028_v35 }
 0xea5   :  { %5074 = vmatpush.xpose.msk.msra.mxu2 %vm273_vm3, %v7076_v59 }
 0xea8   :  { %5024 = vmatmul.msk.f32.gmra.mxu2 %vm273_vm3, %v3176_v27 }
 0xea9   :  { %5075 = vmatpush.xpose.msk.msra.mxu2 %vm273_vm3, %v7067_v25  ;;  %5068 = vmatmul.msk.f32.gmra.mxu1 %vm273_vm3, %v7037_v21 }
 0xeaa   :  { %5102 = vmatmul.msk.f32.gmra.mxu0 %vm273_vm3, %v7037_v21 }
 0xead   :  { %5076 = vmatpush.xpose.msk.msra.mxu2 %vm273_vm3, %v7053_v43 }
 0xeb0   :  { %5025 = vmatmul.msk.f32.gmra.mxu2 %vm273_vm3, %v3179_v2 }
 0xeb1   :  { %5077 = vmatpush.xpose.msk.msra.mxu2 %vm273_vm3, %v7037_v21  ;;  %5069 = vmatmul.msk.f32.gmra.mxu1 %vm273_vm3, %v7053_v43 }
 0xeb2   :  { %5103 = vmatmul.msk.f32.gmra.mxu0 %vm273_vm3, %v7053_v43 }
 0xeb5   :  { %5078 = vmatpush.xpose.msk.msra.mxu2 %vm273_vm3, %v7028_v35 }
 0xeb8   :  { %5026 = vmatmul.msk.f32.gmra.mxu2 %vm273_vm3, %v3182_v41 }
 0xeb9   :  { %5079 = vmatpush.xpose.msk.msra.mxu2 %vm273_vm3, %v7018_v62  ;;  %5070 = vmatmul.msk.f32.gmra.mxu1 %vm273_vm3, %v7067_v25 }
 0xeba   :  { %5104 = vmatmul.msk.f32.gmra.mxu0 %vm273_vm3, %v7067_v25 }
 0xebd   :  { %5080 = vmatpush.xpose.msk.msra.mxu2 %vm273_vm3, %v7009_v34 }
 0xec0   :  { %5027 = vmatmul.msk.f32.gmra.mxu2 %vm273_vm3, %v3185_v11 }
 0xec1   :  { %5081 = vmatpush.xpose.msk.msra.mxu2 %vm273_vm3, %v7000_v55  ;;  %5071 = vmatmul.msk.f32.gmra.mxu1 %vm273_vm3, %v7076_v59 }
 0xec2   :  { %5105 = vmatmul.msk.f32.gmra.mxu0 %vm273_vm3, %v7076_v59 }
 0xec5   :  { %5082 = vmatpush.xpose.msk.msra.mxu2 %vm273_vm3, %v6984_v22 }
 0xec8   :  { %5028 = vmatmul.msk.f32.gmra.mxu2 %vm273_vm3, %v3188_v10 }
 0xec9   :  { %5072 = vmatmul.msk.f32.gmra.mxu1 %vm273_vm3, %v7085_v19 }
 0xeca   :  { %5106 = vmatmul.msk.f32.gmra.mxu0 %vm273_vm3, %v7085_v19 }
 0xedb   :  { %v3191_v45 = vpop.f32.mrf.mxu1  ;;  %v3430_v20 = vpop.f32.mrf.mxu0 }
 0xedc   :  { %5029 = vmatmul.msk.f32.gmra.mxu2 %vm273_vm3, %v3191_v45  ;;  %v7246_v45 = vld [vmem:[%s7783_s24 + $0x30] sm:$0xff] }
 0xee6   :  { %v3194_v53 = vpop.f32.mrf.mxu1  ;;  %v3433_v14 = vpop.f32.mrf.mxu0 }
 0xee7   :  { %5030 = vmatmul.msk.f32.gmra.mxu2 %vm273_vm3, %v3194_v53 }
 0xeee   :  { %v3197_v9 = vpop.f32.mrf.mxu1  ;;  %v3436_v32 = vpop.f32.mrf.mxu0 }
 0xeef   :  { %5031 = vmatmul.msk.f32.gmra.mxu2 %vm273_vm3, %v3197_v9  ;;  %v7254_v9 = vld [vmem:[%s7783_s24 + $0x38] sm:$0xff] }
 0xef6   :  { %v3200_v37 = vpop.f32.mrf.mxu1 }
 0xef7   :  { %v3439_v29 = vpop.f32.mrf.mxu0  ;;  %5032 = vmatmul.msk.f32.gmra.mxu2 %vm273_vm3, %v3200_v37 }
 0xef8   :  { %3478 = vmatpush.msrb.mxu3 %v3439_v29 }
 0xefa   :  { %3479 = vmatpush.msrb.mxu3 %v3436_v32 }
 0xefc   :  { %3480 = vmatpush.msrb.mxu3 %v3433_v14 }
 0xefe   :  { %3481 = vmatpush.msrb.mxu3 %v3430_v20  ;;  %v3544_v7 = vpop.f32.mrf.mxu1 }
 0xeff   :  { %v7181_v6 = vpop.f32.mrf.mxu0  ;;  %5083 = vmatmul.msk.f32.vlgmr.msra.gmra.mxu2 %vm273_vm3, %v3544_v7 }
 0xf00   :  { %3482 = vmatpush.msrb.mxu3 %v3427_v54 }
 0xf02   :  { %3483 = vmatpush.msrb.mxu3 %v3424_v4 }
 0xf04   :  { %3484 = vmatpush.msrb.mxu3 %v3421_v36  ;;  %v7236_v36 = vld [vmem:[%s7783_s24 + $0x28] sm:$0xff] }
 0xf06   :  { %3485 = vmatpush.msrb.mxu3 %v3418_v57  ;;  %v3547_v16 = vpop.f32.mrf.mxu1 }
 0xf07   :  { %v7184_v17 = vpop.f32.mrf.mxu0  ;;  %5084 = vmatmul.msk.f32.gmra.mxu2 %vm273_vm3, %v3547_v16 }
 0xf08   :  { %3486 = vmatpush.msrb.mxu3 %v3415_v38 }
 0xf0a   :  { %3487 = vmatpush.msrb.mxu3 %v3412_v47  ;;  %v7227_v47 = vld [vmem:[%s7783_s24 + $0x20] sm:$0xff] }
 0xf0e   :  { %v3550_v33 = vpop.f32.mrf.mxu1 }
 0xf0f   :  { %v3789_v52 = vpop.f32.mrf.mxu0  ;;  %5085 = vmatmul.msk.f32.gmra.mxu2 %vm273_vm3, %v3550_v33 }
 0xf16   :  { %v3553_v61 = vpop.f32.mrf.mxu1 }
 0xf17   :  { %v3792_v31 = vpop.f32.mrf.mxu0  ;;  %5086 = vmatmul.msk.f32.gmra.mxu2 %vm273_vm3, %v3553_v61 }
 0xf1e   :  { %v3556_v39 = vpop.f32.mrf.mxu1 }
 0xf1f   :  { %v3795_v3 = vpop.f32.mrf.mxu0  ;;  %5087 = vmatmul.msk.f32.gmra.mxu2 %vm273_vm3, %v3556_v39 }
 0xf23   :  { %v3250_v56 = vpop.f32.mrf.mxu2 }
 0xf24   :  { %v7194_v24 = vadd.f32 %v7191_v63, %v3250_v56 }
 0xf26   :  { %v3559_v1 = vpop.f32.mrf.mxu1  ;;  %v3280_v28 = vsel %vm1560_vm13, %v7194_v24, -inf }
 0xf27   :  { %v3798_v30 = vpop.f32.mrf.mxu0  ;;  %3281 = vmax.xlane.f32.xlu1 %v3280_v28  ;;  %5088 = vmatmul.msk.f32.gmra.mxu2 %vm273_vm3, %v3559_v1 }
 0xf2b   :  { %v3253_v13 = vpop.f32.mrf.mxu2 }
 0xf2c   :  { %v7203_v42 = vadd.f32 %v7200_v50, %v3253_v13 }
 0xf2e   :  { %v3562_v46 = vpop.f32.mrf.mxu1  ;;  %v3283_v12 = vsel %vm1560_vm13, %v7203_v42, -inf }
 0xf2f   :  { %v3801_v51 = vpop.f32.mrf.mxu0  ;;  %3284 = vmax.xlane.f32.xlu2 %v3283_v12  ;;  %5089 = vmatmul.msk.f32.gmra.mxu2 %vm273_vm3, %v3562_v46  ;;  %v7281_v12 = vld [vmem:[%s7783_s24 + $0x48] sm:$0xff] }
 0xf33   :  { %v3256_v18 = vpop.f32.mrf.mxu2 }
 0xf34   :  { %v7212_v60 = vadd.f32 %v7209_v26, %v3256_v18 }
 0xf36   :  { %v3565_v48 = vpop.f32.mrf.mxu1  ;;  %v3286_v58 = vsel %vm1560_vm13, %v7212_v60, -inf }
 0xf37   :  { %v3804_v8 = vpop.f32.mrf.mxu0  ;;  %3287 = vmax.xlane.f32.xlu0 %v3286_v58  ;;  %5090 = vmatmul.msk.f32.gmra.mxu2 %vm273_vm3, %v3565_v48 }
 0xf3b   :  { %v3259_v15 = vpop.f32.mrf.mxu2 }
 0xf3c   :  { %v7221_v44 = vadd.f32 %v7218_v0, %v3259_v15 }
 0xf3e   :  { %v3568_v23 = vpop.f32.mrf.mxu1  ;;  %v3289_v5 = vsel %vm1560_vm13, %v7221_v44, -inf }
 0xf3f   :  { %v3807_v49 = vpop.f32.mrf.mxu0  ;;  %3290 = vmax.xlane.f32.xlu1 %v3289_v5  ;;  %5091 = vmatmul.msk.f32.gmra.mxu2 %vm273_vm3, %v3568_v23 }
 0xf43   :  { %v3262_v27 = vpop.f32.mrf.mxu2 }
 0xf44   :  { %v7230_v2 = vadd.f32 %v7227_v47, %v3262_v27 }
 0xf46   :  { %v3571_v38 = vpop.f32.mrf.mxu1  ;;  %v3292_v41 = vsel %vm1560_vm13, %v7230_v2, -inf }
 0xf47   :  { %v3810_v57 = vpop.f32.mrf.mxu0  ;;  %3293 = vmax.xlane.f32.xlu2 %v3292_v41  ;;  %5092 = vmatmul.msk.f32.gmra.mxu2 %vm273_vm3, %v3571_v38 }
 0xf48   :  { %3849 = vmatpush.msra.mxu3 %v3810_v57 }
 0xf4a   :  { %3850 = vmatpush.msra.mxu3 %v3807_v49 }
 0xf4b   :  { %v3265_v11 = vpop.f32.mrf.mxu2 }
 0xf4c   :  { %v7239_v10 = vadd.f32 %v7236_v36, %v3265_v11  ;;  %3851 = vmatpush.msra.mxu3 %v3804_v8 }
 0xf4e   :  { %3852 = vmatpush.msra.mxu3 %v3801_v51  ;;  %v3295_v4 = vsel %vm1560_vm13, %v7239_v10, -inf }
 0xf4f   :  { %3296 = vmax.xlane.f32.xlu0 %v3295_v4 }
 0xf50   :  { %3853 = vmatpush.msra.mxu3 %v3798_v30 }
 0xf52   :  { %3854 = vmatpush.msra.mxu3 %v3795_v3  ;;  %v7268_v3 = vld [vmem:[%s7783_s24 + $0x40] sm:$0xff] }
 0xf54   :  { %3855 = vmatpush.msra.mxu3 %v3792_v31 }
 0xf56   :  { %3856 = vmatpush.msra.mxu3 %v3789_v52 }
 0xf58   :  { %3857 = vmatpush.msra.mxu3 %v7184_v17 }
 0xf5a   :  { %3858 = vmatpush.msra.mxu3 %v7181_v6 }
 0xf5f   :  { %v3268_v54 = vpop.f32.mrf.mxu2 }
 0xf60   :  { %v7249_v20 = vadd.f32 %v7246_v45, %v3268_v54 }
 0xf62   :  { %v3298_v53 = vsel %vm1560_vm13, %v7249_v20, -inf }
 0xf63   :  { %3299 = vmax.xlane.f32.xlu1 %v3298_v53 }
 0xf6a   :  { %v3271_v14 = vpop.f32.mrf.mxu2 }
 0xf6b   :  { %v7257_v32 = vadd.f32 %v7254_v9, %v3271_v14 }
 0xf6d   :  { %v3301_v37 = vsel %vm1560_vm13, %v7257_v32, -inf }
 0xf6e   :  { %3302 = vmax.xlane.f32.xlu0 %v3301_v37 }
 0xf72   :  { %v3274_v6 = vpop.f32.mrf.mxu2 }
 0xf73   :  { %v7271_v56 = vadd.f32 %v7268_v3, %v3274_v6 }
 0xf7a   :  { %v3277_v39 = vpop.f32.mrf.mxu2 }
 0xf7b   :  { %v7284_v51 = vadd.f32 %v7281_v12, %v3277_v39 }
 0xf7d   :  { %v3307_v15 = vsel %vm1560_vm13, %v7284_v51, -inf }
 0xf82   :  { %v3621_v46 = vpop.f32.mrf.mxu2 }
 0xf83   :  { %v7294_v23 = vadd.f32 %v7191_v63, %v3621_v46 }
 0xf85   :  { %v3651_v57 = vsel %vm1560_vm13, %v7294_v23, -inf }
 0xf8a   :  { %v3624_v49 = vpop.f32.mrf.mxu2 }
 0xf8b   :  { %v7304_v11 = vadd.f32 %v7200_v50, %v3624_v49 }
 0xf8d   :  { %v3654_v14 = vsel %vm1560_vm13, %v7304_v11, -inf }
 0xf9a   :  { %v3282_v29 = vpop.xlane.xlu1 %3281 }
 0xf9b   :  { %v3310_v7 = vsub.f32 %v7194_v24, %v3282_v29 }
 0xf9d   :  { %v3320_v16 = vmul.f32 1.442695, %v3310_v7 }
 0xf9f   :  { %5410 = vpow2.f32 %v3320_v16 }
 0xfa2   :  { %v3285_v17 = vpop.xlane.xlu2 %3284 }
 0xfa3   :  { %v3311_v33 = vsub.f32 %v7203_v42, %v3285_v17  ;;  %v3304_v42 = vsel %vm1560_vm13, %v7271_v56, -inf }
 0xfa5   :  { %v7263_v52 = vpop.eup %5410  ;;  %v3322_v61 = vmul.f32 1.442695, %v3311_v33 }
 0xfa6   :  { %v3340_v31 = vsel %vm1560_vm13, %v7263_v52, 0.0 }
 0xfa7   :  { %5412 = vpow2.f32 %v3322_v61  ;;  %3341 = vadd.xlane.f32.xlu2 %v3340_v31 }
 0xfaa   :  { %v3288_v24 = vpop.xlane.xlu0 %3287 }
 0xfab   :  { %v3312_v1 = vsub.f32 %v7212_v60, %v3288_v24 }
 0xfad   :  { %v7274_v28 = vpop.eup %5412  ;;  %v3324_v30 = vmul.f32 1.442695, %v3312_v1 }
 0xfae   :  { %v3343_v13 = vsel %vm1560_vm13, %v7274_v28, 0.0 }
 0xfaf   :  { %5414 = vpow2.f32 %v3324_v30  ;;  %3344 = vadd.xlane.f32.xlu1 %v3343_v13  ;;  %3305 = vmax.xlane.f32.xlu2 %v3304_v42 }
 0xfb2   :  { %v3291_v18 = vpop.xlane.xlu1 %3290 }
 0xfb3   :  { %v3313_v60 = vsub.f32 %v7221_v44, %v3291_v18 }
 0xfb5   :  { %v7287_v48 = vpop.eup %5414  ;;  %v3326_v58 = vmul.f32 1.442695, %v3313_v60 }
 0xfb6   :  { %v3346_v8 = vsel %vm1560_vm13, %v7287_v48, 0.0 }
 0xfb7   :  { %5416 = vpow2.f32 %v3326_v58  ;;  %3347 = vadd.xlane.f32.xlu0 %v3346_v8  ;;  %3308 = vmax.xlane.f32.xlu1 %v3307_v15 }
 0xfba   :  { %v3294_v5 = vpop.xlane.xlu2 %3293 }
 0xfbb   :  { %v3314_v27 = vsub.f32 %v7230_v2, %v3294_v5  ;;  %v3627_v2 = vpop.f32.mrf.mxu2 }
 0xfbc   :  { %v7314_v29 = vadd.f32 %v7209_v26, %v3627_v2 }
 0xfbd   :  { %v7297_v44 = vpop.eup %5416  ;;  %v3328_v38 = vmul.f32 1.442695, %v3314_v27 }
 0xfbe   :  { %v3349_v41 = vsel %vm1560_vm13, %v7297_v44, 0.0  ;;  %v3657_v7 = vsel %vm1560_vm13, %v7314_v29, -inf }
 0xfbf   :  { %5418 = vpow2.f32 %v3328_v38  ;;  %3350 = vadd.xlane.f32.xlu2 %v3349_v41  ;;  %3652 = vmax.xlane.f32.xlu0 %v3651_v57 }
 0xfc2   :  { %v3297_v63 = vpop.xlane.xlu0 %3296 }
 0xfc3   :  { %v3315_v4 = vsub.f32 %v7239_v10, %v3297_v63  ;;  %v3630_v6 = vpop.f32.mrf.mxu2 }
 0xfc4   :  { %v7323_v16 = vadd.f32 %v7218_v0, %v3630_v6 }
 0xfc5   :  { %v7307_v54 = vpop.eup %5418  ;;  %v3330_v53 = vmul.f32 1.442695, %v3315_v4 }
 0xfc6   :  { %v3352_v37 = vsel %vm1560_vm13, %v7307_v54, 0.0  ;;  %v3660_v33 = vsel %vm1560_vm13, %v7323_v16, -inf }
 0xfc7   :  { %5420 = vpow2.f32 %v3330_v53  ;;  %3655 = vmax.xlane.f32.xlu2 %v3654_v14  ;;  %3353 = vadd.xlane.f32.xlu1 %v3352_v37 }
 0xfcb   :  { %v3633_v30 = vpop.f32.mrf.mxu2 }
 0xfcc   :  { %v7334_v13 = vadd.f32 %v7227_v47, %v3633_v30 }
 0xfcd   :  { %v7316_v50 = vpop.eup %5420 }
 0xfce   :  { %v3355_v10 = vsel %vm1560_vm13, %v7316_v50, 0.0 }
 0xfcf   :  { %3356 = vadd.xlane.f32.xlu0 %v3355_v10  ;;  %3658 = vmax.xlane.f32.xlu1 %v3657_v7 }
 0xfd6   :  { %v3300_v17 = vpop.xlane.xlu1 %3299 }
 0xfd7   :  { %v3316_v26 = vsub.f32 %v7249_v20, %v3300_v17  ;;  %3661 = vmax.xlane.f32.xlu0 %v3660_v33  ;;  %v3663_v20 = vsel %vm1560_vm13, %v7334_v13, -inf }
 0xfd9   :  { %v3332_v61 = vmul.f32 1.442695, %v3316_v26 }
 0xfdb   :  { %5422 = vpow2.f32 %v3332_v61 }
 0xfe1   :  { %v7328_v31 = vpop.eup %5422  ;;  %v3303_v39 = vpop.xlane.xlu0 %3302 }
 0xfe2   :  { %v3317_v24 = vsub.f32 %v7257_v32, %v3303_v39  ;;  %v3358_v1 = vsel %vm1560_vm13, %v7328_v31, 0.0  ;;  %v3636_v32 = vpop.f32.mrf.mxu2 }
 0xfe3   :  { %3359 = vadd.xlane.f32.xlu2 %v3358_v1  ;;  %v7343_v18 = vadd.f32 %v7236_v36, %v3636_v32 }
 0xfe4   :  { %v3334_v0 = vmul.f32 1.442695, %v3317_v24 }
 0xfe5   :  { %v3666_v60 = vsel %vm1560_vm13, %v7343_v18, -inf }
 0xfe6   :  { %5424 = vpow2.f32 %v3334_v0 }
 0xfea   :  { %v3639_v2 = vpop.f32.mrf.mxu2 }
 0xfeb   :  { %3664 = vmax.xlane.f32.xlu2 %v3663_v20  ;;  %v7358_v14 = vadd.f32 %v7246_v45, %v3639_v2 }
 0xfec   :  { %v7338_v42 = vpop.eup %5424 }
 0xfed   :  { %v3361_v46 = vsel %vm1560_vm13, %v7338_v42, 0.0  ;;  %v3669_v17 = vsel %vm1560_vm13, %v7358_v14, -inf }
 0xfee   :  { %3362 = vadd.xlane.f32.xlu1 %v3361_v46 }
 0xff6   :  { %3667 = vmax.xlane.f32.xlu1 %v3666_v60 }
0x101a   :  { %v3342_v47 = vpop.xlane.xlu2 %3341 }
0x101b   :  { %5426 = vrcp.f32 %v3342_v47 }
0x1021   :  { %v5427_v58 = vpop.eup %5426 }
0x1022   :  { %v3380_v8 = vmul.f32 %v5427_v58, %v7263_v52  ;;  %v3345_v15 = vpop.xlane.xlu1 %3344  ;;  %v3306_v5 = vpop.xlane.xlu2 %3305 }
0x1023   :  { %5428 = vrcp.f32 %v3345_v15  ;;  %v3318_v49 = vsub.f32 %v7271_v56, %v3306_v5 }
0x1024   :  { %5047 = vmatmul.msk.f32.vlgmr.msrb.gmra.mxu3 %vm1560_vm13, %v3380_v8 }
0x1025   :  { %v3336_v27 = vmul.f32 1.442695, %v3318_v49 }
0x1027   :  { %5430 = vpow2.f32 %v3336_v27 }
0x1029   :  { %v5429_v36 = vpop.eup %5428 }
0x102a   :  { %v3348_v38 = vpop.xlane.xlu0 %3347  ;;  %v3309_v41 = vpop.xlane.xlu1 %3308  ;;  %v3381_v57 = vmul.f32 %v5429_v36, %v7274_v28 }
0x102b   :  { %5432 = vrcp.f32 %v3348_v38  ;;  %v3319_v63 = vsub.f32 %v7284_v51, %v3309_v41 }
0x102c   :  { %5048 = vmatmul.msk.f32.gmra.mxu3 %vm1560_vm13, %v3381_v57 }
0x102d   :  { %v7353_v52 = vpop.eup %5430  ;;  %v3338_v4 = vmul.f32 1.442695, %v3319_v63 }
0x102e   :  { %v3364_v56 = vsel %vm1560_vm13, %v7353_v52, 0.0 }
0x102f   :  { %5434 = vpow2.f32 %v3338_v4  ;;  %3365 = vadd.xlane.f32.xlu0 %v3364_v56 }
0x1031   :  { %v5433_v53 = vpop.eup %5432 }
0x1032   :  { %v3351_v37 = vpop.xlane.xlu2 %3350  ;;  %v3653_v28 = vpop.xlane.xlu0 %3652  ;;  %v3382_v10 = vmul.f32 %v5433_v53, %v7287_v48 }
0x1033   :  { %5436 = vrcp.f32 %v3351_v37  ;;  %v3681_v51 = vsub.f32 %v7294_v23, %v3653_v28 }
0x1034   :  { %5049 = vmatmul.msk.f32.gmra.mxu3 %vm1560_vm13, %v3382_v10 }
0x1035   :  { %v7363_v7 = vpop.eup %5434  ;;  %v3691_v6 = vmul.f32 1.442695, %v3681_v51 }
0x1036   :  { %v3367_v33 = vsel %vm1560_vm13, %v7363_v7, 0.0 }
0x1037   :  { %5438 = vpow2.f32 %v3691_v6  ;;  %3670 = vmax.xlane.f32.xlu0 %v3669_v17  ;;  %3368 = vadd.xlane.f32.xlu2 %v3367_v33 }
0x1039   :  { %v5437_v45 = vpop.eup %5436 }
0x103a   :  { %v3656_v26 = vpop.xlane.xlu2 %3655  ;;  %v3354_v48 = vpop.xlane.xlu1 %3353  ;;  %v3383_v61 = vmul.f32 %v5437_v45, %v7297_v44  ;;  %v5057_v45 = vld [vmem:[%s7784_s30 + $0x20] sm:$0xff] }
0x103b   :  { %v3682_v23 = vsub.f32 %v7304_v11, %v3656_v26  ;;  %5440 = vrcp.f32 %v3354_v48 }
0x103c   :  { %5050 = vmatmul.msk.f32.gmra.mxu3 %vm1560_vm13, %v3383_v61 }
0x103d   :  { %v7372_v39 = vpop.eup %5438  ;;  %v3693_v24 = vmul.f32 1.442695, %v3682_v23 }
0x103e   :  { %v3711_v1 = vsel %vm1560_vm13, %v7372_v39, 0.0 }
0x103f   :  { %5442 = vpow2.f32 %v3693_v24  ;;  %3712 = vadd.xlane.f32.xlu1 %v3711_v1 }
0x1041   :  { %v5441_v30 = vpop.eup %5440 }
0x1042   :  { %v3357_v0 = vpop.xlane.xlu0 %3356  ;;  %v3659_v20 = vpop.xlane.xlu1 %3658  ;;  %v3384_v46 = vmul.f32 %v5441_v30, %v7307_v54 }
0x1043   :  { %5444 = vrcp.f32 %v3357_v0  ;;  %v3683_v44 = vsub.f32 %v7314_v29, %v3659_v20 }
0x1044   :  { %5051 = vmatmul.msk.f32.gmra.mxu3 %vm1560_vm13, %v3384_v46 }
0x1045   :  { %v7379_v11 = vpop.eup %5442  ;;  %v3695_v32 = vmul.f32 1.442695, %v3683_v44 }
0x1046   :  { %v3714_v60 = vsel %vm1560_vm13, %v7379_v11, 0.0 }
0x1047   :  { %5446 = vpow2.f32 %v3695_v32  ;;  %3715 = vadd.xlane.f32.xlu2 %v3714_v60 }
0x1049   :  { %v5445_v47 = vpop.eup %5444 }
0x104a   :  { %v3662_v58 = vpop.xlane.xlu0 %3661  ;;  %v3385_v8 = vmul.f32 %v5445_v47, %v7316_v50 }
0x104b   :  { %v3684_v15 = vsub.f32 %v7323_v16, %v3662_v58 }
0x104c   :  { %5052 = vmatmul.msk.f32.gmra.mxu3 %vm1560_vm13, %v3385_v8 }
0x104d   :  { %v7386_v54 = vpop.eup %5446  ;;  %v3697_v29 = vmul.f32 1.442695, %v3684_v15 }
0x104e   :  { %v3717_v5 = vsel %vm1560_vm13, %v7386_v54, 0.0 }
0x104f   :  { %5448 = vpow2.f32 %v3697_v29  ;;  %3718 = vadd.xlane.f32.xlu0 %v3717_v5 }
0x1055   :  { %v7390_v49 = vpop.eup %5448 }
0x1056   :  { %v3360_v27 = vpop.xlane.xlu2 %3359  ;;  %v3720_v36 = vsel %vm1560_vm13, %v7390_v49, 0.0 }
0x1057   :  { %5450 = vrcp.f32 %v3360_v27  ;;  %3721 = vadd.xlane.f32.xlu1 %v3720_v36 }
0x105d   :  { %v5451_v50 = vpop.eup %5450 }
0x105e   :  { %v3665_v16 = vpop.xlane.xlu2 %3664  ;;  %v3386_v38 = vmul.f32 %v5451_v50, %v7328_v31  ;;  %v3642_v31 = vpop.f32.mrf.mxu2 }
0x105f   :  { %v3685_v41 = vsub.f32 %v7334_v13, %v3665_v16  ;;  %v7405_v10 = vadd.f32 %v7254_v9, %v3642_v31  ;;  %v5058_v9 = vld [vmem:[%s7784_s30 + $0x28] sm:$0xff] }
0x1060   :  { %5053 = vmatmul.msk.f32.gmra.mxu3 %vm1560_vm13, %v3386_v38  ;;  %4014 = vmatpush.msrb.mxu2 %v5058_v9 }
0x1061   :  { %v3699_v57 = vmul.f32 1.442695, %v3685_v41  ;;  %v3363_v63 = vpop.xlane.xlu1 %3362  ;;  %v3672_v51 = vsel %vm1560_vm13, %v7405_v10, -inf }
0x1062   :  { %5452 = vrcp.f32 %v3363_v63  ;;  %4015 = vmatpush.msrb.mxu2 %v5057_v45  ;;  %v5118_v45 = vld [vmem:[%s7784_s30 + $0x38] sm:$0xff] }
0x1063   :  { %5454 = vpow2.f32 %v3699_v57  ;;  %3937 = vmatpush.msra.mxu1 %v5118_v45 }
0x1066   :  { %v3645_v6 = vpop.f32.mrf.mxu2 }
0x1067   :  { %v7414_v17 = vadd.f32 %v7268_v3, %v3645_v6 }
0x1068   :  { %v5453_v4 = vpop.eup %5452 }
0x1069   :  { %v7397_v56 = vpop.eup %5454  ;;  %v3668_v2 = vpop.xlane.xlu1 %3667  ;;  %v3387_v53 = vmul.f32 %v5453_v4, %v7338_v42  ;;  %v3675_v33 = vsel %vm1560_vm13, %v7414_v17, -inf }
0x106a   :  { %v3686_v37 = vsub.f32 %v7343_v18, %v3668_v2  ;;  %v3723_v28 = vsel %vm1560_vm13, %v7397_v56, 0.0 }
0x106b   :  { %3724 = vadd.xlane.f32.xlu2 %v3723_v28  ;;  %5054 = vmatmul.msk.f32.gmra.mxu3 %vm1560_vm13, %v3387_v53 }
0x106c   :  { %v3701_v13 = vmul.f32 1.442695, %v3686_v37 }
0x106e   :  { %5456 = vpow2.f32 %v3701_v13 }
0x1073   :  { %3673 = vmax.xlane.f32.xlu2 %v3672_v51 }
0x1074   :  { %v7409_v42 = vpop.eup %5456 }
0x1075   :  { %v3726_v18 = vsel %vm1560_vm13, %v7409_v42, 0.0 }
0x1076   :  { %3727 = vadd.xlane.f32.xlu0 %v3726_v18 }
0x107e   :  { %3676 = vmax.xlane.f32.xlu0 %v3675_v33 }
0x10a2   :  { %v3366_v26 = vpop.xlane.xlu0 %3365 }
0x10a3   :  { %5458 = vrcp.f32 %v3366_v26  ;;  %v5117_v26 = vld [vmem:[%s7784_s30 + $0x30] sm:$0xff] }
0x10a4   :  { %3938 = vmatpush.msra.mxu1 %v5117_v26 }
0x10a7   :  { %v3489_v48 = vpop.f32.mrf.mxu3 }
0x10a8   :  { %5129 = vmatmul.msk.f32.vlgmr.msrb.gmra.mxu2 %vm317_vm4, %v3489_v48 }
0x10a9   :  { %v5459_v61 = vpop.eup %5458 }
0x10aa   :  { %v3671_v23 = vpop.xlane.xlu0 %3670  ;;  %v3369_v24 = vpop.xlane.xlu2 %3368  ;;  %v3388_v1 = vmul.f32 %v5459_v61, %v7353_v52 }
0x10ab   :  { %v3687_v3 = vsub.f32 %v7358_v14, %v3671_v23  ;;  %5460 = vrcp.f32 %v3369_v24  ;;  %v3648_v14 = vpop.f32.mrf.mxu2 }
0x10ac   :  { %5055 = vmatmul.msk.f32.gmra.mxu3 %vm1560_vm13, %v3388_v1  ;;  %v7433_v58 = vadd.f32 %v7281_v12, %v3648_v14 }
0x10ad   :  { %v3703_v30 = vmul.f32 1.442695, %v3687_v3 }
0x10ae   :  { %v3678_v15 = vsel %vm1560_vm13, %v7433_v58, -inf }
0x10af   :  { %5462 = vpow2.f32 %v3703_v30  ;;  %v3492_v0 = vpop.f32.mrf.mxu3 }
0x10b0   :  { %5130 = vmatmul.msk.f32.gmra.mxu2 %vm317_vm4, %v3492_v0 }
0x10b1   :  { %v5461_v20 = vpop.eup %5460 }
0x10b2   :  { %v3713_v46 = vpop.xlane.xlu1 %3712  ;;  %v3389_v44 = vmul.f32 %v5461_v20, %v7363_v7 }
0x10b3   :  { %5464 = vrcp.f32 %v3713_v46 }
0x10b4   :  { %5056 = vmatmul.msk.f32.gmra.mxu3 %vm1560_vm13, %v3389_v44 }
0x10b5   :  { %v7427_v32 = vpop.eup %5462 }
0x10b6   :  { %v3729_v52 = vsel %vm1560_vm13, %v7427_v32, 0.0 }
0x10b7   :  { %v3495_v60 = vpop.f32.mrf.mxu3  ;;  %3730 = vadd.xlane.f32.xlu1 %v3729_v52 }
0x10b8   :  { %5131 = vmatmul.msk.f32.gmra.mxu2 %vm317_vm4, %v3495_v60 }
0x10b9   :  { %v5465_v47 = vpop.eup %5464 }
0x10ba   :  { %v3751_v8 = vmul.f32 %v5465_v47, %v7372_v39  ;;  %v3716_v7 = vpop.xlane.xlu2 %3715 }
0x10bb   :  { %5466 = vrcp.f32 %v3716_v7 }
0x10bc   :  { %5107 = vmatmul.msk.f32.vlgmr.msra.gmra.mxu3 %vm1560_vm13, %v3751_v8 }
0x10bf   :  { %v3498_v29 = vpop.f32.mrf.mxu3  ;;  %3679 = vmax.xlane.f32.xlu1 %v3678_v15 }
0x10c0   :  { %5132 = vmatmul.msk.f32.gmra.mxu2 %vm317_vm4, %v3498_v29 }
0x10c1   :  { %v5467_v5 = vpop.eup %5466 }
0x10c2   :  { %v3719_v27 = vpop.xlane.xlu0 %3718  ;;  %v3752_v36 = vmul.f32 %v5467_v5, %v7379_v11 }
0x10c3   :  { %5468 = vrcp.f32 %v3719_v27 }
0x10c4   :  { %5108 = vmatmul.msk.f32.gmra.mxu3 %vm1560_vm13, %v3752_v36 }
0x10c7   :  { %v3501_v12 = vpop.f32.mrf.mxu3 }
0x10c8   :  { %5133 = vmatmul.msk.f32.gmra.mxu2 %vm317_vm4, %v3501_v12 }
0x10c9   :  { %v5469_v39 = vpop.eup %5468 }
0x10ca   :  { %v3722_v50 = vpop.xlane.xlu1 %3721  ;;  %v3753_v16 = vmul.f32 %v5469_v39, %v7386_v54  ;;  %v7477_v39 = vld [vmem:[%s7785_s6 + $0x1] ss:$0 sm:$0xff] }
0x10cb   :  { %5470 = vrcp.f32 %v3722_v50 }
0x10cc   :  { %5109 = vmatmul.msk.f32.gmra.mxu3 %vm1560_vm13, %v3753_v16 }
0x10cf   :  { %v3504_v38 = vpop.f32.mrf.mxu3 }
0x10d0   :  { %5134 = vmatmul.msk.f32.gmra.mxu2 %vm317_vm4, %v3504_v38 }
0x10d1   :  { %v5471_v41 = vpop.eup %5470 }
0x10d2   :  { %v3754_v57 = vmul.f32 %v5471_v41, %v7390_v49 }
0x10d4   :  { %5110 = vmatmul.msk.f32.gmra.mxu3 %vm1560_vm13, %v3754_v57 }
0x10de   :  { %v3725_v11 = vpop.xlane.xlu2 %3724 }
0x10df   :  { %5472 = vrcp.f32 %v3725_v11 }
0x10e3   :  { %v3507_v63 = vpop.f32.mrf.mxu3 }
0x10e4   :  { %5135 = vmatmul.msk.f32.gmra.mxu2 %vm317_vm4, %v3507_v63 }
0x10e5   :  { %v5473_v4 = vpop.eup %5472 }
0x10e6   :  { %v3674_v2 = vpop.xlane.xlu2 %3673  ;;  %v3755_v54 = vmul.f32 %v5473_v4, %v7397_v56 }
0x10e7   :  { %v3688_v53 = vsub.f32 %v7405_v10, %v3674_v2 }
0x10e8   :  { %5111 = vmatmul.msk.f32.gmra.mxu3 %vm1560_vm13, %v3755_v54 }
0x10e9   :  { %v3705_v37 = vmul.f32 1.442695, %v3688_v53  ;;  %v3728_v28 = vpop.xlane.xlu0 %3727 }
0x10ea   :  { %5474 = vrcp.f32 %v3728_v28 }
0x10eb   :  { %5476 = vpow2.f32 %v3705_v37 }
0x10ee   :  { %v3510_v49 = vpop.f32.mrf.mxu3 }
0x10ef   :  { %5136 = vmatmul.msk.f32.gmra.mxu2 %vm317_vm4, %v3510_v49 }
0x10f0   :  { %v5475_v31 = vpop.eup %5474 }
0x10f1   :  { %v5477_v13 = vpop.eup %5476  ;;  %v3677_v51 = vpop.xlane.xlu0 %3676  ;;  %v3756_v18 = vmul.f32 %v5475_v31, %v7409_v42 }
0x10f2   :  { %v3689_v56 = vsub.f32 %v7414_v17, %v3677_v51  ;;  %v3732_v10 = vsel %vm1560_vm13, %v5477_v13, 0.0 }
0x10f3   :  { %3733 = vadd.xlane.f32.xlu2 %v3732_v10  ;;  %5112 = vmatmul.msk.f32.gmra.mxu3 %vm1560_vm13, %v3756_v18 }
0x10f4   :  { %v3707_v6 = vmul.f32 1.442695, %v3689_v56 }
0x10f6   :  { %5478 = vpow2.f32 %v3707_v6 }
0x10fc   :  { %v5479_v33 = vpop.eup %5478 }
0x10fd   :  { %v3735_v9 = vsel %vm1560_vm13, %v5479_v33, 0.0 }
0x10fe   :  { %3736 = vadd.xlane.f32.xlu0 %v3735_v9 }
0x112a   :  { %v3731_v48 = vpop.xlane.xlu1 %3730 }
0x112b   :  { %5480 = vrcp.f32 %v3731_v48  ;;  %v4017_v5 = vpop.f32.mrf.mxu2 }
0x112f   :  { %v3513_v42 = vpop.f32.mrf.mxu3 }
0x1130   :  { %5137 = vmatmul.msk.f32.gmra.mxu2 %vm317_vm4, %v3513_v42 }
0x1131   :  { %v5481_v17 = vpop.eup %5480 }
0x1132   :  { %v3680_v61 = vpop.xlane.xlu1 %3679  ;;  %v3757_v23 = vmul.f32 %v5481_v17, %v7427_v32 }
0x1133   :  { %v3690_v24 = vsub.f32 %v7433_v58, %v3680_v61  ;;  %v4020_v41 = vpop.f32.mrf.mxu2 }
0x1134   :  { %5113 = vmatmul.msk.f32.gmra.mxu3 %vm1560_vm13, %v3757_v23 }
0x1135   :  { %v3709_v1 = vmul.f32 1.442695, %v3690_v24 }
0x1137   :  { %5482 = vpow2.f32 %v3709_v1  ;;  %v3516_v3 = vpop.f32.mrf.mxu3 }
0x1138   :  { %5138 = vmatmul.msk.f32.gmra.mxu2 %vm317_vm4, %v3516_v3 }
0x113b   :  { %v4023_v53 = vpop.f32.mrf.mxu2 }
0x113d   :  { %v5483_v30 = vpop.eup %5482 }
0x113e   :  { %v3738_v0 = vsel %vm1560_vm13, %v5483_v30, 0.0 }
0x113f   :  { %v3860_v20 = vpop.f32.mrf.mxu3  ;;  %3739 = vadd.xlane.f32.xlu1 %v3738_v0 }
0x1140   :  { %5119 = vmatmul.msk.f32.vlgmr.msra.gmra.mxu1 %vm317_vm4, %v3860_v20 }
0x1143   :  { %v4026_v51 = vpop.f32.mrf.mxu2 }
0x1147   :  { %v3863_v46 = vpop.f32.mrf.mxu3 }
0x1148   :  { %5120 = vmatmul.msk.f32.gmra.mxu1 %vm317_vm4, %v3863_v46 }
0x114f   :  { %v3866_v44 = vpop.f32.mrf.mxu3 }
0x1150   :  { %5121 = vmatmul.msk.f32.gmra.mxu1 %vm317_vm4, %v3866_v44 }
0x1157   :  { %v3869_v32 = vpop.f32.mrf.mxu3 }
0x1158   :  { %5122 = vmatmul.msk.f32.gmra.mxu1 %vm317_vm4, %v3869_v32 }
0x1166   :  { %v3734_v52 = vpop.xlane.xlu2 %3733 }
0x1167   :  { %5484 = vrcp.f32 %v3734_v52 }
0x116b   :  { %v3872_v14 = vpop.f32.mrf.mxu3 }
0x116c   :  { %5123 = vmatmul.msk.f32.gmra.mxu1 %vm317_vm4, %v3872_v14 }
0x116d   :  { %v5485_v60 = vpop.eup %5484 }
0x116e   :  { %v3758_v47 = vmul.f32 %v5485_v60, %v5477_v13 }
0x1170   :  { %5114 = vmatmul.msk.f32.gmra.mxu3 %vm1560_vm13, %v3758_v47 }
0x1171   :  { %v3737_v58 = vpop.xlane.xlu0 %3736 }
0x1172   :  { %5486 = vrcp.f32 %v3737_v58 }
0x1176   :  { %v3875_v8 = vpop.f32.mrf.mxu3 }
0x1177   :  { %5124 = vmatmul.msk.f32.gmra.mxu1 %vm317_vm4, %v3875_v8 }
0x1178   :  { %v5487_v7 = vpop.eup %5486 }
0x1179   :  { %v3759_v15 = vmul.f32 %v5487_v7, %v5479_v33  ;;  %v4029_v33 = vpop.f32.mrf.mxu2 }
0x117b   :  { %5115 = vmatmul.msk.f32.gmra.mxu3 %vm1560_vm13, %v3759_v15 }
0x1181   :  { %v4032_v17 = vpop.f32.mrf.mxu2 }
0x11b2   :  { %v3740_v29 = vpop.xlane.xlu1 %3739 }
0x11b3   :  { %5488 = vrcp.f32 %v3740_v29 }
0x11b7   :  { %v3878_v27 = vpop.f32.mrf.mxu3 }
0x11b8   :  { %5125 = vmatmul.msk.f32.gmra.mxu1 %vm317_vm4, %v3878_v27 }
0x11b9   :  { %v5489_v36 = vpop.eup %5488 }
0x11ba   :  { %v3760_v12 = vmul.f32 %v5489_v36, %v5483_v30 }
0x11bc   :  { %5116 = vmatmul.msk.f32.gmra.mxu3 %vm1560_vm13, %v3760_v12 }
0x11bd   :  { %v3940_v50 = vpop.f32.mrf.mxu1 }
0x11be   :  { %v4018_v16 = vadd.f32 %v4017_v5, %v3940_v50 }
0x11c0   :  { %v4052_v38 = vadd.f32 %v7477_v39, %v4018_v16 }
0x11c2   :  { %v4062_v57 = vadd.f32 %v4052_v38, %v6984_v22 }
0x11c4   :  { %v4076_v11 = vsel %vm273_vm3, %v4062_v57, 0.0 }
0x11c5   :  { %4077 = vadd.xlane.f32.xlu2 %v4076_v11  ;;  %v3943_v63 = vpop.f32.mrf.mxu1 }
0x11c6   :  { %v4021_v4 = vadd.f32 %v4020_v41, %v3943_v63 }
0x11c8   :  { %v4053_v2 = vadd.f32 %v7477_v39, %v4021_v4 }
0x11ca   :  { %v4063_v54 = vadd.f32 %v4053_v2, %v7000_v55 }
0x11cc   :  { %v4079_v37 = vsel %vm273_vm3, %v4063_v54, 0.0 }
0x11cd   :  { %4080 = vadd.xlane.f32.xlu0 %v4079_v37  ;;  %v3946_v28 = vpop.f32.mrf.mxu1 }
0x11ce   :  { %v4024_v49 = vadd.f32 %v4023_v53, %v3946_v28 }
0x11d0   :  { %v4054_v31 = vadd.f32 %v7477_v39, %v4024_v49 }
0x11d2   :  { %v4064_v13 = vadd.f32 %v4054_v31, %v7009_v34 }
0x11d4   :  { %v4082_v22 = vsel %vm273_vm3, %v4064_v13, 0.0 }
0x11d5   :  { %v3949_v18 = vpop.f32.mrf.mxu1  ;;  %4083 = vadd.xlane.f32.xlu1 %v4082_v22 }
0x11d6   :  { %v4027_v56 = vadd.f32 %v4026_v51, %v3949_v18 }
0x11d8   :  { %v4055_v10 = vadd.f32 %v7477_v39, %v4027_v56 }
0x11da   :  { %v4065_v55 = vadd.f32 %v4055_v10, %v7018_v62 }
0x11dc   :  { %v4085_v6 = vsel %vm273_vm3, %v4065_v55, 0.0 }
0x11dd   :  { %4086 = vadd.xlane.f32.xlu2 %v4085_v6 }
0x11e9   :  { %v3952_v9 = vpop.f32.mrf.mxu1 }
0x11ea   :  { %v4030_v45 = vadd.f32 %v4029_v33, %v3952_v9 }
0x11ec   :  { %v4056_v26 = vadd.f32 %v7477_v39, %v4030_v45 }
0x11ee   :  { %v4066_v34 = vadd.f32 %v4056_v26, %v7028_v35  ;;  %v4035_v35 = vpop.f32.mrf.mxu2 }
0x11f0   :  { %v4088_v48 = vsel %vm273_vm3, %v4066_v34, 0.0 }
0x11f1   :  { %4089 = vadd.xlane.f32.xlu0 %v4088_v48  ;;  %v5143_v48 = vld [vmem:[%s7786_s7 + $0x28] sm:$0xff] }
0x11f3   :  { %v3881_v42 = vpop.f32.mrf.mxu3 }
0x11f4   :  { %v3955_v61 = vpop.f32.mrf.mxu1  ;;  %5126 = vmatmul.msk.f32.gmra.mxu1 %vm317_vm4, %v3881_v42  ;;  %v5142_v42 = vld [vmem:[%s7786_s7 + $0x20] sm:$0xff] }
0x11f5   :  { %v4033_v23 = vadd.f32 %v4032_v17, %v3955_v61 }
0x11f6   :  { %v4038_v28 = vpop.f32.mrf.mxu2 }
0x11f7   :  { %v4057_v62 = vadd.f32 %v7477_v39, %v4033_v23 }
0x11f9   :  { %v4067_v24 = vadd.f32 %v4057_v62, %v7037_v21 }
0x11fb   :  { %v4091_v1 = vsel %vm273_vm3, %v4067_v24, 0.0 }
0x11fc   :  { %4092 = vadd.xlane.f32.xlu1 %v4091_v1 }
0x11fe   :  { %v3884_v3 = vpop.f32.mrf.mxu3 }
0x11ff   :  { %5127 = vmatmul.msk.f32.gmra.mxu1 %vm317_vm4, %v3884_v3 }
0x1235   :  { %v3958_v30 = vpop.f32.mrf.mxu1 }
0x1236   :  { %v4036_v0 = vadd.f32 %v4035_v35, %v3958_v30 }
0x1238   :  { %v4058_v20 = vadd.f32 %v7477_v39, %v4036_v0  ;;  %v4078_v46 = vpop.xlane.xlu2 %4077 }
0x1239   :  { %v4106_v44 = vmul.f32 %v4078_v46, %v6021_v40 }
0x123a   :  { %v7502_v32 = vadd.f32 %v4058_v20, %v7053_v43 }
0x123b   :  { %v7504_v52 = vsub.f32 %v4062_v57, %v4106_v44 }
0x123c   :  { %v4094_v21 = vsel %vm273_vm3, %v7502_v32, 0.0 }
0x123d   :  { %4095 = vadd.xlane.f32.xlu0 %v4094_v21  ;;  %v4126_v14 = vmul.f32 %v7504_v52, %v7504_v52 }
0x123f   :  { %v3887_v60 = vpop.f32.mrf.mxu3  ;;  %v4136_v47 = vsel %vm273_vm3, %v4126_v14, 0.0 }
0x1240   :  { %v4081_v58 = vpop.xlane.xlu0 %4080  ;;  %4137 = vadd.xlane.f32.xlu2 %v4136_v47  ;;  %5128 = vmatmul.msk.f32.gmra.mxu1 %vm317_vm4, %v3887_v60 }
0x1241   :  { %v4107_v8 = vmul.f32 %v4081_v58, %v6021_v40 }
0x1243   :  { %v7513_v43 = vsub.f32 %v4063_v54, %v4107_v8 }
0x1245   :  { %v4127_v7 = vmul.f32 %v7513_v43, %v7513_v43 }
0x1247   :  { %v4139_v15 = vsel %vm273_vm3, %v4127_v7, 0.0 }
0x1248   :  { %4140 = vadd.xlane.f32.xlu1 %v4139_v15  ;;  %v4084_v29 = vpop.xlane.xlu1 %4083 }
0x1249   :  { %v4108_v5 = vmul.f32 %v4084_v29, %v6021_v40 }
0x124b   :  { %v7519_v27 = vsub.f32 %v4064_v13, %v4108_v5 }
0x124d   :  { %v4128_v36 = vmul.f32 %v7519_v27, %v7519_v27 }
0x124f   :  { %v4142_v12 = vsel %vm273_vm3, %v4128_v36, 0.0 }
0x1250   :  { %v4087_v50 = vpop.xlane.xlu2 %4086  ;;  %4143 = vadd.xlane.f32.xlu2 %v4142_v12 }
0x1251   :  { %v4109_v16 = vmul.f32 %v4087_v50, %v6021_v40  ;;  %v7575_v50 = vld [vmem:[%s7787_s10 + $0x1] ss:$0 sm:$0xff] }
0x1253   :  { %v7525_v38 = vsub.f32 %v4065_v55, %v4109_v16  ;;  %v4041_v55 = vpop.f32.mrf.mxu2 }
0x1255   :  { %v4129_v41 = vmul.f32 %v7525_v38, %v7525_v38 }
0x1257   :  { %v4145_v57 = vsel %vm273_vm3, %v4129_v41, 0.0  ;;  %v7578_v41 = vld [vmem:[%s7788_s11 + $0x1] ss:$0 sm:$0xff] }
0x1258   :  { %4146 = vadd.xlane.f32.xlu0 %v4145_v57 }
0x125b   :  { %v4044_v0 = vpop.f32.mrf.mxu2 }
0x1264   :  { %v4090_v11 = vpop.xlane.xlu0 %4089 }
0x1265   :  { %v4110_v63 = vmul.f32 %v4090_v11, %v6021_v40 }
0x1267   :  { %v7531_v4 = vsub.f32 %v4066_v34, %v4110_v63  ;;  %v5144_v34 = vld [vmem:[%s7786_s7 + $0x30] sm:$0xff] }
0x1269   :  { %v4130_v2 = vmul.f32 %v7531_v4, %v7531_v4 }
0x126b   :  { %v4148_v54 = vsel %vm273_vm3, %v4130_v2, 0.0 }
0x126c   :  { %4149 = vadd.xlane.f32.xlu1 %v4148_v54 }
0x126f   :  { %v4093_v53 = vpop.xlane.xlu1 %4092 }
0x1270   :  { %v4111_v37 = vmul.f32 %v4093_v53, %v6021_v40 }
0x1271   :  { %v3961_v49 = vpop.f32.mrf.mxu1 }
0x1272   :  { %v7537_v31 = vsub.f32 %v4067_v24, %v4111_v37  ;;  %v4039_v13 = vadd.f32 %v4038_v28, %v3961_v49 }
0x1274   :  { %v4059_v22 = vadd.f32 %v7477_v39, %v4039_v13  ;;  %v4131_v51 = vmul.f32 %v7537_v31, %v7537_v31 }
0x1276   :  { %v4151_v18 = vsel %vm273_vm3, %v4131_v51, 0.0  ;;  %v7544_v56 = vadd.f32 %v4059_v22, %v7067_v25  ;;  %v5145_v25 = vld [vmem:[%s7786_s7 + $0x38] sm:$0xff] }
0x1277   :  { %4152 = vadd.xlane.f32.xlu2 %v4151_v18  ;;  %4374 = vmatpush.msra.mxu0 %v5145_v25 }
0x1278   :  { %v4097_v10 = vsel %vm273_vm3, %v7544_v56, 0.0 }
0x1279   :  { %4098 = vadd.xlane.f32.xlu1 %v4097_v10  ;;  %4375 = vmatpush.msra.mxu0 %v5144_v34 }
0x127b   :  { %4376 = vmatpush.msra.mxu0 %v5143_v48 }
0x127c   :  { %v3964_v6 = vpop.f32.mrf.mxu1 }
0x127d   :  { %v4042_v33 = vadd.f32 %v4041_v55, %v3964_v6  ;;  %4377 = vmatpush.msra.mxu0 %v5142_v42 }
0x127f   :  { %v4060_v9 = vadd.f32 %v7477_v39, %v4042_v33 }
0x1281   :  { %v7550_v45 = vadd.f32 %v4060_v9, %v7076_v59 }
0x1283   :  { %v4100_v26 = vsel %vm273_vm3, %v7550_v45, 0.0 }
0x1284   :  { %4101 = vadd.xlane.f32.xlu2 %v4100_v26 }
0x12b0   :  { %v4096_v17 = vpop.xlane.xlu0 %4095 }
0x12b1   :  { %v4112_v61 = vmul.f32 %v4096_v17, %v6021_v40 }
0x12b3   :  { %v7560_v23 = vsub.f32 %v7502_v32, %v4112_v61  ;;  %v4138_v59 = vpop.xlane.xlu2 %4137 }
0x12b4   :  { %v4166_v62 = vmul.f32 %v4138_v59, %v6021_v40 }
0x12b5   :  { %v4132_v24 = vmul.f32 %v7560_v23, %v7560_v23 }
0x12b6   :  { %v4176_v1 = vadd.f32 1e-06, %v4166_v62 }
0x12b7   :  { %v4154_v3 = vsel %vm273_vm3, %v4132_v24, 0.0 }
0x12b8   :  { %5490 = vrsqrt.f32 %v4176_v1  ;;  %4155 = vadd.xlane.f32.xlu0 %v4154_v3  ;;  %vm4192_vm13 = vweird.f32 %v4176_v1 }
0x12bb   :  { %v4141_v35 = vpop.xlane.xlu1 %4140 }
0x12bc   :  { %v4167_v30 = vmul.f32 %v4141_v35, %v6021_v40 }
0x12bd   :  { %v3967_v20 = vpop.f32.mrf.mxu1 }
0x12be   :  { %v5491_v46 = vpop.eup %5490  ;;  %v4177_v44 = vadd.f32 1e-06, %v4167_v30  ;;  %v4045_v32 = vadd.f32 %v4044_v0, %v3967_v20 }
0x12bf   :  { %v4187_v21 = vmul.f32 %v5491_v46, %v4176_v1  ;;  %vm4193_vm4 = vweird.f32 %v5491_v46 }
0x12c0   :  { %5492 = vrsqrt.f32 %v4177_v44  ;;  %v4061_v14 = vadd.f32 %v7477_v39, %v4045_v32  ;;  %vm4194_vm11 = vmor %vm4192_vm13, %vm4193_vm4  ;;  %vm4202_vm14 = vweird.f32 %v4177_v44 }
0x12c1   :  { %v4188_v60 = vmul.f32 %v5491_v46, %v4187_v21 }
0x12c2   :  { %v7569_v47 = vadd.f32 %v4061_v14, %v7085_v19 }
0x12c3   :  { %v4189_v58 = vmul.f32 0.5, %v4188_v60  ;;  %v4144_v8 = vpop.xlane.xlu2 %4143 }
0x12c4   :  { %v4168_v7 = vmul.f32 %v4144_v8, %v6021_v40  ;;  %v4103_v15 = vsel %vm273_vm3, %v7569_v47, 0.0 }
0x12c5   :  { %v4190_v29 = vsub.f32 1.5, %v4189_v58  ;;  %4104 = vadd.xlane.f32.xlu0 %v4103_v15 }
0x12c6   :  { %v5493_v5 = vpop.eup %5492  ;;  %v4178_v36 = vadd.f32 1e-06, %v4168_v7 }
0x12c7   :  { %v4191_v12 = vmul.f32 %v5491_v46, %v4190_v29  ;;  %v4197_v39 = vmul.f32 %v5493_v5, %v4177_v44  ;;  %vm4203_vm12 = vweird.f32 %v5493_v5 }
0x12c8   :  { %5494 = vrsqrt.f32 %v4178_v36  ;;  %vm4204_vm15 = vmor %vm4202_vm14, %vm4203_vm12  ;;  %vm4212_vm1 = vweird.f32 %v4178_v36 }
0x12c9   :  { %v4195_v19 = vsel %vm4194_vm11, %v5491_v46, %v4191_v12  ;;  %v4198_v16 = vmul.f32 %v5493_v5, %v4197_v39 }
0x12ca   :  { %v4286_v57 = vmul.f32 %v4195_v19, %v7504_v52 }
0x12cb   :  { %v4199_v11 = vmul.f32 0.5, %v4198_v16  ;;  %v4147_v63 = vpop.xlane.xlu0 %4146 }
0x12cc   :  { %v4299_v2 = vmul.f32 %v7575_v50, %v4286_v57  ;;  %v4169_v54 = vmul.f32 %v4147_v63, %v6021_v40 }
0x12cd   :  { %v4200_v53 = vsub.f32 1.5, %v4199_v11 }
0x12ce   :  { %v5495_v37 = vpop.eup %5494  ;;  %v7584_v28 = vadd.f32 %v7578_v41, %v4299_v2  ;;  %v4179_v49 = vadd.f32 1e-06, %v4169_v54 }
0x12cf   :  { %v4201_v13 = vmul.f32 %v5493_v5, %v4200_v53  ;;  %v4207_v22 = vmul.f32 %v5495_v37, %v4178_v36  ;;  %vm4213_vm0 = vweird.f32 %v5495_v37 }
0x12d0   :  { %5496 = vrsqrt.f32 %v4179_v49  ;;  %5147 = vmatmul.msk.f32.vlgmr.msra.gmra.mxu0 %vm273_vm3, %v7584_v28  ;;  %vm4214_vm5 = vmor %vm4212_vm1, %vm4213_vm0  ;;  %vm4222_vm7 = vweird.f32 %v4179_v49 }
0x12d1   :  { %v4205_v52 = vsel %vm4204_vm15, %v5493_v5, %v4201_v13  ;;  %v4208_v51 = vmul.f32 %v5495_v37, %v4207_v22 }
0x12d2   :  { %v4287_v18 = vmul.f32 %v4205_v52, %v7513_v43 }
0x12d3   :  { %v4209_v10 = vmul.f32 0.5, %v4208_v51 }
0x12d4   :  { %v4300_v55 = vmul.f32 %v7575_v50, %v4287_v18 }
0x12d5   :  { %v4210_v6 = vsub.f32 1.5, %v4209_v10 }
0x12d6   :  { %v5497_v33 = vpop.eup %5496  ;;  %v7591_v9 = vadd.f32 %v7578_v41, %v4300_v55 }
0x12d7   :  { %v4211_v26 = vmul.f32 %v5495_v37, %v4210_v6  ;;  %v4217_v25 = vmul.f32 %v5497_v33, %v4179_v49  ;;  %vm4223_vm6 = vweird.f32 %v5497_v33 }
0x12d8   :  { %5148 = vmatmul.msk.f32.gmra.mxu0 %vm273_vm3, %v7591_v9  ;;  %vm4224_vm8 = vmor %vm4222_vm7, %vm4223_vm6 }
0x12d9   :  { %v4215_v34 = vsel %vm4214_vm5, %v5495_v37, %v4211_v26  ;;  %v4218_v48 = vmul.f32 %v5497_v33, %v4217_v25  ;;  %v5164_v26 = vld [vmem:[%s7789_s15 + $0x78] sm:$0xff] }
0x12da   :  { %v4288_v43 = vmul.f32 %v4215_v34, %v7519_v27  ;;  %4551 = vmatpush.msrb.mxu3 %v5164_v26  ;;  %v5163_v34 = vld [vmem:[%s7789_s15 + $0x70] sm:$0xff] }
0x12db   :  { %v4219_v42 = vmul.f32 0.5, %v4218_v48 }
0x12dc   :  { %v4301_v17 = vmul.f32 %v7575_v50, %v4288_v43  ;;  %4552 = vmatpush.msrb.mxu3 %v5163_v34 }
0x12dd   :  { %v4220_v61 = vsub.f32 1.5, %v4219_v42  ;;  %v5162_v42 = vld [vmem:[%s7789_s15 + $0x68] sm:$0xff] }
0x12de   :  { %v4314_v59 = vadd.f32 %v7578_v41, %v4301_v17  ;;  %4553 = vmatpush.msrb.mxu3 %v5162_v42 }
0x12df   :  { %v4221_v62 = vmul.f32 %v5497_v33, %v4220_v61  ;;  %v4150_v24 = vpop.xlane.xlu1 %4149 }
0x12e0   :  { %v4170_v1 = vmul.f32 %v4150_v24, %v6021_v40  ;;  %5149 = vmatmul.msk.f32.gmra.mxu0 %vm273_vm3, %v4314_v59  ;;  %v5161_v59 = vld [vmem:[%s7789_s15 + $0x60] sm:$0xff] }
0x12e1   :  { %v4225_v3 = vsel %vm4224_vm8, %v5497_v33, %v4221_v62  ;;  %4554 = vmatpush.msrb.mxu3 %v5161_v59 }
0x12e2   :  { %v4289_v35 = vmul.f32 %v4225_v3, %v7525_v38  ;;  %v4180_v30 = vadd.f32 1e-06, %v4170_v1 }
0x12e4   :  { %5498 = vrsqrt.f32 %v4180_v30  ;;  %v4302_v27 = vmul.f32 %v7575_v50, %v4289_v35  ;;  %vm4232_vm10 = vweird.f32 %v4180_v30  ;;  %v5159_v35 = vld [vmem:[%s7789_s15 + $0x50] sm:$0xff] }
0x12e6   :  { %v4315_v0 = vadd.f32 %v7578_v41, %v4302_v27  ;;  %v5158_v27 = vld [vmem:[%s7789_s15 + $0x48] sm:$0xff] }
0x12e8   :  { %5150 = vmatmul.msk.f32.gmra.mxu0 %vm273_vm3, %v4315_v0 }
0x12ea   :  { %v5499_v20 = vpop.eup %5498  ;;  %v4153_v46 = vpop.xlane.xlu2 %4152 }
0x12eb   :  { %v4227_v44 = vmul.f32 %v5499_v20, %v4180_v30  ;;  %v4171_v32 = vmul.f32 %v4153_v46, %v6021_v40  ;;  %vm4233_vm9 = vweird.f32 %v5499_v20  ;;  %v7654_v46 = vld [vmem:[%s7790_s16 + $0x1] ss:$0 sm:$0xff] }
0x12ec   :  { %v4099_v21 = vpop.xlane.xlu1 %4098  ;;  %vm4234_vm4 = vmor %vm4232_vm10, %vm4233_vm9 }
0x12ed   :  { %v4228_v14 = vmul.f32 %v5499_v20, %v4227_v44  ;;  %v4181_v60 = vadd.f32 1e-06, %v4171_v32  ;;  %v4113_v58 = vmul.f32 %v4099_v21, %v6021_v40 }
0x12ef   :  { %v4229_v8 = vmul.f32 0.5, %v4228_v14  ;;  %5500 = vrsqrt.f32 %v4181_v60  ;;  %v7607_v38 = vsub.f32 %v7544_v56, %v4113_v58  ;;  %vm4242_vm11 = vweird.f32 %v4181_v60 }
0x12f1   :  { %v4230_v7 = vsub.f32 1.5, %v4229_v8  ;;  %v4133_v15 = vmul.f32 %v7607_v38, %v7607_v38 }
0x12f3   :  { %v4231_v29 = vmul.f32 %v5499_v20, %v4230_v7  ;;  %v4157_v5 = vsel %vm273_vm3, %v4133_v15, 0.0 }
0x12f4   :  { %4158 = vadd.xlane.f32.xlu1 %v4157_v5 }
0x12f5   :  { %v5501_v36 = vpop.eup %5500  ;;  %v4235_v12 = vsel %vm4234_vm4, %v5499_v20, %v4231_v29  ;;  %v5157_v20 = vld [vmem:[%s7789_s15 + $0x40] sm:$0xff] }
0x12f6   :  { %v4290_v39 = vmul.f32 %v4235_v12, %v7531_v4  ;;  %v4237_v19 = vmul.f32 %v5501_v36, %v4181_v60  ;;  %vm4243_vm13 = vweird.f32 %v5501_v36 }
0x12f7   :  { %v4102_v16 = vpop.xlane.xlu2 %4101  ;;  %vm4244_vm12 = vmor %vm4242_vm11, %vm4243_vm13 }
0x12f8   :  { %v4238_v57 = vmul.f32 %v5501_v36, %v4237_v19  ;;  %v4114_v56 = vmul.f32 %v4102_v16, %v6021_v40  ;;  %v4303_v11 = vmul.f32 %v7575_v50, %v4290_v39 }
0x12fa   :  { %v4239_v63 = vmul.f32 0.5, %v4238_v57  ;;  %v7616_v2 = vsub.f32 %v7550_v45, %v4114_v56  ;;  %v4316_v54 = vadd.f32 %v7578_v41, %v4303_v11 }
0x12fc   :  { %v4240_v53 = vsub.f32 1.5, %v4239_v63  ;;  %5151 = vmatmul.msk.f32.gmra.mxu0 %vm273_vm3, %v4316_v54  ;;  %v4134_v4 = vmul.f32 %v7616_v2, %v7616_v2 }
0x12fe   :  { %v4241_v37 = vmul.f32 %v5501_v36, %v4240_v53  ;;  %v4160_v49 = vsel %vm273_vm3, %v4134_v4, 0.0 }
0x12ff   :  { %4161 = vadd.xlane.f32.xlu2 %v4160_v49 }
0x1300   :  { %v4245_v13 = vsel %vm4244_vm12, %v5501_v36, %v4241_v37 }
0x1301   :  { %v4291_v45 = vmul.f32 %v4245_v13, %v7537_v31 }
0x1303   :  { %v4304_v22 = vmul.f32 %v7575_v50, %v4291_v45 }
0x1305   :  { %v7626_v52 = vadd.f32 %v7578_v41, %v4304_v22 }
0x1307   :  { %5152 = vmatmul.msk.f32.gmra.mxu0 %vm273_vm3, %v7626_v52 }
0x132b   :  { %v4156_v51 = vpop.xlane.xlu0 %4155 }
0x132c   :  { %v4172_v18 = vmul.f32 %v4156_v51, %v6021_v40 }
0x132e   :  { %v4182_v10 = vadd.f32 1e-06, %v4172_v18 }
0x1330   :  { %5502 = vrsqrt.f32 %v4182_v10  ;;  %vm4252_vm15 = vweird.f32 %v4182_v10 }
0x1336   :  { %v5503_v55 = vpop.eup %5502 }
0x1337   :  { %v4247_v6 = vmul.f32 %v5503_v55, %v4182_v10  ;;  %vm4253_vm14 = vweird.f32 %v5503_v55 }
0x1338   :  { %v4105_v33 = vpop.xlane.xlu0 %4104  ;;  %vm4254_vm0 = vmor %vm4252_vm15, %vm4253_vm14 }
0x1339   :  { %v4248_v31 = vmul.f32 %v5503_v55, %v4247_v6  ;;  %v4115_v25 = vmul.f32 %v4105_v33, %v6021_v40 }
0x133b   :  { %v4249_v48 = vmul.f32 0.5, %v4248_v31  ;;  %v7635_v43 = vsub.f32 %v7569_v47, %v4115_v25  ;;  %v5160_v47 = vld [vmem:[%s7789_s15 + $0x58] sm:$0xff] }
0x133c   :  { %4555 = vmatpush.msrb.mxu3 %v5160_v47 }
0x133d   :  { %v4250_v17 = vsub.f32 1.5, %v4249_v48  ;;  %v4135_v61 = vmul.f32 %v7635_v43, %v7635_v43 }
0x133e   :  { %4556 = vmatpush.msrb.mxu3 %v5159_v35 }
0x133f   :  { %v4251_v62 = vmul.f32 %v5503_v55, %v4250_v17  ;;  %v4163_v24 = vsel %vm273_vm3, %v4135_v61, 0.0 }
0x1340   :  { %4164 = vadd.xlane.f32.xlu0 %v4163_v24  ;;  %4557 = vmatpush.msrb.mxu3 %v5158_v27 }
0x1341   :  { %v4255_v1 = vsel %vm4254_vm0, %v5503_v55, %v4251_v62 }
0x1342   :  { %v4292_v3 = vmul.f32 %v4255_v1, %v7560_v23  ;;  %4558 = vmatpush.msrb.mxu3 %v5157_v20 }
0x1344   :  { %v4305_v30 = vmul.f32 %v7575_v50, %v4292_v3 }
0x1346   :  { %v7648_v0 = vadd.f32 %v7578_v41, %v4305_v30 }
0x1348   :  { %5153 = vmatmul.msk.f32.gmra.mxu0 %vm273_vm3, %v7648_v0 }
0x134d   :  { %v4379_v44 = vpop.f32.mrf.mxu0 }
0x134e   :  { %v4380_v32 = vadd.f32 %v7654_v46, %v4379_v44 }
0x1350   :  { %v4409_v23 = vmul.f32 %v4380_v32, %v4380_v32 }
0x1352   :  { %v4419_v21 = vmul.f32 %v4409_v23, %v4380_v32 }
0x1354   :  { %v4429_v14 = vmul.f32 0.044715, %v4419_v21 }
0x1355   :  { %v4382_v60 = vpop.f32.mrf.mxu0 }
0x1356   :  { %v4439_v58 = vadd.f32 %v4429_v14, %v4380_v32  ;;  %v4383_v8 = vadd.f32 %v7654_v46, %v4382_v60 }
0x1358   :  { %v4449_v7 = vmul.f32 0.7978846, %v4439_v58  ;;  %v4410_v15 = vmul.f32 %v4383_v8, %v4383_v8 }
0x135a   :  { %5504 = vtanh.f32 %v4449_v7  ;;  %v4420_v29 = vmul.f32 %v4410_v15, %v4383_v8 }
0x135c   :  { %v4430_v5 = vmul.f32 0.044715, %v4420_v29 }
0x135d   :  { %v4385_v36 = vpop.f32.mrf.mxu0 }
0x135e   :  { %v4440_v12 = vadd.f32 %v4430_v5, %v4383_v8  ;;  %v4386_v39 = vadd.f32 %v7654_v46, %v4385_v36 }
0x1360   :  { %v5505_v19 = vpop.eup %5504  ;;  %v4450_v16 = vmul.f32 0.7978846, %v4440_v12  ;;  %v4411_v57 = vmul.f32 %v4386_v39, %v4386_v39 }
0x1361   :  { %v4469_v56 = vadd.f32 1.0, %v5505_v19 }
0x1362   :  { %5506 = vtanh.f32 %v4450_v16  ;;  %v4421_v11 = vmul.f32 %v4411_v57, %v4386_v39 }
0x1363   :  { %v4479_v63 = vmul.f32 0.5, %v4469_v56 }
0x1364   :  { %v4431_v54 = vmul.f32 0.044715, %v4421_v11 }
0x1365   :  { %v4489_v53 = vmul.f32 %v4479_v63, %v4380_v32  ;;  %v4388_v4 = vpop.f32.mrf.mxu0 }
0x1366   :  { %v4441_v37 = vadd.f32 %v4431_v54, %v4386_v39  ;;  %v4389_v49 = vadd.f32 %v7654_v46, %v4388_v4 }
0x1367   :  { %5166 = vmatmul.msk.f32.vlgmr.msrb.gmra.mxu3 %vm2785_vm2, %v4489_v53  ;;  %v4159_v13 = vpop.xlane.xlu1 %4158 }
0x1368   :  { %v5507_v45 = vpop.eup %5506  ;;  %v4451_v22 = vmul.f32 0.7978846, %v4441_v37  ;;  %v4412_v51 = vmul.f32 %v4389_v49, %v4389_v49  ;;  %v4173_v18 = vmul.f32 %v4159_v13, %v6021_v40 }
0x1369   :  { %v4470_v10 = vadd.f32 1.0, %v5507_v45 }
0x136a   :  { %5508 = vtanh.f32 %v4451_v22  ;;  %v4422_v55 = vmul.f32 %v4412_v51, %v4389_v49  ;;  %v4183_v6 = vadd.f32 1e-06, %v4173_v18 }
0x136b   :  { %v4480_v33 = vmul.f32 0.5, %v4470_v10 }
0x136c   :  { %v4432_v26 = vmul.f32 0.044715, %v4422_v55  ;;  %5510 = vrsqrt.f32 %v4183_v6  ;;  %vm4262_vm5 = vweird.f32 %v4183_v6 }
0x136d   :  { %v4490_v31 = vmul.f32 %v4480_v33, %v4383_v8 }
0x136e   :  { %v4442_v25 = vadd.f32 %v4432_v26, %v4389_v49 }
0x136f   :  { %5167 = vmatmul.msk.f32.gmra.mxu3 %vm2785_vm2, %v4490_v31 }
0x1370   :  { %v5509_v34 = vpop.eup %5508  ;;  %v4452_v48 = vmul.f32 0.7978846, %v4442_v25 }
0x1371   :  { %v4471_v42 = vadd.f32 1.0, %v5509_v34 }
0x1372   :  { %v5511_v17 = vpop.eup %5510  ;;  %5512 = vtanh.f32 %v4452_v48  ;;  %v4162_v61 = vpop.xlane.xlu2 %4161 }
0x1373   :  { %v4257_v59 = vmul.f32 %v5511_v17, %v4183_v6  ;;  %v4174_v62 = vmul.f32 %v4162_v61, %v6021_v40  ;;  %v4481_v24 = vmul.f32 0.5, %v4471_v42  ;;  %vm4263_vm1 = vweird.f32 %v5511_v17 }
0x1374   :  { %vm4264_vm6 = vmor %vm4262_vm5, %vm4263_vm1 }
0x1375   :  { %v4258_v47 = vmul.f32 %v5511_v17, %v4257_v59  ;;  %v4184_v1 = vadd.f32 1e-06, %v4174_v62  ;;  %v4491_v3 = vmul.f32 %v4481_v24, %v4386_v39 }
0x1377   :  { %v4259_v35 = vmul.f32 0.5, %v4258_v47  ;;  %5514 = vrsqrt.f32 %v4184_v1  ;;  %5168 = vmatmul.msk.f32.gmra.mxu3 %vm2785_vm2, %v4491_v3  ;;  %vm4272_vm8 = vweird.f32 %v4184_v1 }
0x1378   :  { %v5513_v30 = vpop.eup %5512 }
0x1379   :  { %v4260_v27 = vsub.f32 1.5, %v4259_v35  ;;  %v4391_v20 = vpop.f32.mrf.mxu0  ;;  %v4472_v44 = vadd.f32 1.0, %v5513_v30 }
0x137a   :  { %v4392_v32 = vadd.f32 %v7654_v46, %v4391_v20 }
0x137b   :  { %v4261_v23 = vmul.f32 %v5511_v17, %v4260_v27  ;;  %v4482_v21 = vmul.f32 0.5, %v4472_v44 }
0x137c   :  { %v4413_v14 = vmul.f32 %v4392_v32, %v4392_v32 }
0x137d   :  { %v5515_v60 = vpop.eup %5514  ;;  %v4265_v58 = vsel %vm4264_vm6, %v5511_v17, %v4261_v23  ;;  %v4492_v8 = vmul.f32 %v4482_v21, %v4389_v49 }
0x137e   :  { %v4293_v7 = vmul.f32 %v4265_v58, %v7607_v38  ;;  %v4267_v15 = vmul.f32 %v5515_v60, %v4184_v1  ;;  %v4423_v29 = vmul.f32 %v4413_v14, %v4392_v32  ;;  %vm4273_vm7 = vweird.f32 %v5515_v60 }
0x137f   :  { %5169 = vmatmul.msk.f32.gmra.mxu3 %vm2785_vm2, %v4492_v8  ;;  %vm4274_vm9 = vmor %vm4272_vm8, %vm4273_vm7 }
0x1380   :  { %v4268_v5 = vmul.f32 %v5515_v60, %v4267_v15  ;;  %v4433_v36 = vmul.f32 0.044715, %v4423_v29  ;;  %v4306_v12 = vmul.f32 %v7575_v50, %v4293_v7  ;;  %v5237_v7 = vld [vmem:[%s5793_s12 + $0x1] ss:$0 sm:$0xff]  ;;  %s5612_s12 = smov [#allocation2]  }
0x1382   :  { %v4269_v39 = vmul.f32 0.5, %v4268_v5  ;;  %v4443_v19 = vadd.f32 %v4433_v36, %v4392_v32  ;;  %v4319_v16 = vadd.f32 %v7578_v41, %v4306_v12 }
0x1384   :  { %v4270_v57 = vsub.f32 1.5, %v4269_v39  ;;  %v4453_v56 = vmul.f32 0.7978846, %v4443_v19  ;;  %v4394_v11 = vpop.f32.mrf.mxu0  ;;  %5154 = vmatmul.msk.f32.gmra.mxu0 %vm273_vm3, %v4319_v16 }
0x1385   :  { %v4395_v38 = vadd.f32 %v7654_v46, %v4394_v11 }
0x1386   :  { %v4271_v63 = vmul.f32 %v5515_v60, %v4270_v57  ;;  %5516 = vtanh.f32 %v4453_v56 }
0x1387   :  { %v4414_v54 = vmul.f32 %v4395_v38, %v4395_v38 }
0x1388   :  { %v4275_v53 = vsel %vm4274_vm9, %v5515_v60, %v4271_v63 }
0x1389   :  { %v4294_v4 = vmul.f32 %v4275_v53, %v7616_v2  ;;  %v4424_v37 = vmul.f32 %v4414_v54, %v4395_v38 }
0x138b   :  { %v4434_v49 = vmul.f32 0.044715, %v4424_v37  ;;  %v4307_v13 = vmul.f32 %v7575_v50, %v4294_v4 }
0x138c   :  { %v5517_v45 = vpop.eup %5516 }
0x138d   :  { %v4444_v22 = vadd.f32 %v4434_v49, %v4395_v38  ;;  %v4320_v51 = vadd.f32 %v7578_v41, %v4307_v13  ;;  %v4473_v18 = vadd.f32 1.0, %v5517_v45 }
0x138f   :  { %v4454_v10 = vmul.f32 0.7978846, %v4444_v22  ;;  %5155 = vmatmul.msk.f32.gmra.mxu0 %vm273_vm3, %v4320_v51  ;;  %v4483_v55 = vmul.f32 0.5, %v4473_v18 }
0x1391   :  { %5518 = vtanh.f32 %v4454_v10  ;;  %v4493_v6 = vmul.f32 %v4483_v55, %v4392_v32 }
0x1393   :  { %5170 = vmatmul.msk.f32.gmra.mxu3 %vm2785_vm2, %v4493_v6 }
0x1397   :  { %v5519_v33 = vpop.eup %5518 }
0x1398   :  { %v4474_v26 = vadd.f32 1.0, %v5519_v33 }
0x139a   :  { %v4484_v2 = vmul.f32 0.5, %v4474_v26 }
0x139c   :  { %v4494_v31 = vmul.f32 %v4484_v2, %v4395_v38 }
0x139e   :  { %5171 = vmatmul.msk.f32.gmra.mxu3 %vm2785_vm2, %v4494_v31 }
0x13b3   :  { %v4165_v25 = vpop.xlane.xlu0 %4164 }
0x13b4   :  { %v4175_v34 = vmul.f32 %v4165_v25, %v6021_v40 }
0x13b6   :  { %v4185_v48 = vadd.f32 1e-06, %v4175_v34 }
0x13b8   :  { %5520 = vrsqrt.f32 %v4185_v48  ;;  %vm4282_vm4 = vweird.f32 %v4185_v48 }
0x13be   :  { %v5521_v42 = vpop.eup %5520 }
0x13bf   :  { %v4277_v17 = vmul.f32 %v5521_v42, %v4185_v48  ;;  %vm4283_vm10 = vweird.f32 %v5521_v42 }
0x13c0   :  { %vm4284_vm13 = vmor %vm4282_vm4, %vm4283_vm10 }
0x13c1   :  { %v4278_v61 = vmul.f32 %v5521_v42, %v4277_v17 }
0x13c3   :  { %v4279_v59 = vmul.f32 0.5, %v4278_v61 }
0x13c5   :  { %v4280_v62 = vsub.f32 1.5, %v4279_v59  ;;  %v4397_v24 = vpop.f32.mrf.mxu0 }
0x13c6   :  { %v4398_v47 = vadd.f32 %v7654_v46, %v4397_v24 }
0x13c7   :  { %v4281_v1 = vmul.f32 %v5521_v42, %v4280_v62 }
0x13c8   :  { %v4415_v3 = vmul.f32 %v4398_v47, %v4398_v47 }
0x13c9   :  { %v4285_v35 = vsel %vm4284_vm13, %v5521_v42, %v4281_v1 }
0x13ca   :  { %v4295_v30 = vmul.f32 %v4285_v35, %v7635_v43  ;;  %v4425_v27 = vmul.f32 %v4415_v3, %v4398_v47 }
0x13cc   :  { %v4435_v20 = vmul.f32 0.044715, %v4425_v27  ;;  %v4308_v44 = vmul.f32 %v7575_v50, %v4295_v30 }
0x13ce   :  { %v4445_v32 = vadd.f32 %v4435_v20, %v4398_v47  ;;  %v4321_v23 = vadd.f32 %v7578_v41, %v4308_v44 }
0x13d0   :  { %v4455_v21 = vmul.f32 0.7978846, %v4445_v32  ;;  %5156 = vmatmul.msk.f32.gmra.mxu0 %vm273_vm3, %v4321_v23 }
0x13d2   :  { %5522 = vtanh.f32 %v4455_v21 }
0x13d8   :  { %v5523_v14 = vpop.eup %5522 }
0x13d9   :  { %v4475_v60 = vadd.f32 1.0, %v5523_v14 }
0x13db   :  { %v4485_v58 = vmul.f32 0.5, %v4475_v60 }
0x13dd   :  { %v4495_v8 = vmul.f32 %v4485_v58, %v4398_v47 }
0x13df   :  { %5172 = vmatmul.msk.f32.gmra.mxu3 %vm2785_vm2, %v4495_v8 }
0x13ea   :  { %v4560_v15 = vpop.f32.mrf.mxu3 }
0x13eb   :  { %v4561_v43 = vadd.f32 %v5237_v7, %v4560_v15 }
0x13ed   :  { %v4584_v29 = vadd.f32 %v4561_v43, %v7584_v28 }
0x13ef   :  { %v4592_v50 = vsel %vm273_vm3, %v4584_v29, 0.0 }
0x13f0   :  { %4593 = vadd.xlane.f32.xlu1 %v4592_v50 }
0x13f2   :  { %v4563_v5 = vpop.f32.mrf.mxu3 }
0x13f3   :  { %v4564_v41 = vadd.f32 %v5237_v7, %v4563_v5 }
0x13f5   :  { %v7689_v36 = vadd.f32 %v4564_v41, %v7591_v9 }
0x13f7   :  { %v4595_v12 = vsel %vm273_vm3, %v7689_v36, 0.0 }
0x13f8   :  { %4596 = vadd.xlane.f32.xlu2 %v4595_v12 }
0x13fa   :  { %v4566_v39 = vpop.f32.mrf.mxu3 }
0x1401   :  { %v4400_v19 = vpop.f32.mrf.mxu0 }
0x1402   :  { %v4401_v16 = vadd.f32 %v7654_v46, %v4400_v19  ;;  %v4568_v57 = vpop.f32.mrf.mxu3 }
0x1404   :  { %v4416_v56 = vmul.f32 %v4401_v16, %v4401_v16 }
0x1406   :  { %v4426_v11 = vmul.f32 %v4416_v56, %v4401_v16 }
0x1408   :  { %v4436_v28 = vmul.f32 0.044715, %v4426_v11 }
0x140a   :  { %v4446_v38 = vadd.f32 %v4436_v28, %v4401_v16 }
0x140c   :  { %v4456_v63 = vmul.f32 0.7978846, %v4446_v38  ;;  %v4403_v54 = vpop.f32.mrf.mxu0 }
0x140d   :  { %v4404_v53 = vadd.f32 %v7654_v46, %v4403_v54 }
0x140e   :  { %5524 = vtanh.f32 %v4456_v63 }
0x140f   :  { %v4417_v9 = vmul.f32 %v4404_v53, %v4404_v53 }
0x1411   :  { %v4427_v4 = vmul.f32 %v4417_v9, %v4404_v53 }
0x1413   :  { %v4437_v37 = vmul.f32 0.044715, %v4427_v4 }
0x1414   :  { %v5525_v49 = vpop.eup %5524 }
0x1415   :  { %v4447_v13 = vadd.f32 %v4437_v37, %v4404_v53  ;;  %v4476_v45 = vadd.f32 1.0, %v5525_v49 }
0x1416   :  { %v4570_v22 = vpop.f32.mrf.mxu3 }
0x1417   :  { %v4457_v51 = vmul.f32 0.7978846, %v4447_v13  ;;  %v4486_v18 = vmul.f32 0.5, %v4476_v45 }
0x1419   :  { %5526 = vtanh.f32 %v4457_v51  ;;  %v4496_v10 = vmul.f32 %v4486_v18, %v4401_v16  ;;  %v5238_v51 = vld [vmem:[%s5798_s20 + $0x1] ss:$0 sm:$0xff]  ;;  %s4703_s20 = sshll.u32 %s5612_s12, 4  ;;  %s4704_s20 = int_to_ptr.vmem [resolvable:$true] %s4703_s20 }
0x141b   :  { %5173 = vmatmul.msk.f32.gmra.mxu3 %vm2785_vm2, %v4496_v10 }
0x141f   :  { %v5527_v55 = vpop.eup %5526 }
0x1420   :  { %v4477_v6 = vadd.f32 1.0, %v5527_v55  ;;  %v5239_v55 = vld [vmem:[%s5803_s27 + $0x1] ss:$0 sm:$0xff]  ;;  %s4705_s27 = sshll.u32 %s5808_s4, 4  ;;  %s4706_s27 = int_to_ptr.hbm [resolvable:$true] %s4705_s27 }
0x1421   :  { %v4572_v33 = vpop.f32.mrf.mxu3  ;;  %s5560_s18 = sshra.s32 %s4706_s27, 4  ;;  %s5561_s18 = int_to_ptr.hbm [resolvable:$true] %s5560_s18 }
0x1422   :  { %v4573_v26 = vadd.f32 %v5237_v7, %v4572_v33  ;;  %v4487_v2 = vmul.f32 0.5, %v4477_v6  ;;  %s5562_s22 = scalar_lea.hbm %s5561_s18, 32  ;;  %p5565_p1 = scmp.lt.s32.totalorder %s5561_s18, %s5808_s4 }
0x1423   :  { %p5563_p0 = scmp.ne.s32.totalorder %s5561_s18, %s5562_s22  ;;  %p5566_p2 = scmp.lt.s32.totalorder %s5564_s23, %s5562_s22 }
0x1424   :  { %v4586_v31 = vadd.f32 %v4573_v26, %v7626_v52  ;;  %v4497_v25 = vmul.f32 %v4487_v2, %v4404_v53 }
0x1425   :  { %p5567_p3 = por %p5566_p2, %p5565_p1 }
0x1426   :  { %5174 = vmatmul.msk.f32.gmra.mxu3 %vm2785_vm2, %v4497_v25  ;;  %v4598_v34 = vsel %vm273_vm3, %v4586_v31, 0.0 }
0x1427   :  { %4599 = vadd.xlane.f32.xlu0 %v4598_v34  ;;  %p5568_p4 = pnand %p5567_p3, %p5563_p0 }
0x144d   :  { %v4406_v48 = vpop.f32.mrf.mxu0 }
0x144e   :  { %v4407_v42 = vadd.f32 %v7654_v46, %v4406_v48 }
0x1450   :  { %v4418_v17 = vmul.f32 %v4407_v42, %v4407_v42 }
0x1452   :  { %v4428_v61 = vmul.f32 %v4418_v17, %v4407_v42 }
0x1454   :  { %v4438_v59 = vmul.f32 0.044715, %v4428_v61 }
0x1456   :  { %v4448_v62 = vadd.f32 %v4438_v59, %v4407_v42 }
0x1458   :  { %v4458_v24 = vmul.f32 0.7978846, %v4448_v62 }
0x145a   :  { %5528 = vtanh.f32 %v4458_v24 }
0x1460   :  { %v5529_v47 = vpop.eup %5528 }
0x1461   :  { %v4478_v1 = vadd.f32 1.0, %v5529_v47 }
0x1462   :  { %v4575_v3 = vpop.f32.mrf.mxu3 }
0x1463   :  { %v4576_v35 = vadd.f32 %v5237_v7, %v4575_v3  ;;  %v4594_v52 = vpop.xlane.xlu1 %4593  ;;  %v4488_v30 = vmul.f32 0.5, %v4478_v1 }
0x1464   :  { %v4604_v27 = vmul.f32 %v4594_v52, %v6021_v40 }
0x1465   :  { %v4587_v20 = vadd.f32 %v4576_v35, %v7648_v0  ;;  %v4498_v44 = vmul.f32 %v4488_v30, %v4407_v42 }
0x1466   :  { %v4608_v32 = vsub.f32 %v4584_v29, %v4604_v27 }
0x1467   :  { %5175 = vmatmul.msk.f32.gmra.mxu3 %vm2785_vm2, %v4498_v44  ;;  %v4601_v46 = vsel %vm273_vm3, %v4587_v20, 0.0 }
0x1468   :  { %4602 = vadd.xlane.f32.xlu1 %v4601_v46  ;;  %v4612_v23 = vmul.f32 %v4608_v32, %v4608_v32 }
0x146a   :  { %v4616_v21 = vsel %vm273_vm3, %v4612_v23, 0.0 }
0x146b   :  { %v4597_v14 = vpop.xlane.xlu2 %4596  ;;  %4617 = vadd.xlane.f32.xlu2 %v4616_v21 }
0x146c   :  { %v4605_v60 = vmul.f32 %v4597_v14, %v6021_v40 }
0x146e   :  { %v4609_v58 = vsub.f32 %v7689_v36, %v4605_v60 }
0x1470   :  { %v4613_v8 = vmul.f32 %v4609_v58, %v4609_v58 }
0x1472   :  { %v4619_v7 = vsel %vm273_vm3, %v4613_v8, 0.0 }
0x1473   :  { %4620 = vadd.xlane.f32.xlu0 %v4619_v7 }
0x149a   :  { %v4600_v0 = vpop.xlane.xlu0 %4599 }
0x149b   :  { %v4606_v15 = vmul.f32 %v4600_v0, %v6021_v40 }
0x149d   :  { %v7709_v43 = vsub.f32 %v4586_v31, %v4606_v15 }
0x149e   :  { %v4578_v29 = vpop.f32.mrf.mxu3 }
0x149f   :  { %v4614_v50 = vmul.f32 %v7709_v43, %v7709_v43 }
0x14a1   :  { %v4622_v5 = vsel %vm273_vm3, %v4614_v50, 0.0 }
0x14a2   :  { %4623 = vadd.xlane.f32.xlu1 %v4622_v5 }
0x14a9   :  { %v4580_v41 = vpop.f32.mrf.mxu3 }
0x14db   :  { %v4603_v12 = vpop.xlane.xlu1 %4602 }
0x14dc   :  { %v4607_v36 = vmul.f32 %v4603_v12, %v6021_v40 }
0x14de   :  { %v7715_v39 = vsub.f32 %v4587_v20, %v4607_v36  ;;  %v4618_v19 = vpop.xlane.xlu2 %4617 }
0x14df   :  { %v4628_v16 = vmul.f32 %v4618_v19, %v6021_v40 }
0x14e0   :  { %v4615_v57 = vmul.f32 %v7715_v39, %v7715_v39 }
0x14e1   :  { %v4632_v56 = vadd.f32 1e-06, %v4628_v16 }
0x14e2   :  { %v4625_v11 = vsel %vm273_vm3, %v4615_v57, 0.0 }
0x14e3   :  { %5530 = vrsqrt.f32 %v4632_v56  ;;  %4626 = vadd.xlane.f32.xlu2 %v4625_v11  ;;  %vm4642_vm11 = vweird.f32 %v4632_v56 }
0x14e6   :  { %v4621_v28 = vpop.xlane.xlu0 %4620 }
0x14e7   :  { %v4629_v38 = vmul.f32 %v4621_v28, %v6021_v40 }
0x14e9   :  { %v5531_v63 = vpop.eup %5530  ;;  %v4633_v54 = vadd.f32 1e-06, %v4629_v38 }
0x14ea   :  { %v4637_v53 = vmul.f32 %v5531_v63, %v4632_v56  ;;  %v4582_v9 = vpop.f32.mrf.mxu3  ;;  %vm4643_vm2 = vweird.f32 %v5531_v63 }
0x14eb   :  { %5532 = vrsqrt.f32 %v4633_v54  ;;  %vm4644_vm12 = vmor %vm4642_vm11, %vm4643_vm2  ;;  %vm4652_vm15 = vweird.f32 %v4633_v54 }
0x14ec   :  { %v4638_v4 = vmul.f32 %v5531_v63, %v4637_v53 }
0x14ee   :  { %v4639_v37 = vmul.f32 0.5, %v4638_v4 }
0x14f0   :  { %v4640_v49 = vsub.f32 1.5, %v4639_v37 }
0x14f1   :  { %v5533_v13 = vpop.eup %5532 }
0x14f2   :  { %v4641_v45 = vmul.f32 %v5531_v63, %v4640_v49  ;;  %v4647_v22 = vmul.f32 %v5533_v13, %v4633_v54  ;;  %vm4653_vm14 = vweird.f32 %v5533_v13 }
0x14f3   :  { %vm4654_vm0 = vmor %vm4652_vm15, %vm4653_vm14 }
0x14f4   :  { %v4645_v18 = vsel %vm4644_vm12, %v5531_v63, %v4641_v45  ;;  %v4648_v10 = vmul.f32 %v5533_v13, %v4647_v22 }
0x14f5   :  { %v4676_v6 = vmul.f32 %v4645_v18, %v4608_v32 }
0x14f6   :  { %v4649_v33 = vmul.f32 0.5, %v4648_v10 }
0x14f7   :  { %v4683_v26 = vmul.f32 %v5238_v51, %v4676_v6 }
0x14f8   :  { %v4650_v2 = vsub.f32 1.5, %v4649_v33 }
0x14f9   :  { %v4690_v31 = vadd.f32 %v5239_v55, %v4683_v26 }
0x14fa   :  { %v4651_v25 = vmul.f32 %v5533_v13, %v4650_v2 }
0x14fb   :  { %4694 = vst.msk [vmem:[#allocation2] sm:$0xff] %vm273_vm3, %v4690_v31 }
0x14fc   :  { %v4655_v34 = vsel %vm4654_vm0, %v5533_v13, %v4651_v25 }
0x14fd   :  { %v4677_v48 = vmul.f32 %v4655_v34, %v4609_v58 }
0x14ff   :  { %v4684_v42 = vmul.f32 %v5238_v51, %v4677_v48 }
0x1501   :  { %v4691_v17 = vadd.f32 %v5239_v55, %v4684_v42 }
0x1503   :  { %4695 = vst.msk [vmem:[#allocation2 + $0x8] sm:$0xff] %vm273_vm3, %v4691_v17 }
0x1515   :  { %v4624_v61 = vpop.xlane.xlu1 %4623 }
0x1516   :  { %v4630_v59 = vmul.f32 %v4624_v61, %v6021_v40 }
0x1518   :  { %v4634_v62 = vadd.f32 1e-06, %v4630_v59 }
0x151a   :  { %5534 = vrsqrt.f32 %v4634_v62  ;;  %vm4662_vm5 = vweird.f32 %v4634_v62 }
0x1520   :  { %v5535_v24 = vpop.eup %5534 }
0x1521   :  { %v4657_v47 = vmul.f32 %v5535_v24, %v4634_v62  ;;  %vm4663_vm1 = vweird.f32 %v5535_v24 }
0x1522   :  { %vm4664_vm6 = vmor %vm4662_vm5, %vm4663_vm1 }
0x1523   :  { %v4658_v1 = vmul.f32 %v5535_v24, %v4657_v47 }
0x1525   :  { %v4659_v3 = vmul.f32 0.5, %v4658_v1 }
0x1527   :  { %v4660_v35 = vsub.f32 1.5, %v4659_v3 }
0x1529   :  { %v4661_v52 = vmul.f32 %v5535_v24, %v4660_v35 }
0x152b   :  { %v4665_v30 = vsel %vm4664_vm6, %v5535_v24, %v4661_v52 }
0x152c   :  { %v4678_v27 = vmul.f32 %v4665_v30, %v7709_v43 }
0x152e   :  { %v4685_v20 = vmul.f32 %v5238_v51, %v4678_v27 }
0x1530   :  { %v4692_v44 = vadd.f32 %v5239_v55, %v4685_v20 }
0x1532   :  { %4697 = vst.msk [vmem:[#allocation2 + $0x10] sm:$0xff] %vm273_vm3, %v4692_v44 }
0x1556   :  { %v4627_v32 = vpop.xlane.xlu2 %4626 }
0x1557   :  { %v4631_v46 = vmul.f32 %v4627_v32, %v6021_v40 }
0x1559   :  { %v4635_v23 = vadd.f32 1e-06, %v4631_v46 }
0x155b   :  { %5536 = vrsqrt.f32 %v4635_v23  ;;  %vm4672_vm8 = vweird.f32 %v4635_v23 }
0x1561   :  { %v5537_v21 = vpop.eup %5536 }
0x1562   :  { %v4667_v14 = vmul.f32 %v5537_v21, %v4635_v23  ;;  %vm4673_vm7 = vweird.f32 %v5537_v21 }
0x1563   :  { %vm4674_vm9 = vmor %vm4672_vm8, %vm4673_vm7 }
0x1564   :  { %v4668_v60 = vmul.f32 %v5537_v21, %v4667_v14 }
0x1566   :  { %v4669_v58 = vmul.f32 0.5, %v4668_v60 }
0x1568   :  { %v4670_v8 = vsub.f32 1.5, %v4669_v58 }
0x156a   :  { %v4671_v7 = vmul.f32 %v5537_v21, %v4670_v8 }
0x156c   :  { %v4675_v0 = vsel %vm4674_vm9, %v5537_v21, %v4671_v7 }
0x156d   :  { %v4679_v15 = vmul.f32 %v4675_v0, %v7715_v39 }
0x156f   :  { %v4686_v40 = vmul.f32 %v5238_v51, %v4679_v15 }
0x1571   :  { %v4693_v43 = vadd.f32 %v5239_v55, %v4686_v40 }
0x1573   :  { %4698 = vst.msk [vmem:[#allocation2 + $0x18] sm:$0xff] %vm273_vm3, %v4693_v43 }
0x1574   :  { %5571 = shalt.err (!%p5568_p4)
}
0x1575   :  { %s5613_s26 = smov 128   ;;  %s5614_s28 = smov 8  }
0x1576   :  { %4711 = dma.vmem_to_hbm [thread:$0]  %s4704_s20, 512, %s4706_s27, [#allocation3], %s5613_s26, %s5613_s26, %s5614_s28  }
0x1577   :  { %5572 = dma.done.wait [#allocation3], 512  }
0x1578   :  { %5573 = vsyncadd [#allocation3], 4294966784 }
0x1579   :  { %4716 = vsyncpa [#allocation3], 1 }

</bundles_post_ra>
